<compile_context>
chip_gen: v6e
topology: v6e:2x2x1
jax: 0.10.0
libtpu: 0.0.40
codegen_flags: <defaults>
</compile_context>

<pallas_src>
import jax
import jax.numpy as jnp
from jax.experimental import pallas as pl
from jax.experimental.pallas import tpu as pltpu


N_UNITS = 512          # n_units in the PyTorch module
N_LAYERS = 4           # n_layers in the PyTorch module
LEAKY_SLOPE = 0.01     # nn.LeakyReLU() default negative_slope


def _round_up(x, m):
    return ((x + m - 1) // m) * m


def _physical_vmem_bytes():
    """Per-core VMEM capacity; conservative (v7x-sized) fallback."""
    try:
        return int(pltpu.get_tpu_info().vmem_capacity_bytes)
    except Exception:
        return 64 * 1024 * 1024


def _vmem_limit_bytes(tm_eff, tk_eff, k_tiles, H, L):
    """Generation-aware scoped-VMEM limit: floor 32 MiB, cap below physical."""
    x_bytes = 2 * tm_eff * tk_eff * 2                       # double-buffered bf16 x
    w0_bytes = (1 if k_tiles == 1 else 2) * tk_eff * H * 2  # bf16 w0 block(s)
    wh_bytes = L * H * H * 2                                # single-buffered bf16
    acc_bytes = tm_eff * H * 4                              # f32 scratch
    small = (L + 2) * H * 4 + 2 * tm_eff * 4                # biases + output
    need = x_bytes + w0_bytes + wh_bytes + acc_bytes + small + (8 << 20)
    phys = _physical_vmem_bytes()
    return int(max(32 << 20, min(need, phys - (12 << 20), 100 << 20)))


# ----------------------------------------------------------------------------
# Fused MLP kernel: Linear+LeakyReLU -> 4x(Linear+Tanh) -> Linear(->1)
# ----------------------------------------------------------------------------
def _mlp_tail(h, wh_ref, bh_ref, wo_ref, bo_ref):
    """Hidden tanh stack + final Linear(H,1), on two independent row halves.

    Two independent dependency chains let the EUP tanh of one half hide under
    the MXU matmul of the other (different VLIW slots).  tanh runs in bf16
    (bf16 EUP path on v6e/v7x; outputs are in [-1, 1] so precision is fine;
    on v5e the compiler falls back to f32 internally).
    """
    half = h.shape[0] // 2                                  # static, multiple of 8
    ha = h[:half].astype(jnp.bfloat16)
    hb = h[half:].astype(jnp.bfloat16)
    for i in range(N_LAYERS):                               # short static unroll
        za = jnp.dot(ha, wh_ref[i], preferred_element_type=jnp.float32)
        zb = jnp.dot(hb, wh_ref[i], preferred_element_type=jnp.float32)
        ha = jnp.tanh((za + bh_ref[i]).astype(jnp.bfloat16))
        hb = jnp.tanh((zb + bh_ref[i]).astype(jnp.bfloat16))
    wo = wo_ref[...]                                        # (1, H) f32
    out_a = jnp.sum(ha.astype(jnp.float32) * wo, axis=-1, keepdims=True) + bo_ref[...]
    out_b = jnp.sum(hb.astype(jnp.float32) * wo, axis=-1, keepdims=True) + bo_ref[...]
    return jnp.concatenate([out_a, out_b], axis=0)


def _mlp_kernel(x_ref, w0_ref, b0_ref, wh_ref, bh_ref, wo_ref, bo_ref,
                o_ref, acc_ref):
    # x_ref : (TM, TK)  bf16      w0_ref: (TK, H) bf16    b0_ref: (1, H)  f32
    # wh_ref: (L, H, H) bf16      bh_ref: (L, 1, H) f32
    # wo_ref: (1, H)    f32       bo_ref: (1, 1)   f32
    # o_ref : (TM, 1)   f32       acc_ref: (TM, H) f32 scratch
    k = pl.program_id(1)

    @pl.when(k == 0)
    def _init():
        acc_ref[...] = jnp.zeros_like(acc_ref)

    # First Linear, K-blocked over the flattened image dim (f32 accumulate).
    acc_ref[...] += jnp.dot(x_ref[...], w0_ref[...],
                            preferred_element_type=jnp.float32)

    @pl.when(k == pl.num_programs(1) - 1)
    def _epilogue():
        h = acc_ref[...] + b0_ref[...]
        h = jnp.where(h >= 0.0, h, LEAKY_SLOPE * h)         # LeakyReLU, f32 VPU
        # TODO(synk): for very large grids a lane-dense (1, TM) output layout
        # would avoid masked vst; the absolute win is negligible at this size.
        o_ref[...] = _mlp_tail(h, wh_ref, bh_ref, wo_ref, bo_ref)


# ----------------------------------------------------------------------------
# Wrapper: (row tiles, K blocks) grid, resident single-buffered weights
# ----------------------------------------------------------------------------
def discriminator_forward(img, params, *, tm=256, tk_max=4096):
    N = img.shape[0]
    x = img.reshape(N, -1).astype(jnp.bfloat16)             # flatten + direct bf16
    inp = x.shape[1]
    H, L = N_UNITS, N_LAYERS

    # --- Row (M) tiling: multiple of 16 (bf16 sublane packing) ---
    tm = _round_up(tm, 16)
    tm_eff = min(tm, _round_up(N, 16))
    n_pad = _round_up(N, tm_eff)
    # Keep >= 2 grid steps for v7x's two TensorCores when the batch is big.
    if n_pad // tm_eff == 1 and n_pad > 256:
        tm_eff = _round_up(tm_eff // 2, 16)
        n_pad = _round_up(N, tm_eff)
    if n_pad != N:
        x = jnp.pad(x, ((0, n_pad - N), (0, 0)))

    # --- K (flattened-input) tiling for the first Linear ---
    w0 = params["w0"].astype(jnp.bfloat16)                  # (inp, H)
    if inp <= tk_max:
        tk_eff, inp_pad = inp, inp                          # single resident block
    else:
        tk_eff = tk_max                                     # multiple of 128
        inp_pad = _round_up(inp, tk_eff)
        x = jnp.pad(x, ((0, 0), (0, inp_pad - inp)))        # zero pad: no effect
        w0 = jnp.pad(w0, ((0, inp_pad - inp), (0, 0)))
    k_tiles = inp_pad // tk_eff
    m_tiles = n_pad // tm_eff

    b0 = params["b0"].reshape(1, H)
    wh = params["wh"].astype(jnp.bfloat16)                  # (L, H, H)
    bh = params["bh"].reshape(L, 1, H)
    wo = params["wo"].reshape(1, H)
    bo = params["bo"].reshape(1, 1)

    # Constant-index blocks never change across the grid -> single-buffer them.
    resident = dict(pipeline_mode=pl.Buffered(1))
    if k_tiles == 1:
        w0_spec = pl.BlockSpec((tk_eff, H), lambda i, k: (0, 0), **resident)
    else:
        w0_spec = pl.BlockSpec((tk_eff, H), lambda i, k: (k, 0))

    vmem_limit = _vmem_limit_bytes(tm_eff, tk_eff, k_tiles, H, L)

    out = pl.pallas_call(
        _mlp_kernel,
        out_shape=jax.ShapeDtypeStruct((n_pad, 1), jnp.float32),
        grid_spec=pltpu.PrefetchScalarGridSpec(
            num_scalar_prefetch=0,
            grid=(m_tiles, k_tiles),
            in_specs=[
                pl.BlockSpec((tm_eff, tk_eff), lambda i, k: (i, k)),     # x tile
                w0_spec,                                                 # w0
                pl.BlockSpec((1, H), lambda i, k: (0, 0), **resident),   # b0
                pl.BlockSpec((L, H, H), lambda i, k: (0, 0, 0), **resident),  # wh
                pl.BlockSpec((L, 1, H), lambda i, k: (0, 0, 0), **resident),  # bh
                pl.BlockSpec((1, H), lambda i, k: (0, 0), **resident),   # wo
                pl.BlockSpec((1, 1), lambda i, k: (0, 0), **resident),   # bo
            ],
            out_specs=pl.BlockSpec((tm_eff, 1), lambda i, k: (i, 0)),
            scratch_shapes=[pltpu.VMEM((tm_eff, H), jnp.float32)],
        ),
        compiler_params=pltpu.CompilerParams(
            dimension_semantics=("parallel", "arbitrary"),
            vmem_limit_bytes=vmem_limit,
        ),
    )(x, w0, b0, wh, bh, wo, bo)
    return out[:N]


# ----------------------------------------------------------------------------
# Deterministic synthetic parameters (PyTorch nn.Linear-style init)
# ----------------------------------------------------------------------------
def init_params(key, inp_shape):
    if isinstance(inp_shape, tuple) and len(inp_shape) > 1:   # tag == 1 path
        inp = 1
        for d in inp_shape:
            inp *= int(d)
    else:
        inp = int(inp_shape)
    H, L = N_UNITS, N_LAYERS
    keys = jax.random.split(key, L + 2)

    def linear(k, fan_in, fan_out):
        kw, kb = jax.random.split(k)
        bound = 1.0 / (fan_in ** 0.5)
        w = jax.random.uniform(kw, (fan_in, fan_out), jnp.float32, -bound, bound)
        b = jax.random.uniform(kb, (fan_out,), jnp.float32, -bound, bound)
        return w, b

    w0, b0 = linear(keys[0], inp, H)
    whs, bhs = [], []
    for i in range(L):
        w, b = linear(keys[1 + i], H, H)
        whs.append(w)
        bhs.append(b)
    wo, bo = linear(keys[-1], H, 1)
    return dict(w0=w0, b0=b0,
                wh=jnp.stack(whs), bh=jnp.stack(bhs),
                wo=wo.reshape(H), bo=bo.reshape(1))


# Pure-JAX f32 reference (for validation only).
def discriminator_forward_ref(img, params):
    N = img.shape[0]
    h = img.reshape(N, -1).astype(jnp.float32) @ params["w0"] + params["b0"]
    h = jnp.where(h >= 0.0, h, LEAKY_SLOPE * h)
    for i in range(N_LAYERS):
        h = jnp.tanh(h @ params["wh"][i] + params["bh"][i])
    return h @ params["wo"].reshape(-1, 1) + params["bo"].reshape(1, 1)


if __name__ == "__main__":
    channels, img_size, batch = 4, 16, 2
    inp_shape = (channels, img_size, img_size)

    key = jax.random.PRNGKey(0)
    k_params, k_img = jax.random.split(key)
    params = init_params(k_params, inp_shape)
    img = jax.random.normal(k_img, (batch,) + inp_shape, jnp.float32)

    fwd = jax.jit(lambda im: discriminator_forward(im, params))
    validity = jax.block_until_ready(fwd(img))

    assert validity.shape == (batch, 1)
    assert bool(jnp.all(jnp.isfinite(validity)))

    # Relaxed tolerance: bf16 MXU operands + bf16 tanh, f32 accumulation.
    ref = discriminator_forward_ref(img, params)
    assert bool(jnp.allclose(validity, ref, atol=5e-2, rtol=5e-2))

    print("KERNEL_OK")
</pallas_src>

<mosaic_0001>
module attributes {stable_mosaic.version = 11 : i64} {
  func.func @_mlp_kernel(%arg0: i32, %arg1: i32, %arg2: memref<16x1024xbf16, #tpu.memory_space<vmem>>, %arg3: memref<1024x512xbf16, #tpu.memory_space<vmem>>, %arg4: memref<1x512xf32, #tpu.memory_space<vmem>>, %arg5: memref<4x512x512xbf16, #tpu.memory_space<vmem>>, %arg6: memref<4x1x512xf32, #tpu.memory_space<vmem>>, %arg7: memref<1x512xf32, #tpu.memory_space<vmem>>, %arg8: memref<1x1xf32, #tpu.memory_space<vmem>>, %arg9: memref<16x1xf32, #tpu.memory_space<vmem>>, %arg10: memref<16x512xf32, #tpu.memory_space<vmem>>) attributes {dimension_semantics = [#tpu.dimension_semantics<parallel>, #tpu.dimension_semantics<arbitrary>], iteration_bounds = array<i64: 1, 1>, scalar_prefetch = 0 : i64, scratch_operands = 1 : i64, tpu.core_type = #tpu.core_type<tc>, window_params = [{transform_indices = @transform_0, window_bounds = array<i64: 16, 1024>}, {pipeline_mode = #tpu.pipeline_mode<synchronous>, transform_indices = @transform_1, window_bounds = array<i64: 1024, 512>}, {pipeline_mode = #tpu.pipeline_mode<synchronous>, transform_indices = @transform_2, window_bounds = array<i64: 1, 512>}, {pipeline_mode = #tpu.pipeline_mode<synchronous>, transform_indices = @transform_3, window_bounds = array<i64: 4, 512, 512>}, {pipeline_mode = #tpu.pipeline_mode<synchronous>, transform_indices = @transform_4, window_bounds = array<i64: 4, 1, 512>}, {pipeline_mode = #tpu.pipeline_mode<synchronous>, transform_indices = @transform_5, window_bounds = array<i64: 1, 512>}, {pipeline_mode = #tpu.pipeline_mode<synchronous>, transform_indices = @transform_6, window_bounds = array<i64: 1, 1>}, {transform_indices = @transform_7, window_bounds = array<i64: 16, 1>}]} {
    %c0_i32 = arith.constant 0 : i32
    %0 = arith.cmpi eq, %arg1, %c0_i32 : i32
    %1 = arith.extui %0 : i1 to i32
    %c0_i32_0 = arith.constant 0 : i32
    %2 = arith.cmpi ne, %1, %c0_i32_0 : i32
    scf.if %2 {
      %cst_10 = arith.constant 0.000000e+00 : f32
      %12 = vector.broadcast %cst_10 : f32 to vector<16x512xf32>
      %c0_11 = arith.constant 0 : index
      %c0_12 = arith.constant 0 : index
      %13 = vector.load %arg10[%c0_11, %c0_12] : memref<16x512xf32, #tpu.memory_space<vmem>>, vector<16x512xf32>
      tpu.vector_store %arg10[%c0_11, %c0_12], %12 {strides = array<i32>} : memref<16x512xf32, #tpu.memory_space<vmem>>, vector<16x512xf32>,
    } else {
    }
    %c0 = arith.constant 0 : index
    %c0_1 = arith.constant 0 : index
    %3 = vector.load %arg10[%c0, %c0_1] : memref<16x512xf32, #tpu.memory_space<vmem>>, vector<16x512xf32>
    %c0_2 = arith.constant 0 : index
    %c0_3 = arith.constant 0 : index
    %4 = vector.load %arg2[%c0_2, %c0_3] : memref<16x1024xbf16, #tpu.memory_space<vmem>>, vector<16x1024xbf16>
    %c0_4 = arith.constant 0 : index
    %c0_5 = arith.constant 0 : index
    %5 = vector.load %arg3[%c0_4, %c0_5] : memref<1024x512xbf16, #tpu.memory_space<vmem>>, vector<1024x512xbf16>
    %cst = arith.constant dense<0.000000e+00> : vector<16x512xf32>
    %6 = tpu.matmul %4, %5, %cst {dimension_numbers = #tpu.dot_dimension_numbers<[1], [0], [0], [1], [0, 0, 1, 1], [], []>} : vector<16x1024xbf16>, vector<1024x512xbf16>, vector<16x512xf32> -> vector<16x512xf32>
    %7 = arith.addf %3, %6 : vector<16x512xf32>
    %c0_6 = arith.constant 0 : index
    %c0_7 = arith.constant 0 : index
    %8 = vector.load %arg10[%c0_6, %c0_7] : memref<16x512xf32, #tpu.memory_space<vmem>>, vector<16x512xf32>
    tpu.vector_store %arg10[%c0_6, %c0_7], %7 {strides = array<i32>} : memref<16x512xf32, #tpu.memory_space<vmem>>, vector<16x512xf32>,
    %c0_i32_8 = arith.constant 0 : i32
    %9 = arith.cmpi eq, %arg1, %c0_i32_8 : i32
    %10 = arith.extui %9 : i1 to i32
    %c0_i32_9 = arith.constant 0 : i32
    %11 = arith.cmpi ne, %10, %c0_i32_9 : i32
    scf.if %11 {
      %c0_10 = arith.constant 0 : index
      %c0_11 = arith.constant 0 : index
      %12 = vector.load %arg10[%c0_10, %c0_11] : memref<16x512xf32, #tpu.memory_space<vmem>>, vector<16x512xf32>
      %c0_12 = arith.constant 0 : index
      %c0_13 = arith.constant 0 : index
      %13 = vector.load %arg4[%c0_12, %c0_13] : memref<1x512xf32, #tpu.memory_space<vmem>>, vector<1x512xf32>
      %14 = vector.broadcast %13 : vector<1x512xf32> to vector<16x512xf32>
      %15 = arith.addf %12, %14 : vector<16x512xf32>
      %cst_14 = arith.constant 0.000000e+00 : f32
      %16 = vector.broadcast %cst_14 : f32 to vector<16x512xf32>
      %17 = arith.cmpf oge, %15, %16 : vector<16x512xf32>
      %cst_15 = arith.constant 0.00999999977 : f32
      %18 = vector.broadcast %cst_15 : f32 to vector<16x512xf32>
      %19 = arith.mulf %18, %15 : vector<16x512xf32>
      %20 = arith.select %17, %15, %19 : vector<16x512xi1>, vector<16x512xf32>
      %21 = vector.extract_strided_slice %20 {offsets = [0, 0], sizes = [8, 512], strides = [1, 1]} : vector<16x512xf32> to vector<8x512xf32>
      %22 = arith.truncf %21 : vector<8x512xf32> to vector<8x512xbf16>
      %23 = vector.extract_strided_slice %20 {offsets = [8, 0], sizes = [8, 512], strides = [1, 1]} : vector<16x512xf32> to vector<8x512xf32>
      %24 = arith.truncf %23 : vector<8x512xf32> to vector<8x512xbf16>
      %c0_16 = arith.constant 0 : index
      %c0_17 = arith.constant 0 : index
      %c0_18 = arith.constant 0 : index
      %25 = vector.load %arg5[%c0_16, %c0_17, %c0_18] : memref<4x512x512xbf16, #tpu.memory_space<vmem>>, vector<1x512x512xbf16>
      %26 = vector.shape_cast %25 : vector<1x512x512xbf16> to vector<512x512xbf16>
      %cst_19 = arith.constant dense<0.000000e+00> : vector<8x512xf32>
      %27 = tpu.matmul %22, %26, %cst_19 {dimension_numbers = #tpu.dot_dimension_numbers<[1], [0], [0], [1], [0, 0, 1, 1], [], []>} : vector<8x512xbf16>, vector<512x512xbf16>, vector<8x512xf32> -> vector<8x512xf32>
      %c0_20 = arith.constant 0 : index
      %c0_21 = arith.constant 0 : index
      %c0_22 = arith.constant 0 : index
      %28 = vector.load %arg5[%c0_20, %c0_21, %c0_22] : memref<4x512x512xbf16, #tpu.memory_space<vmem>>, vector<1x512x512xbf16>
      %29 = vector.shape_cast %28 : vector<1x512x512xbf16> to vector<512x512xbf16>
      %cst_23 = arith.constant dense<0.000000e+00> : vector<8x512xf32>
      %30 = tpu.matmul %24, %29, %cst_23 {dimension_numbers = #tpu.dot_dimension_numbers<[1], [0], [0], [1], [0, 0, 1, 1], [], []>} : vector<8x512xbf16>, vector<512x512xbf16>, vector<8x512xf32> -> vector<8x512xf32>
      %c0_24 = arith.constant 0 : index
      %c0_25 = arith.constant 0 : index
      %c0_26 = arith.constant 0 : index
      %31 = vector.load %arg6[%c0_24, %c0_25, %c0_26] : memref<4x1x512xf32, #tpu.memory_space<vmem>>, vector<1x1x512xf32>
      %32 = vector.shape_cast %31 : vector<1x1x512xf32> to vector<1x512xf32>
      %33 = vector.broadcast %32 : vector<1x512xf32> to vector<8x512xf32>
      %34 = arith.addf %27, %33 : vector<8x512xf32>
      %35 = arith.truncf %34 : vector<8x512xf32> to vector<8x512xbf16>
      %36 = math.tanh %35 : vector<8x512xbf16>
      %c0_27 = arith.constant 0 : index
      %c0_28 = arith.constant 0 : index
      %c0_29 = arith.constant 0 : index
      %37 = vector.load %arg6[%c0_27, %c0_28, %c0_29] : memref<4x1x512xf32, #tpu.memory_space<vmem>>, vector<1x1x512xf32>
      %38 = vector.shape_cast %37 : vector<1x1x512xf32> to vector<1x512xf32>
      %39 = vector.broadcast %38 : vector<1x512xf32> to vector<8x512xf32>
      %40 = arith.addf %30, %39 : vector<8x512xf32>
      %41 = arith.truncf %40 : vector<8x512xf32> to vector<8x512xbf16>
      %42 = math.tanh %41 : vector<8x512xbf16>
      %c1 = arith.constant 1 : index
      %c0_30 = arith.constant 0 : index
      %c0_31 = arith.constant 0 : index
      %43 = vector.load %arg5[%c1, %c0_30, %c0_31] : memref<4x512x512xbf16, #tpu.memory_space<vmem>>, vector<1x512x512xbf16>
      %44 = vector.shape_cast %43 : vector<1x512x512xbf16> to vector<512x512xbf16>
      %cst_32 = arith.constant dense<0.000000e+00> : vector<8x512xf32>
      %45 = tpu.matmul %36, %44, %cst_32 {dimension_numbers = #tpu.dot_dimension_numbers<[1], [0], [0], [1], [0, 0, 1, 1], [], []>} : vector<8x512xbf16>, vector<512x512xbf16>, vector<8x512xf32> -> vector<8x512xf32>
      %c1_33 = arith.constant 1 : index
      %c0_34 = arith.constant 0 : index
      %c0_35 = arith.constant 0 : index
      %46 = vector.load %arg5[%c1_33, %c0_34, %c0_35] : memref<4x512x512xbf16, #tpu.memory_space<vmem>>, vector<1x512x512xbf16>
      %47 = vector.shape_cast %46 : vector<1x512x512xbf16> to vector<512x512xbf16>
      %cst_36 = arith.constant dense<0.000000e+00> : vector<8x512xf32>
      %48 = tpu.matmul %42, %47, %cst_36 {dimension_numbers = #tpu.dot_dimension_numbers<[1], [0], [0], [1], [0, 0, 1, 1], [], []>} : vector<8x512xbf16>, vector<512x512xbf16>, vector<8x512xf32> -> vector<8x512xf32>
      %c1_37 = arith.constant 1 : index
      %c0_38 = arith.constant 0 : index
      %c0_39 = arith.constant 0 : index
      %49 = vector.load %arg6[%c1_37, %c0_38, %c0_39] : memref<4x1x512xf32, #tpu.memory_space<vmem>>, vector<1x1x512xf32>
      %50 = vector.shape_cast %49 : vector<1x1x512xf32> to vector<1x512xf32>
      %51 = vector.broadcast %50 : vector<1x512xf32> to vector<8x512xf32>
      %52 = arith.addf %45, %51 : vector<8x512xf32>
      %53 = arith.truncf %52 : vector<8x512xf32> to vector<8x512xbf16>
      %54 = math.tanh %53 : vector<8x512xbf16>
      %c1_40 = arith.constant 1 : index
      %c0_41 = arith.constant 0 : index
      %c0_42 = arith.constant 0 : index
      %55 = vector.load %arg6[%c1_40, %c0_41, %c0_42] : memref<4x1x512xf32, #tpu.memory_space<vmem>>, vector<1x1x512xf32>
      %56 = vector.shape_cast %55 : vector<1x1x512xf32> to vector<1x512xf32>
      %57 = vector.broadcast %56 : vector<1x512xf32> to vector<8x512xf32>
      %58 = arith.addf %48, %57 : vector<8x512xf32>
      %59 = arith.truncf %58 : vector<8x512xf32> to vector<8x512xbf16>
      %60 = math.tanh %59 : vector<8x512xbf16>
      %c2 = arith.constant 2 : index
      %c0_43 = arith.constant 0 : index
      %c0_44 = arith.constant 0 : index
      %61 = vector.load %arg5[%c2, %c0_43, %c0_44] : memref<4x512x512xbf16, #tpu.memory_space<vmem>>, vector<1x512x512xbf16>
      %62 = vector.shape_cast %61 : vector<1x512x512xbf16> to vector<512x512xbf16>
      %cst_45 = arith.constant dense<0.000000e+00> : vector<8x512xf32>
      %63 = tpu.matmul %54, %62, %cst_45 {dimension_numbers = #tpu.dot_dimension_numbers<[1], [0], [0], [1], [0, 0, 1, 1], [], []>} : vector<8x512xbf16>, vector<512x512xbf16>, vector<8x512xf32> -> vector<8x512xf32>
      %c2_46 = arith.constant 2 : index
      %c0_47 = arith.constant 0 : index
      %c0_48 = arith.constant 0 : index
      %64 = vector.load %arg5[%c2_46, %c0_47, %c0_48] : memref<4x512x512xbf16, #tpu.memory_space<vmem>>, vector<1x512x512xbf16>
      %65 = vector.shape_cast %64 : vector<1x512x512xbf16> to vector<512x512xbf16>
      %cst_49 = arith.constant dense<0.000000e+00> : vector<8x512xf32>
      %66 = tpu.matmul %60, %65, %cst_49 {dimension_numbers = #tpu.dot_dimension_numbers<[1], [0], [0], [1], [0, 0, 1, 1], [], []>} : vector<8x512xbf16>, vector<512x512xbf16>, vector<8x512xf32> -> vector<8x512xf32>
      %c2_50 = arith.constant 2 : index
      %c0_51 = arith.constant 0 : index
      %c0_52 = arith.constant 0 : index
      %67 = vector.load %arg6[%c2_50, %c0_51, %c0_52] : memref<4x1x512xf32, #tpu.memory_space<vmem>>, vector<1x1x512xf32>
      %68 = vector.shape_cast %67 : vector<1x1x512xf32> to vector<1x512xf32>
      %69 = vector.broadcast %68 : vector<1x512xf32> to vector<8x512xf32>
      %70 = arith.addf %63, %69 : vector<8x512xf32>
      %71 = arith.truncf %70 : vector<8x512xf32> to vector<8x512xbf16>
      %72 = math.tanh %71 : vector<8x512xbf16>
      %c2_53 = arith.constant 2 : index
      %c0_54 = arith.constant 0 : index
      %c0_55 = arith.constant 0 : index
      %73 = vector.load %arg6[%c2_53, %c0_54, %c0_55] : memref<4x1x512xf32, #tpu.memory_space<vmem>>, vector<1x1x512xf32>
      %74 = vector.shape_cast %73 : vector<1x1x512xf32> to vector<1x512xf32>
      %75 = vector.broadcast %74 : vector<1x512xf32> to vector<8x512xf32>
      %76 = arith.addf %66, %75 : vector<8x512xf32>
      %77 = arith.truncf %76 : vector<8x512xf32> to vector<8x512xbf16>
      %78 = math.tanh %77 : vector<8x512xbf16>
      %c3 = arith.constant 3 : index
      %c0_56 = arith.constant 0 : index
      %c0_57 = arith.constant 0 : index
      %79 = vector.load %arg5[%c3, %c0_56, %c0_57] : memref<4x512x512xbf16, #tpu.memory_space<vmem>>, vector<1x512x512xbf16>
      %80 = vector.shape_cast %79 : vector<1x512x512xbf16> to vector<512x512xbf16>
      %cst_58 = arith.constant dense<0.000000e+00> : vector<8x512xf32>
      %81 = tpu.matmul %72, %80, %cst_58 {dimension_numbers = #tpu.dot_dimension_numbers<[1], [0], [0], [1], [0, 0, 1, 1], [], []>} : vector<8x512xbf16>, vector<512x512xbf16>, vector<8x512xf32> -> vector<8x512xf32>
      %c3_59 = arith.constant 3 : index
      %c0_60 = arith.constant 0 : index
      %c0_61 = arith.constant 0 : index
      %82 = vector.load %arg5[%c3_59, %c0_60, %c0_61] : memref<4x512x512xbf16, #tpu.memory_space<vmem>>, vector<1x512x512xbf16>
      %83 = vector.shape_cast %82 : vector<1x512x512xbf16> to vector<512x512xbf16>
      %cst_62 = arith.constant dense<0.000000e+00> : vector<8x512xf32>
      %84 = tpu.matmul %78, %83, %cst_62 {dimension_numbers = #tpu.dot_dimension_numbers<[1], [0], [0], [1], [0, 0, 1, 1], [], []>} : vector<8x512xbf16>, vector<512x512xbf16>, vector<8x512xf32> -> vector<8x512xf32>
      %c3_63 = arith.constant 3 : index
      %c0_64 = arith.constant 0 : index
      %c0_65 = arith.constant 0 : index
      %85 = vector.load %arg6[%c3_63, %c0_64, %c0_65] : memref<4x1x512xf32, #tpu.memory_space<vmem>>, vector<1x1x512xf32>
      %86 = vector.shape_cast %85 : vector<1x1x512xf32> to vector<1x512xf32>
      %87 = vector.broadcast %86 : vector<1x512xf32> to vector<8x512xf32>
      %88 = arith.addf %81, %87 : vector<8x512xf32>
      %89 = arith.truncf %88 : vector<8x512xf32> to vector<8x512xbf16>
      %90 = math.tanh %89 : vector<8x512xbf16>
      %c3_66 = arith.constant 3 : index
      %c0_67 = arith.constant 0 : index
      %c0_68 = arith.constant 0 : index
      %91 = vector.load %arg6[%c3_66, %c0_67, %c0_68] : memref<4x1x512xf32, #tpu.memory_space<vmem>>, vector<1x1x512xf32>
      %92 = vector.shape_cast %91 : vector<1x1x512xf32> to vector<1x512xf32>
      %93 = vector.broadcast %92 : vector<1x512xf32> to vector<8x512xf32>
      %94 = arith.addf %84, %93 : vector<8x512xf32>
      %95 = arith.truncf %94 : vector<8x512xf32> to vector<8x512xbf16>
      %96 = math.tanh %95 : vector<8x512xbf16>
      %c0_69 = arith.constant 0 : index
      %c0_70 = arith.constant 0 : index
      %97 = vector.load %arg7[%c0_69, %c0_70] : memref<1x512xf32, #tpu.memory_space<vmem>>, vector<1x512xf32>
      %98 = arith.extf %90 : vector<8x512xbf16> to vector<8x512xf32>
      %99 = vector.broadcast %97 : vector<1x512xf32> to vector<8x512xf32>
      %100 = arith.mulf %98, %99 : vector<8x512xf32>
      %cst_71 = arith.constant dense<0.000000e+00> : vector<8xf32>
      %101 = vector.multi_reduction <add>, %100, %cst_71 [1] : vector<8x512xf32> to vector<8xf32>
      %102 = vector.shape_cast %101 : vector<8xf32> to vector<8x1xf32>
      %c0_72 = arith.constant 0 : index
      %c0_73 = arith.constant 0 : index
      %103 = vector.load %arg8[%c0_72, %c0_73] : memref<1x1xf32, #tpu.memory_space<vmem>>, vector<1x1xf32>
      %104 = vector.broadcast %103 : vector<1x1xf32> to vector<8x1xf32>
      %105 = arith.addf %102, %104 : vector<8x1xf32>
      %106 = arith.extf %96 : vector<8x512xbf16> to vector<8x512xf32>
      %107 = vector.broadcast %97 : vector<1x512xf32> to vector<8x512xf32>
      %108 = arith.mulf %106, %107 : vector<8x512xf32>
      %cst_74 = arith.constant dense<0.000000e+00> : vector<8xf32>
      %109 = vector.multi_reduction <add>, %108, %cst_74 [1] : vector<8x512xf32> to vector<8xf32>
      %110 = vector.shape_cast %109 : vector<8xf32> to vector<8x1xf32>
      %c0_75 = arith.constant 0 : index
      %c0_76 = arith.constant 0 : index
      %111 = vector.load %arg8[%c0_75, %c0_76] : memref<1x1xf32, #tpu.memory_space<vmem>>, vector<1x1xf32>
      %112 = vector.broadcast %111 : vector<1x1xf32> to vector<8x1xf32>
      %113 = arith.addf %110, %112 : vector<8x1xf32>
      %114 = tpu.concatenate %105, %113 in 0 : vector<8x1xf32>, vector<8x1xf32> -> vector<16x1xf32>
      %c0_77 = arith.constant 0 : index
      %c0_78 = arith.constant 0 : index
      %115 = vector.load %arg9[%c0_77, %c0_78] : memref<16x1xf32, #tpu.memory_space<vmem>>, vector<16x1xf32>
      tpu.vector_store %arg9[%c0_77, %c0_78], %114 {strides = array<i32>} : memref<16x1xf32, #tpu.memory_space<vmem>>, vector<16x1xf32>,
    } else {
    }
    return
  }
  func.func @transform_0(%arg0: i32, %arg1: i32) -> (i32, i32) {
    %c0_i32 = arith.constant 0 : i32
    return %arg0, %arg1 : i32, i32
  }
  func.func @transform_1(%arg0: i32, %arg1: i32) -> (i32, i32) {
    %c0_i32 = arith.constant 0 : i32
    %c0_i32_0 = arith.constant 0 : i32
    %c0_i32_1 = arith.constant 0 : i32
    return %c0_i32, %c0_i32_0 : i32, i32
  }
  func.func @transform_2(%arg0: i32, %arg1: i32) -> (i32, i32) {
    %c0_i32 = arith.constant 0 : i32
    %c0_i32_0 = arith.constant 0 : i32
    %c0_i32_1 = arith.constant 0 : i32
    return %c0_i32, %c0_i32_0 : i32, i32
  }
  func.func @transform_3(%arg0: i32, %arg1: i32) -> (i32, i32, i32) {
    %c0_i32 = arith.constant 0 : i32
    %c0_i32_0 = arith.constant 0 : i32
    %c0_i32_1 = arith.constant 0 : i32
    %c0_i32_2 = arith.constant 0 : i32
    return %c0_i32, %c0_i32_0, %c0_i32_1 : i32, i32, i32
  }
  func.func @transform_4(%arg0: i32, %arg1: i32) -> (i32, i32, i32) {
    %c0_i32 = arith.constant 0 : i32
    %c0_i32_0 = arith.constant 0 : i32
    %c0_i32_1 = arith.constant 0 : i32
    %c0_i32_2 = arith.constant 0 : i32
    return %c0_i32, %c0_i32_0, %c0_i32_1 : i32, i32, i32
  }
  func.func @transform_5(%arg0: i32, %arg1: i32) -> (i32, i32) {
    %c0_i32 = arith.constant 0 : i32
    %c0_i32_0 = arith.constant 0 : i32
    %c0_i32_1 = arith.constant 0 : i32
    return %c0_i32, %c0_i32_0 : i32, i32
  }
  func.func @transform_6(%arg0: i32, %arg1: i32) -> (i32, i32) {
    %c0_i32 = arith.constant 0 : i32
    %c0_i32_0 = arith.constant 0 : i32
    %c0_i32_1 = arith.constant 0 : i32
    return %c0_i32, %c0_i32_0 : i32, i32
  }
  func.func @transform_7(%arg0: i32, %arg1: i32) -> (i32, i32) {
    %c0_i32 = arith.constant 0 : i32
    %c0_i32_0 = arith.constant 0 : i32
    return %arg0, %c0_i32 : i32, i32
  }
}

</mosaic_0001>

<bundles_post_ra>
// kernel: _lambda_.1
= control target key start
LH: loop header
LB: loop body
LE: loop exit
PB: predicated region body
PF: predicated region fallthrough
CT: control target
= control target key end

     0   :  { %s11215_s0 = inlined_call_operand.vmem [shape: bf16[16,1024], index: 0, kind: input, shape index: {}]   ;;  %s11216_s1 = inlined_call_operand.hbm [shape: bf16[1024,512], index: 1, kind: input, shape index: {}]   ;;  %s11217_s2 = inlined_call_operand.hbm [shape: f32[1,512], index: 2, kind: input, shape index: {}]   ;;  %s11218_s3 = inlined_call_operand.hbm [shape: bf16[4,512,512], index: 3, kind: input, shape index: {}]   ;;  %s11219_s4 = inlined_call_operand.hbm [shape: f32[4,1,512], index: 4, kind: input, shape index: {}]   ;;  %s11220_s5 = inlined_call_operand.hbm [shape: f32[1,512], index: 5, kind: input, shape index: {}]   ;;  %s11221_s6 = inlined_call_operand.<no memory space> [shape: f32[1,1], index: 6, kind: input, shape index: {}]   ;;  %s11222_s7 = inlined_call_operand.vmem [shape: f32[16,1], index: 7, kind: output, shape index: {}]  }
   0x1   :  { %v12_v0 = vstv %s11221_s6 }
   0x2   :  { %13 = vst [vmem:[#allocation3] sm:$0x1] %v12_v0 }
   0x3   :  { %14 = vsyncpa [#allocation5], 0 }
   0x4   :  { %15 = vsyncpa [#allocation7], 0 }
   0x5   :  { %16 = vsyncpa [#allocation10], 0  ;;  %s8888_s26 = smov [#allocation6]   ;;  %s8889_s28 = smov [#allocation9]  }
   0x6   :  { %s37_s27 = sshll.u32 %s8888_s26, 4  ;;  %s58_s29 = sshll.u32 %s8889_s28, 4  ;;  %s38_s27 = int_to_ptr.vmem [resolvable:$true] %s37_s27  ;;  %s59_s29 = int_to_ptr.vmem [resolvable:$true] %s58_s29 }
   0x7   :  { %s8790_s30 = scalar_lea.vmem %s38_s27, 64  ;;  %p8795_p1 = scmp.lt.s32.totalorder %s38_s27, %s38_s27 }
   0x8   :  { %p8791_p0 = scmp.ne.s32.totalorder %s38_s27, %s8790_s30  ;;  %p8796_p2 = scmp.lt.s32.totalorder %s8790_s30, %s8790_s30 }
   0xa   :  { %p8797_p3 = por %p8796_p2, %p8795_p1 }
   0xc   :  { %p8798_p4 = pnand %p8797_p3, %p8791_p0 }
   0xe   :  { %8801 = shalt.err (!%p8798_p4)
}
   0xf   :  { %40 = dma.hbm_to_vmem [thread:$0]  %s11217_s2, 64, %s38_s27, [#allocation7]  }
  0x10   :  { %s8810_s6 = scalar_lea.vmem %s59_s29, 256  ;;  %p8815_p6 = scmp.lt.s32.totalorder %s59_s29, %s59_s29 }
  0x11   :  { %p8811_p5 = scmp.ne.s32.totalorder %s59_s29, %s8810_s6  ;;  %p8816_p7 = scmp.lt.s32.totalorder %s8810_s6, %s8810_s6 }
  0x13   :  { %p8817_p8 = por %p8816_p7, %p8815_p6 }
  0x15   :  { %p8818_p9 = pnand %p8817_p8, %p8811_p5 }
  0x17   :  { %8821 = shalt.err (!%p8818_p9)
}
  0x18   :  { %s8890_s10 = smov 64   ;;  %s8891_s11 = smov 4  }
  0x19   :  { %64 = dma.hbm_to_vmem [thread:$0]  %s11219_s4, 256, %s59_s29, [#allocation10], %s8890_s10, %s8890_s10, %s8891_s11  }
  0x1a   :  { %s8892_s14 = smov [#allocation4]  }
  0x1b   :  { %s24_s15 = sshll.u32 %s8892_s14, 4  ;;  %s25_s15 = int_to_ptr.vmem [resolvable:$true] %s24_s15 }
  0x1c   :  { %s8830_s16 = scalar_lea.vmem %s25_s15, 32768  ;;  %p8835_p11 = scmp.lt.s32.totalorder %s25_s15, %s25_s15 }
  0x1d   :  { %p8831_p10 = scmp.ne.s32.totalorder %s25_s15, %s8830_s16  ;;  %p8836_p12 = scmp.lt.s32.totalorder %s8830_s16, %s8830_s16 }
  0x1f   :  { %p8837_p13 = por %p8836_p12, %p8835_p11 }
  0x21   :  { %p8838_p0 = pnand %p8837_p13, %p8831_p10 }
  0x23   :  { %8841 = shalt.err (!%p8838_p0)
}
  0x24   :  { %s8893_s2 = smov 256   ;;  %s8894_s17 = smov 16  }
  0x25   :  { %30 = dma.hbm_to_vmem [thread:$0]  %s11216_s1, 32768, %s25_s15, [#allocation5], %s8893_s2, %s8893_s2, %s8894_s17  }
  0x26   :  { %s8895_s20 = smov [#allocation8]   ;;  %s8896_s4 = smov [#allocation11]  }
  0x27   :  { %s46_s21 = sshll.u32 %s8895_s20, 4  ;;  %s71_s22 = sshll.u32 %s8896_s4, 4  ;;  %s47_s21 = int_to_ptr.vmem [resolvable:$true] %s46_s21  ;;  %s72_s22 = int_to_ptr.vmem [resolvable:$true] %s71_s22 }
  0x28   :  { %s8850_s23 = scalar_lea.vmem %s47_s21, 65536  ;;  %p8855_p2 = scmp.lt.s32.totalorder %s47_s21, %s47_s21 }
  0x29   :  { %p8851_p1 = scmp.ne.s32.totalorder %s47_s21, %s8850_s23  ;;  %p8856_p3 = scmp.lt.s32.totalorder %s8850_s23, %s8850_s23 }
  0x2b   :  { %p8857_p4 = por %p8856_p3, %p8855_p2 }
  0x2d   :  { %p8858_p5 = pnand %p8857_p4, %p8851_p1 }
  0x2f   :  { %8861 = shalt.err (!%p8858_p5)
}
  0x30   :  { %52 = dma.hbm_to_vmem [thread:$0]  %s11218_s3, 65536, %s47_s21, [#allocation7], %s8893_s2, %s8893_s2, %s8894_s17  }
  0x31   :  { %s8870_s26 = scalar_lea.vmem %s72_s22, 64  ;;  %p8875_p7 = scmp.lt.s32.totalorder %s72_s22, %s72_s22 }
  0x32   :  { %p8871_p6 = scmp.ne.s32.totalorder %s72_s22, %s8870_s26  ;;  %p8876_p8 = scmp.lt.s32.totalorder %s8870_s26, %s8870_s26 }
  0x34   :  { %p8877_p9 = por %p8876_p8, %p8875_p7 }
  0x36   :  { %p8878_p10 = pnand %p8877_p9, %p8871_p6 }
  0x38   :  { %8881 = shalt.err (!%p8878_p10)
}
  0x39   :  { %74 = dma.hbm_to_vmem [thread:$0]  %s11220_s5, 64, %s72_s22, [#allocation10]  }
  0x3a   :  { %8882 = dma.done.wait [#allocation5], 32768  }
  0x3b   :  { %8883 = vsyncadd [#allocation5], 4294934528 }
  0x3c   :  { %8884 = dma.done.wait [#allocation7], 65600  }
  0x3d   :  { %8885 = vsyncadd [#allocation7], 4294901696 }
  0x3e   :  { %8886 = dma.done.wait [#allocation10], 320  }
  0x3f   :  { %8887 = vsyncadd [#allocation10], 4294966976  ;;  %v7524_v1 = vld [vmem:[#allocation4 + $0xe4] ss:$16 sps:$4 sm:$0xff]   ;;  %v7528_v3 = vld [vmem:[#allocation4 + $0xe0] ss:$16 sps:$4 sm:$0xff]  }
  0x40   :  { %v7526_v2 = vld [vmem:[#allocation4 + $0x2e4] ss:$16 sps:$4 sm:$0xff]   ;;  %1696 = vmatprep.subr.bf16.mxu0 %v7524_v1  ;;  %v7529_v4 = vld [vmem:[#allocation4 + $0x2e0] ss:$16 sps:$4 sm:$0xff]   ;;  %vm6728_vm8 = vcmask 7168  }
  0x41   :  { %1739 = vmatprep.subr.bf16.mxu1 %v7526_v2  ;;  %v7530_v5 = vld [vmem:[#allocation4 + $0xc4] ss:$16 sps:$4 sm:$0xff]   ;;  %1697 = vmatpush1.bf16.msra.mxu0 %v7528_v3  ;;  %v7534_v7 = vld [vmem:[#allocation4 + $0xc0] ss:$16 sps:$4 sm:$0xff]  }
  0x42   :  { %1740 = vmatpush1.bf16.msra.mxu1 %v7529_v4  ;;  %v7532_v6 = vld [vmem:[#allocation4 + $0x2c4] ss:$16 sps:$4 sm:$0xff]   ;;  %1698 = vmatprep.subr.bf16.mxu0 %v7530_v5  ;;  %v7535_v8 = vld [vmem:[#allocation4 + $0x2c0] ss:$16 sps:$4 sm:$0xff]  }
  0x43   :  { %1741 = vmatprep.subr.bf16.mxu1 %v7532_v6  ;;  %v7536_v9 = vld [vmem:[#allocation4 + $0xa4] ss:$16 sps:$4 sm:$0xff]   ;;  %v7540_v11 = vld [vmem:[#allocation4 + $0xa0] ss:$16 sps:$4 sm:$0xff]  }
  0x44   :  { %v7538_v10 = vld [vmem:[#allocation4 + $0x2a4] ss:$16 sps:$4 sm:$0xff]   ;;  %v7541_v12 = vld [vmem:[#allocation4 + $0x2a0] ss:$16 sps:$4 sm:$0xff]  }
  0x45   :  { %1699 = vmatpush1.bf16.msra.mxu0 %v7534_v7  ;;  %v7542_v13 = vld [vmem:[#allocation4 + $0x84] ss:$16 sps:$4 sm:$0xff]   ;;  %v7546_v15 = vld [vmem:[#allocation4 + $0x80] ss:$16 sps:$4 sm:$0xff]  }
  0x46   :  { %1742 = vmatpush1.bf16.msra.mxu1 %v7535_v8  ;;  %1700 = vmatprep.subr.bf16.mxu0 %v7536_v9  ;;  %v7544_v14 = vld [vmem:[#allocation4 + $0x284] ss:$16 sps:$4 sm:$0xff]   ;;  %v7547_v16 = vld [vmem:[#allocation4 + $0x280] ss:$16 sps:$4 sm:$0xff]  }
  0x47   :  { %1743 = vmatprep.subr.bf16.mxu1 %v7538_v10  ;;  %v7548_v17 = vld [vmem:[#allocation4 + $0x64] ss:$16 sps:$4 sm:$0xff]   ;;  %v7552_v19 = vld [vmem:[#allocation4 + $0x60] ss:$16 sps:$4 sm:$0xff]  }
  0x48   :  { %v7550_v18 = vld [vmem:[#allocation4 + $0x264] ss:$16 sps:$4 sm:$0xff]   ;;  %v7553_v20 = vld [vmem:[#allocation4 + $0x260] ss:$16 sps:$4 sm:$0xff]  }
  0x49   :  { %1701 = vmatpush1.bf16.msra.mxu0 %v7540_v11  ;;  %v7554_v21 = vld [vmem:[#allocation4 + $0x44] ss:$16 sps:$4 sm:$0xff]   ;;  %v7558_v23 = vld [vmem:[#allocation4 + $0x40] ss:$16 sps:$4 sm:$0xff]  }
  0x4a   :  { %1744 = vmatpush1.bf16.msra.mxu1 %v7541_v12  ;;  %1702 = vmatprep.subr.bf16.mxu0 %v7542_v13  ;;  %v7556_v22 = vld [vmem:[#allocation4 + $0x244] ss:$16 sps:$4 sm:$0xff]   ;;  %v7559_v24 = vld [vmem:[#allocation4 + $0x240] ss:$16 sps:$4 sm:$0xff]  }
  0x4b   :  { %1745 = vmatprep.subr.bf16.mxu1 %v7544_v14  ;;  %v7560_v25 = vld [vmem:[#allocation4 + $0x24] ss:$16 sps:$4 sm:$0xff]   ;;  %v7564_v27 = vld [vmem:[#allocation4 + $0x20] ss:$16 sps:$4 sm:$0xff]  }
  0x4c   :  { %v7562_v26 = vld [vmem:[#allocation4 + $0x224] ss:$16 sps:$4 sm:$0xff]   ;;  %v7565_v28 = vld [vmem:[#allocation4 + $0x220] ss:$16 sps:$4 sm:$0xff]  }
  0x4d   :  { %1703 = vmatpush1.bf16.msra.mxu0 %v7546_v15  ;;  %v7566_v29 = vld [vmem:[#allocation4 + $0x4] ss:$16 sps:$4 sm:$0xff]   ;;  %v7570_v31 = vld [vmem:[#allocation4] ss:$16 sps:$4 sm:$0xff]  }
  0x4e   :  { %1746 = vmatpush1.bf16.msra.mxu1 %v7547_v16  ;;  %1704 = vmatprep.subr.bf16.mxu0 %v7548_v17  ;;  %v7568_v30 = vld [vmem:[#allocation4 + $0x204] ss:$16 sps:$4 sm:$0xff]   ;;  %v7571_v32 = vld [vmem:[#allocation4 + $0x200] ss:$16 sps:$4 sm:$0xff]  }
  0x4f   :  { %1747 = vmatprep.subr.bf16.mxu1 %v7550_v18  ;;  %v7572_v33 = vld [vmem:[#allocation4 + $0x1e4] ss:$16 sps:$4 sm:$0xff]   ;;  %v7576_v35 = vld [vmem:[#allocation4 + $0x1e0] ss:$16 sps:$4 sm:$0xff]  }
  0x50   :  { %v7574_v34 = vld [vmem:[#allocation4 + $0x3e4] ss:$16 sps:$4 sm:$0xff]   ;;  %v7577_v36 = vld [vmem:[#allocation4 + $0x3e0] ss:$16 sps:$4 sm:$0xff]  }
  0x51   :  { %1705 = vmatpush1.bf16.msra.mxu0 %v7552_v19  ;;  %v7578_v37 = vld [vmem:[#allocation4 + $0x1c4] ss:$16 sps:$4 sm:$0xff]   ;;  %v7582_v39 = vld [vmem:[#allocation4 + $0x1c0] ss:$16 sps:$4 sm:$0xff]  }
  0x52   :  { %1748 = vmatpush1.bf16.msra.mxu1 %v7553_v20  ;;  %1706 = vmatprep.subr.bf16.mxu0 %v7554_v21  ;;  %v7580_v38 = vld [vmem:[#allocation4 + $0x3c4] ss:$16 sps:$4 sm:$0xff]   ;;  %v7583_v40 = vld [vmem:[#allocation4 + $0x3c0] ss:$16 sps:$4 sm:$0xff]  }
  0x53   :  { %1749 = vmatprep.subr.bf16.mxu1 %v7556_v22  ;;  %v7584_v41 = vld [vmem:[#allocation4 + $0x1a4] ss:$16 sps:$4 sm:$0xff]   ;;  %v7588_v43 = vld [vmem:[#allocation4 + $0x1a0] ss:$16 sps:$4 sm:$0xff]  }
  0x54   :  { %v7586_v42 = vld [vmem:[#allocation4 + $0x3a4] ss:$16 sps:$4 sm:$0xff]   ;;  %v7589_v44 = vld [vmem:[#allocation4 + $0x3a0] ss:$16 sps:$4 sm:$0xff]  }
  0x55   :  { %1707 = vmatpush1.bf16.msra.mxu0 %v7558_v23  ;;  %v7590_v45 = vld [vmem:[#allocation4 + $0x184] ss:$16 sps:$4 sm:$0xff]   ;;  %v7594_v47 = vld [vmem:[#allocation4 + $0x180] ss:$16 sps:$4 sm:$0xff]  }
  0x56   :  { %1750 = vmatpush1.bf16.msra.mxu1 %v7559_v24  ;;  %1708 = vmatprep.subr.bf16.mxu0 %v7560_v25  ;;  %v7592_v46 = vld [vmem:[#allocation4 + $0x384] ss:$16 sps:$4 sm:$0xff]   ;;  %v7595_v48 = vld [vmem:[#allocation4 + $0x380] ss:$16 sps:$4 sm:$0xff]  }
  0x57   :  { %1751 = vmatprep.subr.bf16.mxu1 %v7562_v26  ;;  %v112_v49 = vld [vmem:[%s11215_s0] sm:$0xff]  ;;  %v113_v51 = vld [vmem:[%s11215_s0 + $0x8] sm:$0xff] }
  0x58   :  { %v116_v50 = vld [vmem:[%s11215_s0 + $0x20] sm:$0xff]  ;;  %v117_v52 = vld [vmem:[%s11215_s0 + $0x28] sm:$0xff] }
  0x59   :  { %1709 = vmatpush1.bf16.msra.mxu0 %v7564_v27  ;;  %v7596_v53 = vld [vmem:[#allocation4 + $0x164] ss:$16 sps:$4 sm:$0xff]   ;;  %v8967_v54 = vcombine.high %v112_v49, %v116_v50  ;;  %v8969_v56 = vcombine.high %v113_v51, %v117_v52  ;;  %v7600_v57 = vld [vmem:[#allocation4 + $0x160] ss:$16 sps:$4 sm:$0xff]   ;;  %v8973_v9 = vcombine.low %v112_v49, %v116_v50  ;;  %v8975_v10 = vcombine.low %v113_v51, %v117_v52 }
  0x5a   :  { %1752 = vmatpush1.bf16.msra.mxu1 %v7565_v28  ;;  %1710 = vmatprep.subr.bf16.mxu0 %v7566_v29  ;;  %v7598_v55 = vld [vmem:[#allocation4 + $0x364] ss:$16 sps:$4 sm:$0xff]   ;;  %v7601_v58 = vld [vmem:[#allocation4 + $0x360] ss:$16 sps:$4 sm:$0xff]  }
  0x5b   :  { %1753 = vmatprep.subr.bf16.mxu1 %v7568_v30  ;;  %1728 = vmatprep.mubr.bf16.mxu0 %v8967_v54  ;;  %v7602_v59 = vld [vmem:[#allocation4 + $0x144] ss:$16 sps:$4 sm:$0xff]   ;;  %v7606_v61 = vld [vmem:[#allocation4 + $0x140] ss:$16 sps:$4 sm:$0xff]  }
  0x5c   :  { %1771 = vmatprep.mubr.bf16.mxu1 %v8969_v56  ;;  %v7604_v60 = vld [vmem:[#allocation4 + $0x344] ss:$16 sps:$4 sm:$0xff]   ;;  %v7607_v62 = vld [vmem:[#allocation4 + $0x340] ss:$16 sps:$4 sm:$0xff]  }
  0x5d   :  { %1711 = vmatpush1.bf16.msra.mxu0 %v7570_v31  ;;  %v7608_v63 = vld [vmem:[#allocation4 + $0x124] ss:$16 sps:$4 sm:$0xff]   ;;  %v7612_v1 = vld [vmem:[#allocation4 + $0x120] ss:$16 sps:$4 sm:$0xff]  }
  0x5e   :  { %1754 = vmatpush1.bf16.msra.mxu1 %v7571_v32  ;;  %1712 = vmatprep.subr.bf16.mxu0 %v7572_v33  ;;  %v7610_v0 = vld [vmem:[#allocation4 + $0x324] ss:$16 sps:$4 sm:$0xff]   ;;  %v7613_v2 = vld [vmem:[#allocation4 + $0x320] ss:$16 sps:$4 sm:$0xff]  }
  0x5f   :  { %1755 = vmatprep.subr.bf16.mxu1 %v7574_v34  ;;  %v7614_v3 = vld [vmem:[#allocation4 + $0x104] ss:$16 sps:$4 sm:$0xff]   ;;  %v7618_v5 = vld [vmem:[#allocation4 + $0x100] ss:$16 sps:$4 sm:$0xff]  }
  0x60   :  { %v7616_v4 = vld [vmem:[#allocation4 + $0x304] ss:$16 sps:$4 sm:$0xff]   ;;  %v7619_v6 = vld [vmem:[#allocation4 + $0x300] ss:$16 sps:$4 sm:$0xff]  }
  0x61   :  { %1713 = vmatpush2.bf16.msra.mxu0 %v7576_v35  ;;  %v7622_v7 = vld [vmem:[#allocation4 + $0x4e4] ss:$16 sps:$4 sm:$0xff]   ;;  %v7620_v11 = vld [vmem:[#allocation4 + $0x4e0] ss:$16 sps:$4 sm:$0xff]  }
  0x62   :  { %1756 = vmatpush2.bf16.msra.mxu1 %v7577_v36  ;;  %1714 = vmatprep.subr.bf16.mxu0 %v7578_v37  ;;  %v7625_v8 = vld [vmem:[#allocation4 + $0x6e4] ss:$16 sps:$4 sm:$0xff]   ;;  %v7623_v12 = vld [vmem:[#allocation4 + $0x6e0] ss:$16 sps:$4 sm:$0xff]  }
  0x63   :  { %1757 = vmatprep.subr.bf16.mxu1 %v7580_v38  ;;  %v7628_v13 = vld [vmem:[#allocation4 + $0x4c4] ss:$16 sps:$4 sm:$0xff]   ;;  %v7626_v15 = vld [vmem:[#allocation4 + $0x4c0] ss:$16 sps:$4 sm:$0xff]  }
  0x64   :  { %v7631_v14 = vld [vmem:[#allocation4 + $0x6c4] ss:$16 sps:$4 sm:$0xff]   ;;  %v7629_v16 = vld [vmem:[#allocation4 + $0x6c0] ss:$16 sps:$4 sm:$0xff]  }
  0x65   :  { %1715 = vmatpush2.bf16.msra.mxu0 %v7582_v39  ;;  %v7634_v17 = vld [vmem:[#allocation4 + $0x4a4] ss:$16 sps:$4 sm:$0xff]   ;;  %v7632_v19 = vld [vmem:[#allocation4 + $0x4a0] ss:$16 sps:$4 sm:$0xff]  }
  0x66   :  { %1758 = vmatpush2.bf16.msra.mxu1 %v7583_v40  ;;  %1716 = vmatprep.subr.bf16.mxu0 %v7584_v41  ;;  %v7637_v18 = vld [vmem:[#allocation4 + $0x6a4] ss:$16 sps:$4 sm:$0xff]   ;;  %v7635_v20 = vld [vmem:[#allocation4 + $0x6a0] ss:$16 sps:$4 sm:$0xff]  }
  0x67   :  { %1759 = vmatprep.subr.bf16.mxu1 %v7586_v42  ;;  %v7640_v21 = vld [vmem:[#allocation4 + $0x484] ss:$16 sps:$4 sm:$0xff]   ;;  %v7638_v23 = vld [vmem:[#allocation4 + $0x480] ss:$16 sps:$4 sm:$0xff]  }
  0x68   :  { %v7643_v22 = vld [vmem:[#allocation4 + $0x684] ss:$16 sps:$4 sm:$0xff]   ;;  %v7641_v24 = vld [vmem:[#allocation4 + $0x680] ss:$16 sps:$4 sm:$0xff]  }
  0x69   :  { %1717 = vmatpush2.bf16.msra.mxu0 %v7588_v43  ;;  %v7646_v25 = vld [vmem:[#allocation4 + $0x464] ss:$16 sps:$4 sm:$0xff]   ;;  %v7644_v27 = vld [vmem:[#allocation4 + $0x460] ss:$16 sps:$4 sm:$0xff]  }
  0x6a   :  { %1760 = vmatpush2.bf16.msra.mxu1 %v7589_v44  ;;  %1718 = vmatprep.subr.bf16.mxu0 %v7590_v45  ;;  %v7649_v26 = vld [vmem:[#allocation4 + $0x664] ss:$16 sps:$4 sm:$0xff]   ;;  %v7647_v28 = vld [vmem:[#allocation4 + $0x660] ss:$16 sps:$4 sm:$0xff]  }
  0x6b   :  { %1761 = vmatprep.subr.bf16.mxu1 %v7592_v46  ;;  %v7652_v29 = vld [vmem:[#allocation4 + $0x444] ss:$16 sps:$4 sm:$0xff]   ;;  %v7650_v31 = vld [vmem:[#allocation4 + $0x440] ss:$16 sps:$4 sm:$0xff]  }
  0x6c   :  { %v7655_v30 = vld [vmem:[#allocation4 + $0x644] ss:$16 sps:$4 sm:$0xff]   ;;  %v7653_v32 = vld [vmem:[#allocation4 + $0x640] ss:$16 sps:$4 sm:$0xff]  }
  0x6d   :  { %1719 = vmatpush2.bf16.msra.mxu0 %v7594_v47  ;;  %v7658_v33 = vld [vmem:[#allocation4 + $0x424] ss:$16 sps:$4 sm:$0xff]   ;;  %v7656_v35 = vld [vmem:[#allocation4 + $0x420] ss:$16 sps:$4 sm:$0xff]  }
  0x6e   :  { %1762 = vmatpush2.bf16.msra.mxu1 %v7595_v48  ;;  %1720 = vmatprep.subr.bf16.mxu0 %v7596_v53  ;;  %v7661_v34 = vld [vmem:[#allocation4 + $0x624] ss:$16 sps:$4 sm:$0xff]   ;;  %v7659_v36 = vld [vmem:[#allocation4 + $0x620] ss:$16 sps:$4 sm:$0xff]  }
  0x6f   :  { %1763 = vmatprep.subr.bf16.mxu1 %v7598_v55  ;;  %v8982_v37 = vld [vmem:[%s11215_s0 + $0x10] sm:$0xff]  ;;  %v8992_v39 = vld [vmem:[%s11215_s0 + $0x18] sm:$0xff] }
  0x70   :  { %v8987_v38 = vld [vmem:[%s11215_s0 + $0x30] sm:$0xff]  ;;  %v8997_v40 = vld [vmem:[%s11215_s0 + $0x38] sm:$0xff] }
  0x71   :  { %1721 = vmatpush2.bf16.msra.mxu0 %v7600_v57  ;;  %v7664_v41 = vld [vmem:[#allocation4 + $0x404] ss:$16 sps:$4 sm:$0xff]   ;;  %v9001_v42 = vcombine.high %v8982_v37, %v8987_v38  ;;  %v9005_v44 = vcombine.high %v8992_v39, %v8997_v40  ;;  %v7662_v45 = vld [vmem:[#allocation4 + $0x400] ss:$16 sps:$4 sm:$0xff]  }
  0x72   :  { %1764 = vmatpush2.bf16.msra.mxu1 %v7601_v58  ;;  %1722 = vmatprep.subr.bf16.mxu0 %v7602_v59  ;;  %v7667_v43 = vld [vmem:[#allocation4 + $0x604] ss:$16 sps:$4 sm:$0xff]   ;;  %v7665_v46 = vld [vmem:[#allocation4 + $0x600] ss:$16 sps:$4 sm:$0xff]  }
  0x73   :  { %1765 = vmatprep.subr.bf16.mxu1 %v7604_v60  ;;  %v7670_v47 = vld [vmem:[#allocation4 + $0x5e4] ss:$16 sps:$4 sm:$0xff]   ;;  %v7668_v49 = vld [vmem:[#allocation4 + $0x5e0] ss:$16 sps:$4 sm:$0xff]  }
  0x74   :  { %v7673_v48 = vld [vmem:[#allocation4 + $0x7e4] ss:$16 sps:$4 sm:$0xff]   ;;  %v7671_v50 = vld [vmem:[#allocation4 + $0x7e0] ss:$16 sps:$4 sm:$0xff]  }
  0x75   :  { %1723 = vmatpush2.bf16.msra.mxu0 %v7606_v61  ;;  %v7676_v51 = vld [vmem:[#allocation4 + $0x5c4] ss:$16 sps:$4 sm:$0xff]   ;;  %v7674_v53 = vld [vmem:[#allocation4 + $0x5c0] ss:$16 sps:$4 sm:$0xff]  }
  0x76   :  { %1766 = vmatpush2.bf16.msra.mxu1 %v7607_v62  ;;  %1724 = vmatprep.subr.bf16.mxu0 %v7608_v63  ;;  %v7679_v52 = vld [vmem:[#allocation4 + $0x7c4] ss:$16 sps:$4 sm:$0xff]   ;;  %v7677_v55 = vld [vmem:[#allocation4 + $0x7c0] ss:$16 sps:$4 sm:$0xff]  }
  0x77   :  { %1767 = vmatprep.subr.bf16.mxu1 %v7610_v0  ;;  %v7682_v57 = vld [vmem:[#allocation4 + $0x5a4] ss:$16 sps:$4 sm:$0xff]   ;;  %v7680_v59 = vld [vmem:[#allocation4 + $0x5a0] ss:$16 sps:$4 sm:$0xff]  }
  0x78   :  { %v7685_v58 = vld [vmem:[#allocation4 + $0x7a4] ss:$16 sps:$4 sm:$0xff]   ;;  %v7683_v60 = vld [vmem:[#allocation4 + $0x7a0] ss:$16 sps:$4 sm:$0xff]  }
  0x79   :  { %1725 = vmatpush2.bf16.msra.mxu0 %v7612_v1  ;;  %v7688_v61 = vld [vmem:[#allocation4 + $0x584] ss:$16 sps:$4 sm:$0xff]   ;;  %v7686_v63 = vld [vmem:[#allocation4 + $0x580] ss:$16 sps:$4 sm:$0xff]  }
  0x7a   :  { %1768 = vmatpush2.bf16.msra.mxu1 %v7613_v2  ;;  %1726 = vmatprep.subr.bf16.mxu0 %v7614_v3  ;;  %v7691_v62 = vld [vmem:[#allocation4 + $0x784] ss:$16 sps:$4 sm:$0xff]   ;;  %v7689_v0 = vld [vmem:[#allocation4 + $0x780] ss:$16 sps:$4 sm:$0xff]  }
  0x7b   :  { %1769 = vmatprep.subr.bf16.mxu1 %v7616_v4  ;;  %v7694_v1 = vld [vmem:[#allocation4 + $0x564] ss:$16 sps:$4 sm:$0xff]   ;;  %v7692_v3 = vld [vmem:[#allocation4 + $0x560] ss:$16 sps:$4 sm:$0xff]  }
  0x7c   :  { %v7697_v2 = vld [vmem:[#allocation4 + $0x764] ss:$16 sps:$4 sm:$0xff]   ;;  %v7695_v4 = vld [vmem:[#allocation4 + $0x760] ss:$16 sps:$4 sm:$0xff]  }
  0x7d   :  { %1727 = vmatpush2.bf16.msra.mxu0 %v7618_v5  ;;  %v7700_v5 = vld [vmem:[#allocation4 + $0x544] ss:$16 sps:$4 sm:$0xff]  }
  0x7e   :  { %1770 = vmatpush2.bf16.msra.mxu1 %v7619_v6  ;;  %1782 = vmatprep.subr.bf16.mxu0 %v7622_v7  ;;  %v7703_v6 = vld [vmem:[#allocation4 + $0x744] ss:$16 sps:$4 sm:$0xff]   ;;  %v7698_v7 = vld [vmem:[#allocation4 + $0x540] ss:$16 sps:$4 sm:$0xff]  }
  0x7f   :  { %1825 = vmatprep.subr.bf16.mxu1 %v7625_v8  ;;  %v7701_v8 = vld [vmem:[#allocation4 + $0x740] ss:$16 sps:$4 sm:$0xff]  }
  0x80   :  { %1729 = vmatmul.mubr.bf16.vlgmr.msra.gmra.mxu0 %v8973_v9 }
  0x81   :  { %1772 = vmatmul.mubr.bf16.vlgmr.msra.gmra.mxu1 %v8975_v10  ;;  %1783 = vmatpush1.bf16.msra.mxu0 %v7620_v11  ;;  %v7706_v11 = vld [vmem:[#allocation4 + $0x524] ss:$16 sps:$4 sm:$0xff]  }
  0x82   :  { %1826 = vmatpush1.bf16.msra.mxu1 %v7623_v12  ;;  %1784 = vmatprep.subr.bf16.mxu0 %v7628_v13  ;;  %v7709_v12 = vld [vmem:[#allocation4 + $0x724] ss:$16 sps:$4 sm:$0xff]   ;;  %v7704_v13 = vld [vmem:[#allocation4 + $0x520] ss:$16 sps:$4 sm:$0xff]  }
  0x83   :  { %1827 = vmatprep.subr.bf16.mxu1 %v7631_v14  ;;  %1814 = vmatprep.mubr.bf16.mxu0 %v9001_v42  ;;  %v7707_v14 = vld [vmem:[#allocation4 + $0x720] ss:$16 sps:$4 sm:$0xff]  }
  0x84   :  { %1857 = vmatprep.mubr.bf16.mxu1 %v9005_v44 }
  0x85   :  { %1785 = vmatpush1.bf16.msra.mxu0 %v7626_v15  ;;  %v7712_v15 = vld [vmem:[#allocation4 + $0x504] ss:$16 sps:$4 sm:$0xff]  }
  0x86   :  { %1828 = vmatpush1.bf16.msra.mxu1 %v7629_v16  ;;  %1786 = vmatprep.subr.bf16.mxu0 %v7634_v17  ;;  %v7715_v16 = vld [vmem:[#allocation4 + $0x704] ss:$16 sps:$4 sm:$0xff]   ;;  %v7710_v17 = vld [vmem:[#allocation4 + $0x500] ss:$16 sps:$4 sm:$0xff]  }
  0x87   :  { %1829 = vmatprep.subr.bf16.mxu1 %v7637_v18  ;;  %v7713_v18 = vld [vmem:[#allocation4 + $0x700] ss:$16 sps:$4 sm:$0xff]  }
  0x89   :  { %1787 = vmatpush1.bf16.msra.mxu0 %v7632_v19  ;;  %v7718_v19 = vld [vmem:[#allocation4 + $0xec] ss:$16 sps:$4 sm:$0xff]  }
  0x8a   :  { %1830 = vmatpush1.bf16.msra.mxu1 %v7635_v20  ;;  %1788 = vmatprep.subr.bf16.mxu0 %v7640_v21  ;;  %v7721_v20 = vld [vmem:[#allocation4 + $0x2ec] ss:$16 sps:$4 sm:$0xff]   ;;  %v9011_v21 = vcombine.low %v8982_v37, %v8987_v38 }
  0x8b   :  { %1831 = vmatprep.subr.bf16.mxu1 %v7643_v22  ;;  %v9015_v22 = vcombine.low %v8992_v39, %v8997_v40  ;;  %v7742_v37 = vld [vmem:[#allocation4 + $0x6c] ss:$16 sps:$4 sm:$0xff]   ;;  %v7740_v39 = vld [vmem:[#allocation4 + $0x68] ss:$16 sps:$4 sm:$0xff]  }
  0x8c   :  { %v7745_v38 = vld [vmem:[#allocation4 + $0x26c] ss:$16 sps:$4 sm:$0xff]  }
  0x8d   :  { %1789 = vmatpush1.bf16.msra.mxu0 %v7638_v23  ;;  %v7716_v23 = vld [vmem:[#allocation4 + $0xe8] ss:$16 sps:$4 sm:$0xff]   ;;  %v7751_v40 = vld [vmem:[#allocation4 + $0x24c] ss:$16 sps:$4 sm:$0xff]  }
  0x8e   :  { %1832 = vmatpush1.bf16.msra.mxu1 %v7641_v24  ;;  %1790 = vmatprep.subr.bf16.mxu0 %v7646_v25  ;;  %v7719_v24 = vld [vmem:[#allocation4 + $0x2e8] ss:$16 sps:$4 sm:$0xff]   ;;  %v7724_v25 = vld [vmem:[#allocation4 + $0xcc] ss:$16 sps:$4 sm:$0xff]  }
  0x8f   :  { %1833 = vmatprep.subr.bf16.mxu1 %v7649_v26  ;;  %v7727_v26 = vld [vmem:[#allocation4 + $0x2cc] ss:$16 sps:$4 sm:$0xff]  }
  0x91   :  { %1791 = vmatpush1.bf16.msra.mxu0 %v7644_v27  ;;  %v7722_v27 = vld [vmem:[#allocation4 + $0xc8] ss:$16 sps:$4 sm:$0xff]  }
  0x92   :  { %1834 = vmatpush1.bf16.msra.mxu1 %v7647_v28  ;;  %1792 = vmatprep.subr.bf16.mxu0 %v7652_v29  ;;  %v7725_v28 = vld [vmem:[#allocation4 + $0x2c8] ss:$16 sps:$4 sm:$0xff]   ;;  %v7730_v29 = vld [vmem:[#allocation4 + $0xac] ss:$16 sps:$4 sm:$0xff]  }
  0x93   :  { %1835 = vmatprep.subr.bf16.mxu1 %v7655_v30  ;;  %v7733_v30 = vld [vmem:[#allocation4 + $0x2ac] ss:$16 sps:$4 sm:$0xff]  }
  0x95   :  { %1793 = vmatpush1.bf16.msra.mxu0 %v7650_v31  ;;  %v7728_v31 = vld [vmem:[#allocation4 + $0xa8] ss:$16 sps:$4 sm:$0xff]  }
  0x96   :  { %1836 = vmatpush1.bf16.msra.mxu1 %v7653_v32  ;;  %1794 = vmatprep.subr.bf16.mxu0 %v7658_v33  ;;  %v7731_v32 = vld [vmem:[#allocation4 + $0x2a8] ss:$16 sps:$4 sm:$0xff]   ;;  %v7736_v33 = vld [vmem:[#allocation4 + $0x8c] ss:$16 sps:$4 sm:$0xff]  }
  0x97   :  { %1837 = vmatprep.subr.bf16.mxu1 %v7661_v34  ;;  %v7739_v34 = vld [vmem:[#allocation4 + $0x28c] ss:$16 sps:$4 sm:$0xff]  }
  0x99   :  { %1795 = vmatpush1.bf16.msra.mxu0 %v7656_v35  ;;  %v7734_v35 = vld [vmem:[#allocation4 + $0x88] ss:$16 sps:$4 sm:$0xff]  }
  0x9a   :  { %1838 = vmatpush1.bf16.msra.mxu1 %v7659_v36  ;;  %1796 = vmatprep.subr.bf16.mxu0 %v7664_v41  ;;  %v7737_v36 = vld [vmem:[#allocation4 + $0x288] ss:$16 sps:$4 sm:$0xff]  }
  0x9b   :  { %1839 = vmatprep.subr.bf16.mxu1 %v7667_v43  ;;  %v7746_v41 = vld [vmem:[#allocation4 + $0x48] ss:$16 sps:$4 sm:$0xff]  }
  0x9c   :  { %v7749_v43 = vld [vmem:[#allocation4 + $0x248] ss:$16 sps:$4 sm:$0xff]  }
  0x9d   :  { %1797 = vmatpush1.bf16.msra.mxu0 %v7662_v45  ;;  %v7754_v45 = vld [vmem:[#allocation4 + $0x2c] ss:$16 sps:$4 sm:$0xff]  }
  0x9e   :  { %1840 = vmatpush1.bf16.msra.mxu1 %v7665_v46  ;;  %1798 = vmatprep.subr.bf16.mxu0 %v7670_v47  ;;  %v7757_v46 = vld [vmem:[#allocation4 + $0x22c] ss:$16 sps:$4 sm:$0xff]   ;;  %v7752_v47 = vld [vmem:[#allocation4 + $0x28] ss:$16 sps:$4 sm:$0xff]  }
  0x9f   :  { %1841 = vmatprep.subr.bf16.mxu1 %v7673_v48  ;;  %v7755_v48 = vld [vmem:[#allocation4 + $0x228] ss:$16 sps:$4 sm:$0xff]  }
  0xa1   :  { %1799 = vmatpush2.bf16.msra.mxu0 %v7668_v49  ;;  %v7760_v49 = vld [vmem:[#allocation4 + $0xc] ss:$16 sps:$4 sm:$0xff]  }
  0xa2   :  { %1842 = vmatpush2.bf16.msra.mxu1 %v7671_v50  ;;  %1800 = vmatprep.subr.bf16.mxu0 %v7676_v51  ;;  %v7763_v50 = vld [vmem:[#allocation4 + $0x20c] ss:$16 sps:$4 sm:$0xff]   ;;  %v7758_v51 = vld [vmem:[#allocation4 + $0x8] ss:$16 sps:$4 sm:$0xff]  }
  0xa3   :  { %1843 = vmatprep.subr.bf16.mxu1 %v7679_v52  ;;  %v7761_v52 = vld [vmem:[#allocation4 + $0x208] ss:$16 sps:$4 sm:$0xff]  }
  0xa5   :  { %1801 = vmatpush2.bf16.msra.mxu0 %v7674_v53  ;;  %v7766_v53 = vld [vmem:[#allocation4 + $0x1ec] ss:$16 sps:$4 sm:$0xff]  }
  0xa6   :  { %1844 = vmatpush2.bf16.msra.mxu1 %v7677_v55  ;;  %1802 = vmatprep.subr.bf16.mxu0 %v7682_v57  ;;  %v7769_v55 = vld [vmem:[#allocation4 + $0x3ec] ss:$16 sps:$4 sm:$0xff]   ;;  %v7764_v57 = vld [vmem:[#allocation4 + $0x1e8] ss:$16 sps:$4 sm:$0xff]  }
  0xa7   :  { %1845 = vmatprep.subr.bf16.mxu1 %v7685_v58  ;;  %v7767_v58 = vld [vmem:[#allocation4 + $0x3e8] ss:$16 sps:$4 sm:$0xff]  }
  0xa9   :  { %1803 = vmatpush2.bf16.msra.mxu0 %v7680_v59  ;;  %v7772_v59 = vld [vmem:[#allocation4 + $0x1cc] ss:$16 sps:$4 sm:$0xff]  }
  0xaa   :  { %1846 = vmatpush2.bf16.msra.mxu1 %v7683_v60  ;;  %1804 = vmatprep.subr.bf16.mxu0 %v7688_v61  ;;  %v7775_v60 = vld [vmem:[#allocation4 + $0x3cc] ss:$16 sps:$4 sm:$0xff]   ;;  %v7770_v61 = vld [vmem:[#allocation4 + $0x1c8] ss:$16 sps:$4 sm:$0xff]  }
  0xab   :  { %1847 = vmatprep.subr.bf16.mxu1 %v7691_v62  ;;  %v7773_v62 = vld [vmem:[#allocation4 + $0x3c8] ss:$16 sps:$4 sm:$0xff]  }
  0xad   :  { %1805 = vmatpush2.bf16.msra.mxu0 %v7686_v63  ;;  %v7778_v63 = vld [vmem:[#allocation4 + $0x1ac] ss:$16 sps:$4 sm:$0xff]  }
  0xae   :  { %1848 = vmatpush2.bf16.msra.mxu1 %v7689_v0  ;;  %1806 = vmatprep.subr.bf16.mxu0 %v7694_v1  ;;  %v7781_v0 = vld [vmem:[#allocation4 + $0x3ac] ss:$16 sps:$4 sm:$0xff]   ;;  %v7776_v1 = vld [vmem:[#allocation4 + $0x1a8] ss:$16 sps:$4 sm:$0xff]  }
  0xaf   :  { %1849 = vmatprep.subr.bf16.mxu1 %v7697_v2  ;;  %v7779_v2 = vld [vmem:[#allocation4 + $0x3a8] ss:$16 sps:$4 sm:$0xff]  }
  0xb1   :  { %1807 = vmatpush2.bf16.msra.mxu0 %v7692_v3  ;;  %v7784_v3 = vld [vmem:[#allocation4 + $0x18c] ss:$16 sps:$4 sm:$0xff]  }
  0xb2   :  { %1850 = vmatpush2.bf16.msra.mxu1 %v7695_v4  ;;  %1808 = vmatprep.subr.bf16.mxu0 %v7700_v5  ;;  %v7787_v4 = vld [vmem:[#allocation4 + $0x38c] ss:$16 sps:$4 sm:$0xff]   ;;  %v7782_v5 = vld [vmem:[#allocation4 + $0x188] ss:$16 sps:$4 sm:$0xff]  }
  0xb3   :  { %1851 = vmatprep.subr.bf16.mxu1 %v7703_v6  ;;  %v7785_v6 = vld [vmem:[#allocation4 + $0x388] ss:$16 sps:$4 sm:$0xff]  }
  0xb5   :  { %1809 = vmatpush2.bf16.msra.mxu0 %v7698_v7  ;;  %v7790_v7 = vld [vmem:[#allocation4 + $0x16c] ss:$16 sps:$4 sm:$0xff]  }
  0xb6   :  { %1852 = vmatpush2.bf16.msra.mxu1 %v7701_v8  ;;  %1810 = vmatprep.subr.bf16.mxu0 %v7706_v11  ;;  %v7793_v8 = vld [vmem:[#allocation4 + $0x36c] ss:$16 sps:$4 sm:$0xff]   ;;  %v7788_v11 = vld [vmem:[#allocation4 + $0x168] ss:$16 sps:$4 sm:$0xff]  }
  0xb7   :  { %1853 = vmatprep.subr.bf16.mxu1 %v7709_v12  ;;  %v7791_v12 = vld [vmem:[#allocation4 + $0x368] ss:$16 sps:$4 sm:$0xff]  }
  0xb9   :  { %1811 = vmatpush2.bf16.msra.mxu0 %v7704_v13  ;;  %v7796_v13 = vld [vmem:[#allocation4 + $0x14c] ss:$16 sps:$4 sm:$0xff]  }
  0xba   :  { %1854 = vmatpush2.bf16.msra.mxu1 %v7707_v14  ;;  %1812 = vmatprep.subr.bf16.mxu0 %v7712_v15  ;;  %v7799_v14 = vld [vmem:[#allocation4 + $0x34c] ss:$16 sps:$4 sm:$0xff]   ;;  %v7794_v15 = vld [vmem:[#allocation4 + $0x148] ss:$16 sps:$4 sm:$0xff]  }
  0xbb   :  { %1855 = vmatprep.subr.bf16.mxu1 %v7715_v16  ;;  %v7797_v16 = vld [vmem:[#allocation4 + $0x348] ss:$16 sps:$4 sm:$0xff]  }
  0xbd   :  { %1813 = vmatpush2.bf16.msra.mxu0 %v7710_v17  ;;  %v7802_v17 = vld [vmem:[#allocation4 + $0x12c] ss:$16 sps:$4 sm:$0xff]  }
  0xbe   :  { %1856 = vmatpush2.bf16.msra.mxu1 %v7713_v18  ;;  %1868 = vmatprep.subr.bf16.mxu0 %v7718_v19  ;;  %v7805_v18 = vld [vmem:[#allocation4 + $0x32c] ss:$16 sps:$4 sm:$0xff]   ;;  %v7800_v19 = vld [vmem:[#allocation4 + $0x128] ss:$16 sps:$4 sm:$0xff]  }
  0xbf   :  { %1911 = vmatprep.subr.bf16.mxu1 %v7721_v20  ;;  %v7803_v20 = vld [vmem:[#allocation4 + $0x328] ss:$16 sps:$4 sm:$0xff]  }
  0xc0   :  { %1815 = vmatmul.mubr.bf16.vlgmr.msra.gmra.mxu0 %v9011_v21 }
  0xc1   :  { %1858 = vmatmul.mubr.bf16.vlgmr.msra.gmra.mxu1 %v9015_v22  ;;  %1869 = vmatpush1.bf16.msra.mxu0 %v7716_v23  ;;  %v7808_v23 = vld [vmem:[#allocation4 + $0x10c] ss:$16 sps:$4 sm:$0xff]  }
  0xc2   :  { %1912 = vmatpush1.bf16.msra.mxu1 %v7719_v24  ;;  %1870 = vmatprep.subr.bf16.mxu0 %v7724_v25  ;;  %v7811_v24 = vld [vmem:[#allocation4 + $0x30c] ss:$16 sps:$4 sm:$0xff]   ;;  %v7806_v25 = vld [vmem:[#allocation4 + $0x108] ss:$16 sps:$4 sm:$0xff]  }
  0xc3   :  { %1913 = vmatprep.subr.bf16.mxu1 %v7727_v26  ;;  %1900 = vmatprep.mubr.bf16.mxu0 %v8967_v54  ;;  %v7743_v54 = vld [vmem:[#allocation4 + $0x268] ss:$16 sps:$4 sm:$0xff]  }
  0xc4   :  { %1943 = vmatprep.mubr.bf16.mxu1 %v8969_v56  ;;  %v7748_v56 = vld [vmem:[#allocation4 + $0x4c] ss:$16 sps:$4 sm:$0xff]   ;;  %v7809_v26 = vld [vmem:[#allocation4 + $0x308] ss:$16 sps:$4 sm:$0xff]  }
  0xc5   :  { %1871 = vmatpush1.bf16.msra.mxu0 %v7722_v27  ;;  %v7814_v27 = vld [vmem:[#allocation4 + $0x4ec] ss:$16 sps:$4 sm:$0xff]  }
  0xc6   :  { %1914 = vmatpush1.bf16.msra.mxu1 %v7725_v28  ;;  %1872 = vmatprep.subr.bf16.mxu0 %v7730_v29  ;;  %v7817_v28 = vld [vmem:[#allocation4 + $0x6ec] ss:$16 sps:$4 sm:$0xff]   ;;  %v7812_v29 = vld [vmem:[#allocation4 + $0x4e8] ss:$16 sps:$4 sm:$0xff]  }
  0xc7   :  { %1915 = vmatprep.subr.bf16.mxu1 %v7733_v30  ;;  %v7815_v30 = vld [vmem:[#allocation4 + $0x6e8] ss:$16 sps:$4 sm:$0xff]  }
  0xc9   :  { %1873 = vmatpush1.bf16.msra.mxu0 %v7728_v31  ;;  %v7820_v31 = vld [vmem:[#allocation4 + $0x4cc] ss:$16 sps:$4 sm:$0xff]  }
  0xca   :  { %1916 = vmatpush1.bf16.msra.mxu1 %v7731_v32  ;;  %1874 = vmatprep.subr.bf16.mxu0 %v7736_v33  ;;  %v7823_v32 = vld [vmem:[#allocation4 + $0x6cc] ss:$16 sps:$4 sm:$0xff]   ;;  %v7818_v33 = vld [vmem:[#allocation4 + $0x4c8] ss:$16 sps:$4 sm:$0xff]  }
  0xcb   :  { %1917 = vmatprep.subr.bf16.mxu1 %v7739_v34  ;;  %v7821_v34 = vld [vmem:[#allocation4 + $0x6c8] ss:$16 sps:$4 sm:$0xff]  }
  0xcd   :  { %1875 = vmatpush1.bf16.msra.mxu0 %v7734_v35  ;;  %v7826_v35 = vld [vmem:[#allocation4 + $0x4ac] ss:$16 sps:$4 sm:$0xff]  }
  0xce   :  { %1918 = vmatpush1.bf16.msra.mxu1 %v7737_v36  ;;  %1876 = vmatprep.subr.bf16.mxu0 %v7742_v37  ;;  %v7829_v36 = vld [vmem:[#allocation4 + $0x6ac] ss:$16 sps:$4 sm:$0xff]   ;;  %v7824_v37 = vld [vmem:[#allocation4 + $0x4a8] ss:$16 sps:$4 sm:$0xff]  }
  0xcf   :  { %1919 = vmatprep.subr.bf16.mxu1 %v7745_v38  ;;  %v7827_v38 = vld [vmem:[#allocation4 + $0x6a8] ss:$16 sps:$4 sm:$0xff]  }
  0xd1   :  { %1877 = vmatpush1.bf16.msra.mxu0 %v7740_v39  ;;  %v7832_v39 = vld [vmem:[#allocation4 + $0x48c] ss:$16 sps:$4 sm:$0xff]  }
  0xd2   :  { %1920 = vmatpush1.bf16.msra.mxu1 %v7743_v54  ;;  %1878 = vmatprep.subr.bf16.mxu0 %v7748_v56  ;;  %v7833_v54 = vld [vmem:[#allocation4 + $0x688] ss:$16 sps:$4 sm:$0xff]   ;;  %v7838_v56 = vld [vmem:[#allocation4 + $0x46c] ss:$16 sps:$4 sm:$0xff]  }
  0xd3   :  { %1921 = vmatprep.subr.bf16.mxu1 %v7751_v40  ;;  %v7841_v40 = vld [vmem:[#allocation4 + $0x66c] ss:$16 sps:$4 sm:$0xff]  }
  0xd5   :  { %1879 = vmatpush1.bf16.msra.mxu0 %v7746_v41  ;;  %v7836_v41 = vld [vmem:[#allocation4 + $0x468] ss:$16 sps:$4 sm:$0xff]  }
  0xd6   :  { %1922 = vmatpush1.bf16.msra.mxu1 %v7749_v43  ;;  %1880 = vmatprep.subr.bf16.mxu0 %v7754_v45  ;;  %v7839_v43 = vld [vmem:[#allocation4 + $0x668] ss:$16 sps:$4 sm:$0xff]  }
  0xd7   :  { %1923 = vmatprep.subr.bf16.mxu1 %v7757_v46  ;;  %v7842_v45 = vld [vmem:[#allocation4 + $0x448] ss:$16 sps:$4 sm:$0xff]  }
  0xd8   :  { %v7845_v46 = vld [vmem:[#allocation4 + $0x648] ss:$16 sps:$4 sm:$0xff]  }
  0xd9   :  { %1881 = vmatpush1.bf16.msra.mxu0 %v7752_v47  ;;  %v7850_v47 = vld [vmem:[#allocation4 + $0x42c] ss:$16 sps:$4 sm:$0xff]  }
  0xda   :  { %1924 = vmatpush1.bf16.msra.mxu1 %v7755_v48  ;;  %1882 = vmatprep.subr.bf16.mxu0 %v7760_v49  ;;  %v7853_v48 = vld [vmem:[#allocation4 + $0x62c] ss:$16 sps:$4 sm:$0xff]   ;;  %v7848_v49 = vld [vmem:[#allocation4 + $0x428] ss:$16 sps:$4 sm:$0xff]  }
  0xdb   :  { %1925 = vmatprep.subr.bf16.mxu1 %v7763_v50  ;;  %v7851_v50 = vld [vmem:[#allocation4 + $0x628] ss:$16 sps:$4 sm:$0xff]  }
  0xdd   :  { %1883 = vmatpush1.bf16.msra.mxu0 %v7758_v51  ;;  %v7856_v51 = vld [vmem:[#allocation4 + $0x40c] ss:$16 sps:$4 sm:$0xff]  }
  0xde   :  { %1926 = vmatpush1.bf16.msra.mxu1 %v7761_v52  ;;  %1884 = vmatprep.subr.bf16.mxu0 %v7766_v53  ;;  %v7859_v52 = vld [vmem:[#allocation4 + $0x60c] ss:$16 sps:$4 sm:$0xff]   ;;  %v7854_v53 = vld [vmem:[#allocation4 + $0x408] ss:$16 sps:$4 sm:$0xff]  }
  0xdf   :  { %1927 = vmatprep.subr.bf16.mxu1 %v7769_v55  ;;  %v7857_v55 = vld [vmem:[#allocation4 + $0x608] ss:$16 sps:$4 sm:$0xff]  }
  0xe1   :  { %1885 = vmatpush2.bf16.msra.mxu0 %v7764_v57  ;;  %v7862_v57 = vld [vmem:[#allocation4 + $0x5ec] ss:$16 sps:$4 sm:$0xff]  }
  0xe2   :  { %1928 = vmatpush2.bf16.msra.mxu1 %v7767_v58  ;;  %1886 = vmatprep.subr.bf16.mxu0 %v7772_v59  ;;  %v7865_v58 = vld [vmem:[#allocation4 + $0x7ec] ss:$16 sps:$4 sm:$0xff]   ;;  %v7860_v59 = vld [vmem:[#allocation4 + $0x5e8] ss:$16 sps:$4 sm:$0xff]  }
  0xe3   :  { %1929 = vmatprep.subr.bf16.mxu1 %v7775_v60  ;;  %v7863_v60 = vld [vmem:[#allocation4 + $0x7e8] ss:$16 sps:$4 sm:$0xff]  }
  0xe5   :  { %1887 = vmatpush2.bf16.msra.mxu0 %v7770_v61  ;;  %v7868_v61 = vld [vmem:[#allocation4 + $0x5cc] ss:$16 sps:$4 sm:$0xff]  }
  0xe6   :  { %1930 = vmatpush2.bf16.msra.mxu1 %v7773_v62  ;;  %1888 = vmatprep.subr.bf16.mxu0 %v7778_v63  ;;  %v7871_v62 = vld [vmem:[#allocation4 + $0x7cc] ss:$16 sps:$4 sm:$0xff]   ;;  %v7866_v63 = vld [vmem:[#allocation4 + $0x5c8] ss:$16 sps:$4 sm:$0xff]  }
  0xe7   :  { %1931 = vmatprep.subr.bf16.mxu1 %v7781_v0  ;;  %v7869_v0 = vld [vmem:[#allocation4 + $0x7c8] ss:$16 sps:$4 sm:$0xff]  }
  0xe9   :  { %1889 = vmatpush2.bf16.msra.mxu0 %v7776_v1  ;;  %v7874_v1 = vld [vmem:[#allocation4 + $0x5ac] ss:$16 sps:$4 sm:$0xff]  }
  0xea   :  { %1932 = vmatpush2.bf16.msra.mxu1 %v7779_v2  ;;  %1890 = vmatprep.subr.bf16.mxu0 %v7784_v3  ;;  %v7877_v2 = vld [vmem:[#allocation4 + $0x7ac] ss:$16 sps:$4 sm:$0xff]   ;;  %v7872_v3 = vld [vmem:[#allocation4 + $0x5a8] ss:$16 sps:$4 sm:$0xff]  }
  0xeb   :  { %1933 = vmatprep.subr.bf16.mxu1 %v7787_v4  ;;  %v7875_v4 = vld [vmem:[#allocation4 + $0x7a8] ss:$16 sps:$4 sm:$0xff]  }
  0xed   :  { %1891 = vmatpush2.bf16.msra.mxu0 %v7782_v5  ;;  %v7880_v5 = vld [vmem:[#allocation4 + $0x58c] ss:$16 sps:$4 sm:$0xff]  }
  0xee   :  { %1934 = vmatpush2.bf16.msra.mxu1 %v7785_v6  ;;  %1892 = vmatprep.subr.bf16.mxu0 %v7790_v7  ;;  %v7883_v6 = vld [vmem:[#allocation4 + $0x78c] ss:$16 sps:$4 sm:$0xff]   ;;  %v7878_v7 = vld [vmem:[#allocation4 + $0x588] ss:$16 sps:$4 sm:$0xff]  }
  0xef   :  { %1935 = vmatprep.subr.bf16.mxu1 %v7793_v8  ;;  %v7881_v8 = vld [vmem:[#allocation4 + $0x788] ss:$16 sps:$4 sm:$0xff]  }
  0xf1   :  { %1893 = vmatpush2.bf16.msra.mxu0 %v7788_v11  ;;  %v7886_v11 = vld [vmem:[#allocation4 + $0x56c] ss:$16 sps:$4 sm:$0xff]  }
  0xf2   :  { %1936 = vmatpush2.bf16.msra.mxu1 %v7791_v12  ;;  %1894 = vmatprep.subr.bf16.mxu0 %v7796_v13  ;;  %v7889_v12 = vld [vmem:[#allocation4 + $0x76c] ss:$16 sps:$4 sm:$0xff]   ;;  %v7884_v13 = vld [vmem:[#allocation4 + $0x568] ss:$16 sps:$4 sm:$0xff]  }
  0xf3   :  { %1937 = vmatprep.subr.bf16.mxu1 %v7799_v14  ;;  %v7887_v14 = vld [vmem:[#allocation4 + $0x768] ss:$16 sps:$4 sm:$0xff]  }
  0xf5   :  { %1895 = vmatpush2.bf16.msra.mxu0 %v7794_v15  ;;  %v7892_v15 = vld [vmem:[#allocation4 + $0x54c] ss:$16 sps:$4 sm:$0xff]  }
  0xf6   :  { %1938 = vmatpush2.bf16.msra.mxu1 %v7797_v16  ;;  %1896 = vmatprep.subr.bf16.mxu0 %v7802_v17  ;;  %v7895_v16 = vld [vmem:[#allocation4 + $0x74c] ss:$16 sps:$4 sm:$0xff]   ;;  %v7890_v17 = vld [vmem:[#allocation4 + $0x548] ss:$16 sps:$4 sm:$0xff]  }
  0xf7   :  { %1939 = vmatprep.subr.bf16.mxu1 %v7805_v18  ;;  %v7893_v18 = vld [vmem:[#allocation4 + $0x748] ss:$16 sps:$4 sm:$0xff]  }
  0xf9   :  { %1897 = vmatpush2.bf16.msra.mxu0 %v7800_v19  ;;  %v7898_v19 = vld [vmem:[#allocation4 + $0x52c] ss:$16 sps:$4 sm:$0xff]  }
  0xfa   :  { %1940 = vmatpush2.bf16.msra.mxu1 %v7803_v20  ;;  %1898 = vmatprep.subr.bf16.mxu0 %v7808_v23  ;;  %v7901_v20 = vld [vmem:[#allocation4 + $0x72c] ss:$16 sps:$4 sm:$0xff]   ;;  %v7896_v23 = vld [vmem:[#allocation4 + $0x528] ss:$16 sps:$4 sm:$0xff]  }
  0xfb   :  { %1941 = vmatprep.subr.bf16.mxu1 %v7811_v24  ;;  %v7899_v24 = vld [vmem:[#allocation4 + $0x728] ss:$16 sps:$4 sm:$0xff]  }
  0xfd   :  { %1899 = vmatpush2.bf16.msra.mxu0 %v7806_v25  ;;  %v7904_v25 = vld [vmem:[#allocation4 + $0x50c] ss:$16 sps:$4 sm:$0xff]  }
  0xfe   :  { %1942 = vmatpush2.bf16.msra.mxu1 %v7809_v26  ;;  %1954 = vmatprep.subr.bf16.mxu0 %v7814_v27  ;;  %v7907_v26 = vld [vmem:[#allocation4 + $0x70c] ss:$16 sps:$4 sm:$0xff]   ;;  %v7902_v27 = vld [vmem:[#allocation4 + $0x508] ss:$16 sps:$4 sm:$0xff]  }
  0xff   :  { %1997 = vmatprep.subr.bf16.mxu1 %v7817_v28  ;;  %v7905_v28 = vld [vmem:[#allocation4 + $0x708] ss:$16 sps:$4 sm:$0xff]  }
 0x100   :  { %1901 = vmatmul.mubr.bf16.vlgmr.msra.gmra.mxu0 %v8973_v9  ;;  %v7835_v9 = vld [vmem:[#allocation4 + $0x68c] ss:$16 sps:$4 sm:$0xff]  }
 0x101   :  { %1944 = vmatmul.mubr.bf16.vlgmr.msra.gmra.mxu1 %v8975_v10  ;;  %1955 = vmatpush1.bf16.msra.mxu0 %v7812_v29  ;;  %v7830_v10 = vld [vmem:[#allocation4 + $0x488] ss:$16 sps:$4 sm:$0xff]  }
 0x102   :  { %1998 = vmatpush1.bf16.msra.mxu1 %v7815_v30  ;;  %1956 = vmatprep.subr.bf16.mxu0 %v7820_v31  ;;  %v7910_v29 = vld [vmem:[#allocation8 + $0xe4] ss:$16 sps:$4 sm:$0xff]   ;;  %v7908_v30 = vld [vmem:[#allocation8 + $0xe0] ss:$16 sps:$4 sm:$0xff]  }
 0x103   :  { %1999 = vmatprep.subr.bf16.mxu1 %v7823_v32  ;;  %1986 = vmatprep.mubr.bf16.mxu0 %v9001_v42  ;;  %v7844_v42 = vld [vmem:[#allocation4 + $0x44c] ss:$16 sps:$4 sm:$0xff]   ;;  %v7913_v31 = vld [vmem:[#allocation8 + $0xc4] ss:$16 sps:$4 sm:$0xff]  }
 0x104   :  { %2029 = vmatprep.mubr.bf16.mxu1 %v9005_v44  ;;  %v7847_v44 = vld [vmem:[#allocation4 + $0x64c] ss:$16 sps:$4 sm:$0xff]  }
 0x105   :  { %1957 = vmatpush1.bf16.msra.mxu0 %v7818_v33 }
 0x106   :  { %2000 = vmatpush1.bf16.msra.mxu1 %v7821_v34  ;;  %1958 = vmatprep.subr.bf16.mxu0 %v7826_v35  ;;  %v7911_v34 = vld [vmem:[#allocation8 + $0xc0] ss:$16 sps:$4 sm:$0xff]  }
 0x107   :  { %2001 = vmatprep.subr.bf16.mxu1 %v7829_v36 }
 0x109   :  { %1959 = vmatpush1.bf16.msra.mxu0 %v7824_v37  ;;  %v7916_v37 = vld [vmem:[#allocation8 + $0xa4] ss:$16 sps:$4 sm:$0xff]  }
 0x10a   :  { %2002 = vmatpush1.bf16.msra.mxu1 %v7827_v38  ;;  %1960 = vmatprep.subr.bf16.mxu0 %v7832_v39 }
 0x10b   :  { %2003 = vmatprep.subr.bf16.mxu1 %v7835_v9 }
 0x10d   :  { %1961 = vmatpush1.bf16.msra.mxu0 %v7830_v10  ;;  %v7914_v10 = vld [vmem:[#allocation8 + $0xa0] ss:$16 sps:$4 sm:$0xff]  }
 0x10e   :  { %2004 = vmatpush1.bf16.msra.mxu1 %v7833_v54  ;;  %1962 = vmatprep.subr.bf16.mxu0 %v7838_v56 }
 0x10f   :  { %2005 = vmatprep.subr.bf16.mxu1 %v7841_v40 }
 0x111   :  { %1963 = vmatpush1.bf16.msra.mxu0 %v7836_v41  ;;  %v7922_v41 = vld [vmem:[#allocation8 + $0x64] ss:$16 sps:$4 sm:$0xff]  }
 0x112   :  { %2006 = vmatpush1.bf16.msra.mxu1 %v7839_v43  ;;  %1964 = vmatprep.subr.bf16.mxu0 %v7844_v42  ;;  %v7920_v43 = vld [vmem:[#allocation8 + $0x60] ss:$16 sps:$4 sm:$0xff]   ;;  %v7925_v42 = vld [vmem:[#allocation8 + $0x44] ss:$16 sps:$4 sm:$0xff]  }
 0x113   :  { %2007 = vmatprep.subr.bf16.mxu1 %v7847_v44  ;;  %v8004_v44 = vld [vmem:[#allocation8 + $0x2e0] ss:$16 sps:$4 sm:$0xff]  }
 0x115   :  { %1965 = vmatpush1.bf16.msra.mxu0 %v7842_v45  ;;  %v8006_v45 = vld [vmem:[#allocation8 + $0x2e4] ss:$16 sps:$4 sm:$0xff]  }
 0x116   :  { %2008 = vmatpush1.bf16.msra.mxu1 %v7845_v46  ;;  %1966 = vmatprep.subr.bf16.mxu0 %v7850_v47  ;;  %v7923_v46 = vld [vmem:[#allocation8 + $0x40] ss:$16 sps:$4 sm:$0xff]   ;;  %v9039_v47 = vld [vmem:[#allocation8 + $0x24] ss:$16 sps:$4 sm:$0xff]  }
 0x117   :  { %2009 = vmatprep.subr.bf16.mxu1 %v7853_v48  ;;  %v8007_v48 = vld [vmem:[#allocation8 + $0x2c0] ss:$16 sps:$4 sm:$0xff]  }
 0x119   :  { %1967 = vmatpush1.bf16.msra.mxu0 %v7848_v49  ;;  %v8009_v49 = vld [vmem:[#allocation8 + $0x2c4] ss:$16 sps:$4 sm:$0xff]  }
 0x11a   :  { %2010 = vmatpush1.bf16.msra.mxu1 %v7851_v50  ;;  %1968 = vmatprep.subr.bf16.mxu0 %v7856_v51  ;;  %v9041_v50 = vld [vmem:[#allocation8 + $0x20] ss:$16 sps:$4 sm:$0xff]   ;;  %v9043_v51 = vld [vmem:[#allocation8 + $0x4] ss:$16 sps:$4 sm:$0xff]  }
 0x11b   :  { %2011 = vmatprep.subr.bf16.mxu1 %v7859_v52  ;;  %v8010_v52 = vld [vmem:[#allocation8 + $0x2a0] ss:$16 sps:$4 sm:$0xff]  }
 0x11d   :  { %1969 = vmatpush1.bf16.msra.mxu0 %v7854_v53  ;;  %v8012_v53 = vld [vmem:[#allocation8 + $0x2a4] ss:$16 sps:$4 sm:$0xff]  }
 0x11e   :  { %2012 = vmatpush1.bf16.msra.mxu1 %v7857_v55  ;;  %1970 = vmatprep.subr.bf16.mxu0 %v7862_v57  ;;  %v9046_v55 = vld [vmem:[#allocation8] ss:$16 sps:$4 sm:$0xff]   ;;  %v9048_v57 = vld [vmem:[#allocation8 + $0x1e4] ss:$16 sps:$4 sm:$0xff]  }
 0x11f   :  { %2013 = vmatprep.subr.bf16.mxu1 %v7865_v58  ;;  %v8013_v58 = vld [vmem:[#allocation8 + $0x280] ss:$16 sps:$4 sm:$0xff]  }
 0x121   :  { %1971 = vmatpush2.bf16.msra.mxu0 %v7860_v59  ;;  %v8015_v59 = vld [vmem:[#allocation8 + $0x284] ss:$16 sps:$4 sm:$0xff]  }
 0x122   :  { %2014 = vmatpush2.bf16.msra.mxu1 %v7863_v60  ;;  %1972 = vmatprep.subr.bf16.mxu0 %v7868_v61  ;;  %v9052_v60 = vld [vmem:[#allocation8 + $0x1e0] ss:$16 sps:$4 sm:$0xff]   ;;  %v9054_v61 = vld [vmem:[#allocation8 + $0x1c4] ss:$16 sps:$4 sm:$0xff]  }
 0x123   :  { %2015 = vmatprep.subr.bf16.mxu1 %v7871_v62  ;;  %v8016_v62 = vld [vmem:[#allocation8 + $0x260] ss:$16 sps:$4 sm:$0xff]  }
 0x125   :  { %1973 = vmatpush2.bf16.msra.mxu0 %v7866_v63  ;;  %v8018_v63 = vld [vmem:[#allocation8 + $0x264] ss:$16 sps:$4 sm:$0xff]  }
 0x126   :  { %2016 = vmatpush2.bf16.msra.mxu1 %v7869_v0  ;;  %1974 = vmatprep.subr.bf16.mxu0 %v7874_v1  ;;  %v9058_v0 = vld [vmem:[#allocation8 + $0x1c0] ss:$16 sps:$4 sm:$0xff]   ;;  %v9060_v1 = vld [vmem:[#allocation8 + $0x1a4] ss:$16 sps:$4 sm:$0xff]  }
 0x127   :  { %2017 = vmatprep.subr.bf16.mxu1 %v7877_v2  ;;  %v8019_v2 = vld [vmem:[#allocation8 + $0x240] ss:$16 sps:$4 sm:$0xff]  }
 0x129   :  { %1975 = vmatpush2.bf16.msra.mxu0 %v7872_v3  ;;  %v8021_v3 = vld [vmem:[#allocation8 + $0x244] ss:$16 sps:$4 sm:$0xff]  }
 0x12a   :  { %2018 = vmatpush2.bf16.msra.mxu1 %v7875_v4  ;;  %1976 = vmatprep.subr.bf16.mxu0 %v7880_v5  ;;  %v9064_v4 = vld [vmem:[#allocation8 + $0x1a0] ss:$16 sps:$4 sm:$0xff]   ;;  %v9066_v5 = vld [vmem:[#allocation8 + $0x184] ss:$16 sps:$4 sm:$0xff]  }
 0x12b   :  { %2019 = vmatprep.subr.bf16.mxu1 %v7883_v6  ;;  %v8022_v6 = vld [vmem:[#allocation8 + $0x220] ss:$16 sps:$4 sm:$0xff]  }
 0x12d   :  { %1977 = vmatpush2.bf16.msra.mxu0 %v7878_v7  ;;  %v8024_v7 = vld [vmem:[#allocation8 + $0x224] ss:$16 sps:$4 sm:$0xff]  }
 0x12e   :  { %2020 = vmatpush2.bf16.msra.mxu1 %v7881_v8  ;;  %1978 = vmatprep.subr.bf16.mxu0 %v7886_v11  ;;  %v9070_v8 = vld [vmem:[#allocation8 + $0x180] ss:$16 sps:$4 sm:$0xff]   ;;  %v9072_v11 = vld [vmem:[#allocation8 + $0x164] ss:$16 sps:$4 sm:$0xff]  }
 0x12f   :  { %2021 = vmatprep.subr.bf16.mxu1 %v7889_v12  ;;  %v8025_v12 = vld [vmem:[#allocation8 + $0x200] ss:$16 sps:$4 sm:$0xff]  }
 0x131   :  { %1979 = vmatpush2.bf16.msra.mxu0 %v7884_v13  ;;  %v8027_v13 = vld [vmem:[#allocation8 + $0x204] ss:$16 sps:$4 sm:$0xff]  }
 0x132   :  { %2022 = vmatpush2.bf16.msra.mxu1 %v7887_v14  ;;  %1980 = vmatprep.subr.bf16.mxu0 %v7892_v15  ;;  %v9076_v14 = vld [vmem:[#allocation8 + $0x160] ss:$16 sps:$4 sm:$0xff]   ;;  %v9078_v15 = vld [vmem:[#allocation8 + $0x144] ss:$16 sps:$4 sm:$0xff]  }
 0x133   :  { %2023 = vmatprep.subr.bf16.mxu1 %v7895_v16  ;;  %v8028_v16 = vld [vmem:[#allocation8 + $0x3e0] ss:$16 sps:$4 sm:$0xff]  }
 0x135   :  { %1981 = vmatpush2.bf16.msra.mxu0 %v7890_v17  ;;  %v8030_v17 = vld [vmem:[#allocation8 + $0x3e4] ss:$16 sps:$4 sm:$0xff]  }
 0x136   :  { %2024 = vmatpush2.bf16.msra.mxu1 %v7893_v18  ;;  %1982 = vmatprep.subr.bf16.mxu0 %v7898_v19  ;;  %v9082_v18 = vld [vmem:[#allocation8 + $0x140] ss:$16 sps:$4 sm:$0xff]   ;;  %v9084_v19 = vld [vmem:[#allocation8 + $0x124] ss:$16 sps:$4 sm:$0xff]  }
 0x137   :  { %2025 = vmatprep.subr.bf16.mxu1 %v7901_v20  ;;  %v8031_v20 = vld [vmem:[#allocation8 + $0x3c0] ss:$16 sps:$4 sm:$0xff]  }
 0x139   :  { %1983 = vmatpush2.bf16.msra.mxu0 %v7896_v23  ;;  %v8033_v23 = vld [vmem:[#allocation8 + $0x3c4] ss:$16 sps:$4 sm:$0xff]  }
 0x13a   :  { %2026 = vmatpush2.bf16.msra.mxu1 %v7899_v24  ;;  %1984 = vmatprep.subr.bf16.mxu0 %v7904_v25  ;;  %v9088_v24 = vld [vmem:[#allocation8 + $0x120] ss:$16 sps:$4 sm:$0xff]   ;;  %v9090_v25 = vld [vmem:[#allocation8 + $0x104] ss:$16 sps:$4 sm:$0xff]  }
 0x13b   :  { %2027 = vmatprep.subr.bf16.mxu1 %v7907_v26  ;;  %v8034_v26 = vld [vmem:[#allocation8 + $0x3a0] ss:$16 sps:$4 sm:$0xff]  }
 0x13d   :  { %1985 = vmatpush2.bf16.msra.mxu0 %v7902_v27  ;;  %v8036_v27 = vld [vmem:[#allocation8 + $0x3a4] ss:$16 sps:$4 sm:$0xff]  }
 0x13e   :  { %2028 = vmatpush2.bf16.msra.mxu1 %v7905_v28  ;;  %2919 = vmatprep.subr.bf16.mxu0 %v7910_v29  ;;  %v2069_v28 = vlaneseq  ;;  %v9094_v29 = vld [vmem:[#allocation8 + $0x100] ss:$16 sps:$4 sm:$0xff]  }
 0x13f   :  { %2960 = vmatprep.subr.bf16.mxu1 %v8006_v45  ;;  %v8045_v45 = vld [vmem:[#allocation8 + $0x344] ss:$16 sps:$4 sm:$0xff]  }
 0x140   :  { %v9025_v32 = vpop.f32.mrf.mxu0  ;;  %1987 = vmatmul.mubr.bf16.vlgmr.msra.gmra.mxu0 %v9011_v21  ;;  %v7919_v21 = vld [vmem:[#allocation8 + $0x84] ss:$16 sps:$4 sm:$0xff]  }
 0x141   :  { %v9027_v33 = vpop.f32.mrf.mxu1  ;;  %2030 = vmatmul.mubr.bf16.vlgmr.msra.gmra.mxu1 %v9015_v22  ;;  %2920 = vmatpush1.bf16.msra.mxu0 %v7908_v30  ;;  %v7917_v22 = vld [vmem:[#allocation8 + $0x80] ss:$16 sps:$4 sm:$0xff]   ;;  %v9096_v30 = vld [vmem:[#allocation8 + $0xec] ss:$16 sps:$4 sm:$0xff]  }
 0x142   :  { %v9031_v35 = vpop.f32.mrf.mxu0  ;;  %2921 = vmatprep.subr.bf16.mxu0 %v7913_v31  ;;  %2961 = vmatpush1.bf16.msra.mxu1 %v8004_v44  ;;  %v8037_v31 = vld [vmem:[#allocation8 + $0x380] ss:$16 sps:$4 sm:$0xff]  }
 0x143   :  { %v9033_v36 = vpop.f32.mrf.mxu1  ;;  %2962 = vmatprep.subr.bf16.mxu1 %v8009_v49  ;;  %v8043_v49 = vld [vmem:[#allocation8 + $0x340] ss:$16 sps:$4 sm:$0xff]  }
 0x144   :  { %v1734_v38 = vpop.f32.mrf.mxu0 }
 0x145   :  { %v1777_v39 = vpop.f32.mrf.mxu1  ;;  %2922 = vmatpush1.bf16.msra.mxu0 %v7911_v34  ;;  %v8039_v34 = vld [vmem:[#allocation8 + $0x384] ss:$16 sps:$4 sm:$0xff]  }
 0x146   :  { %v9035_v9 = vadd.f32 %v1777_v39, %v1734_v38  ;;  %v1736_v54 = vpop.f32.mrf.mxu0  ;;  %2923 = vmatprep.subr.bf16.mxu0 %v7916_v37  ;;  %2963 = vmatpush1.bf16.msra.mxu1 %v8007_v48  ;;  %v9098_v37 = vshrl.u32 %v2069_v28, 7  ;;  %v9102_v38 = vld [vmem:[#allocation6] sm:$0xf]  ;;  %v8040_v39 = vld [vmem:[#allocation8 + $0x360] ss:$16 sps:$4 sm:$0xff]  }
 0x147   :  { %v1779_v56 = vpop.f32.mrf.mxu1  ;;  %2964 = vmatprep.subr.bf16.mxu1 %v8012_v53 }
 0x148   :  { %v9037_v40 = vadd.f32 %v1779_v56, %v1736_v54  ;;  %v9105_v54 = vsub.s32 0, %v9098_v37  ;;  %v1774_v56 = vadd.f32 %v9027_v33, %v9025_v32 }
 0x149   :  { %2924 = vmatpush1.bf16.msra.mxu0 %v7914_v10  ;;  %v8042_v10 = vld [vmem:[#allocation8 + $0x364] ss:$16 sps:$4 sm:$0xff]  }
 0x14a   :  { %2925 = vmatprep.subr.bf16.mxu0 %v7919_v21  ;;  %2965 = vmatpush1.bf16.msra.mxu1 %v8010_v52  ;;  %11404 = vst [vmem:[#allocation15_spill] sm:$0xff] %v9105_v54  ;;  %v9112_v21 = vsub.s32 1, %v9098_v37  ;;  %v2072_v44 = vrot.slane %v9102_v38, %v9105_v54  ;;  %v9229_v54 = vld [vmem:[#allocation8 + $0x128] ss:$16 sps:$4 sm:$0xff]  }
 0x14b   :  { %2966 = vmatprep.subr.bf16.mxu1 %v8015_v59  ;;  %11415 = vst [vmem:[#allocation26_spill] sm:$0xff] %v9229_v54 }
 0x14c   :  { %11405 = vst [vmem:[#allocation16_spill] sm:$0xff] %v9112_v21  ;;  %v2076_v32 = vrot.slane %v9102_v38, %v9112_v21 }
 0x14d   :  { %2926 = vmatpush1.bf16.msra.mxu0 %v7917_v22 }
 0x14e   :  { %2927 = vmatprep.subr.bf16.mxu0 %v7922_v41  ;;  %2967 = vmatpush1.bf16.msra.mxu1 %v8013_v58 }
 0x14f   :  { %2968 = vmatprep.subr.bf16.mxu1 %v8018_v63 }
 0x151   :  { %2928 = vmatpush1.bf16.msra.mxu0 %v7920_v43  ;;  %v1776_v43 = vadd.f32 %v9033_v36, %v9031_v35 }
 0x152   :  { %2929 = vmatprep.subr.bf16.mxu0 %v7925_v42  ;;  %2969 = vmatpush1.bf16.msra.mxu1 %v8016_v62  ;;  %v8048_v62 = vld [vmem:[#allocation8 + $0x324] ss:$16 sps:$4 sm:$0xff]  }
 0x153   :  { %2970 = vmatprep.subr.bf16.mxu1 %v8021_v3 }
 0x155   :  { %2930 = vmatpush1.bf16.msra.mxu0 %v7923_v46 }
 0x156   :  { %2931 = vmatprep.subr.bf16.mxu0 %v9039_v47  ;;  %2971 = vmatpush1.bf16.msra.mxu1 %v8019_v2  ;;  %v8046_v2 = vld [vmem:[#allocation8 + $0x320] ss:$16 sps:$4 sm:$0xff]  }
 0x157   :  { %2972 = vmatprep.subr.bf16.mxu1 %v8024_v7 }
 0x159   :  { %2932 = vmatpush1.bf16.msra.mxu0 %v9041_v50 }
 0x15a   :  { %2933 = vmatprep.subr.bf16.mxu0 %v9043_v51  ;;  %2973 = vmatpush1.bf16.msra.mxu1 %v8022_v6 }
 0x15b   :  { %2974 = vmatprep.subr.bf16.mxu1 %v8027_v13 }
 0x15d   :  { %2934 = vmatpush1.bf16.msra.mxu0 %v9046_v55 }
 0x15e   :  { %2935 = vmatprep.subr.bf16.mxu0 %v9048_v57  ;;  %2975 = vmatpush1.bf16.msra.mxu1 %v8025_v12 }
 0x15f   :  { %2976 = vmatprep.subr.bf16.mxu1 %v8030_v17 }
 0x161   :  { %2936 = vmatpush2.bf16.msra.mxu0 %v9052_v60 }
 0x162   :  { %2937 = vmatprep.subr.bf16.mxu0 %v9054_v61  ;;  %2977 = vmatpush2.bf16.msra.mxu1 %v8028_v16 }
 0x163   :  { %2978 = vmatprep.subr.bf16.mxu1 %v8033_v23 }
 0x165   :  { %2938 = vmatpush2.bf16.msra.mxu0 %v9058_v0 }
 0x166   :  { %2939 = vmatprep.subr.bf16.mxu0 %v9060_v1  ;;  %2979 = vmatpush2.bf16.msra.mxu1 %v8031_v20  ;;  %v9124_v20 = vld [vmem:[#allocation8 + $0x304] ss:$16 sps:$4 sm:$0xff]  }
 0x167   :  { %2980 = vmatprep.subr.bf16.mxu1 %v8036_v27  ;;  %11406 = vst [vmem:[#allocation17_spill] sm:$0xff] %v9124_v20  ;;  %v9128_v27 = vld [vmem:[#allocation8 + $0x300] ss:$16 sps:$4 sm:$0xff]  }
 0x168   :  { %11407 = vst [vmem:[#allocation18_spill] sm:$0xff] %v9128_v27 }
 0x169   :  { %2940 = vmatpush2.bf16.msra.mxu0 %v9064_v4 }
 0x16a   :  { %2941 = vmatprep.subr.bf16.mxu0 %v9066_v5  ;;  %2981 = vmatpush2.bf16.msra.mxu1 %v8034_v26  ;;  %v9126_v26 = vld [vmem:[#allocation8 + $0xe8] ss:$16 sps:$4 sm:$0xff]  }
 0x16b   :  { %2982 = vmatprep.subr.bf16.mxu1 %v8039_v34 }
 0x16d   :  { %2942 = vmatpush2.bf16.msra.mxu0 %v9070_v8 }
 0x16e   :  { %2943 = vmatprep.subr.bf16.mxu0 %v9072_v11  ;;  %2983 = vmatpush2.bf16.msra.mxu1 %v8037_v31  ;;  %v9130_v31 = vld [vmem:[#allocation8 + $0xcc] ss:$16 sps:$4 sm:$0xff]  }
 0x16f   :  { %2984 = vmatprep.subr.bf16.mxu1 %v8042_v10  ;;  %v9138_v10 = vld [vmem:[#allocation8 + $0x2ec] ss:$16 sps:$4 sm:$0xff]  }
 0x170   :  { %11408 = vst [vmem:[#allocation19_spill] sm:$0xff] %v9138_v10 }
 0x171   :  { %2944 = vmatpush2.bf16.msra.mxu0 %v9076_v14 }
 0x172   :  { %2945 = vmatprep.subr.bf16.mxu0 %v9078_v15  ;;  %2985 = vmatpush2.bf16.msra.mxu1 %v8040_v39 }
 0x173   :  { %2986 = vmatprep.subr.bf16.mxu1 %v8045_v45  ;;  %v9161_v45 = vld [vmem:[#allocation8 + $0x68] ss:$16 sps:$4 sm:$0xff]  }
 0x175   :  { %2946 = vmatpush2.bf16.msra.mxu0 %v9082_v18 }
 0x176   :  { %2947 = vmatprep.subr.bf16.mxu0 %v9084_v19  ;;  %2987 = vmatpush2.bf16.msra.mxu1 %v8043_v49  ;;  %v9169_v49 = vld [vmem:[#allocation8 + $0x2c] ss:$16 sps:$4 sm:$0xff]  }
 0x177   :  { %2988 = vmatprep.subr.bf16.mxu1 %v8048_v62  ;;  %v9197_v62 = vld [vmem:[#allocation8 + $0x1a8] ss:$16 sps:$4 sm:$0xff]  }
 0x179   :  { %2948 = vmatpush2.bf16.msra.mxu0 %v9088_v24 }
 0x17a   :  { %2949 = vmatprep.subr.bf16.mxu0 %v9090_v25  ;;  %2989 = vmatpush2.bf16.msra.mxu1 %v8046_v2  ;;  %v9203_v2 = vld [vmem:[#allocation8 + $0x188] ss:$16 sps:$4 sm:$0xff]  }
 0x17b   :  { %2990 = vmatprep.subr.bf16.mxu1 %v9124_v20  ;;  %11409 = vst [vmem:[#allocation20_spill] sm:$0xff] %v9203_v2 }
 0x17d   :  { %2950 = vmatpush2.bf16.msra.mxu0 %v9094_v29 }
 0x17e   :  { %3001 = vmatprep.subr.bf16.mxu0 %v9096_v30  ;;  %2991 = vmatpush2.bf16.msra.mxu1 %v9128_v27  ;;  %v9234_v27 = vld [vmem:[#allocation8 + $0x10c] ss:$16 sps:$4 sm:$0xff]  }
 0x17f   :  { %3042 = vmatprep.subr.bf16.mxu1 %v9138_v10  ;;  %11416 = vst [vmem:[#allocation27_spill] sm:$0xff] %v9234_v27 }
 0x180   :  { %v1816_v22 = vpop.f32.mrf.mxu0 }
 0x181   :  { %v1859_v41 = vpop.f32.mrf.mxu1  ;;  %v1817_v42 = vadd.f32 %v1816_v22, %v1774_v56  ;;  %v9140_v56 = vld [vmem:[#allocation8 + $0xc8] ss:$16 sps:$4 sm:$0xff]   ;;  %v9146_v22 = vld [vmem:[#allocation8 + $0xac] ss:$16 sps:$4 sm:$0xff]  }
 0x182   :  { %v1818_v46 = vpop.f32.mrf.mxu0 }
 0x183   :  { %v1861_v48 = vpop.f32.mrf.mxu1  ;;  %v1860_v52 = vadd.f32 %v1859_v41, %v1817_v42  ;;  %v1819_v53 = vadd.f32 %v1818_v46, %v1776_v43  ;;  %v9149_v41 = vld [vmem:[#allocation8 + $0xa8] ss:$16 sps:$4 sm:$0xff]   ;;  %v9151_v43 = vld [vmem:[#allocation8 + $0x8c] ss:$16 sps:$4 sm:$0xff]  }
 0x184   :  { %v1820_v33 = vpop.f32.mrf.mxu0  ;;  %v9155_v42 = vld [vmem:[#allocation8 + $0x88] ss:$16 sps:$4 sm:$0xff]   ;;  %v9163_v46 = vld [vmem:[#allocation8 + $0x4c] ss:$16 sps:$4 sm:$0xff]  }
 0x185   :  { %v2089_v58 = vadd.f32 %v2072_v44, %v1860_v52  ;;  %v1862_v59 = vadd.f32 %v1861_v48, %v1819_v53  ;;  %v1821_v35 = vadd.f32 %v1820_v33, %v9035_v9  ;;  %v1863_v36 = vpop.f32.mrf.mxu1  ;;  %v9167_v48 = vld [vmem:[#allocation8 + $0x48] ss:$16 sps:$4 sm:$0xff]   ;;  %v9175_v53 = vld [vmem:[#allocation8 + $0xc] ss:$16 sps:$4 sm:$0xff]  }
 0x186   :  { %v1822_v63 = vpop.f32.mrf.mxu0  ;;  %v9173_v52 = vld [vmem:[#allocation8 + $0x28] ss:$16 sps:$4 sm:$0xff]   ;;  %v9181_v33 = vld [vmem:[#allocation8 + $0x1ec] ss:$16 sps:$4 sm:$0xff]  }
 0x187   :  { %vm2097_vm0 = vcmp.ge.f32.partialorder %v2089_v58, 0.0  ;;  %v2105_v3 = vmul.f32 0.01, %v2089_v58  ;;  %v2090_v6 = vadd.f32 %v2076_v32, %v1862_v59  ;;  %v1864_v7 = vadd.f32 %v1863_v36, %v1821_v35  ;;  %v1865_v17 = vpop.f32.mrf.mxu1  ;;  %v9187_v59 = vld [vmem:[#allocation8 + $0x1cc] ss:$16 sps:$4 sm:$0xff]  }
 0x188   :  { %v1823_v12 = vadd.f32 %v1822_v63, %v9037_v40  ;;  %v9191_v35 = vld [vmem:[#allocation8 + $0x1c8] ss:$16 sps:$4 sm:$0xff]   ;;  %v9193_v36 = vld [vmem:[#allocation8 + $0x1ac] ss:$16 sps:$4 sm:$0xff]  }
 0x189   :  { %v2106_v13 = vmul.f32 0.01, %v2090_v6  ;;  %v9122_v16 = vadd.f32 %v2072_v44, %v1864_v7  ;;  %vm2098_vm1 = vcmp.ge.f32.partialorder %v2090_v6, 0.0  ;;  %v2113_v9 = vsel %vm2097_vm0, %v2089_v58, %v2105_v3  ;;  %v9157_v44 = vld [vmem:[#allocation8 + $0x6c] ss:$16 sps:$4 sm:$0xff]  }
 0x18a   :  { %v1866_v23 = vadd.f32 %v1865_v17, %v1823_v12  ;;  %v9136_v39 = vpack.c.bf16 %v2113_v9, %v2113_v9  ;;  %v9185_v58 = vld [vmem:[#allocation8 + $0x1e8] ss:$16 sps:$4 sm:$0xff]   ;;  %v9199_v63 = vld [vmem:[#allocation8 + $0x18c] ss:$16 sps:$4 sm:$0xff]  }
 0x18b   :  { %v2114_v28 = vsel %vm2098_vm1, %v2090_v6, %v2106_v13  ;;  %v9205_v3 = vld [vmem:[#allocation8 + $0x16c] ss:$16 sps:$4 sm:$0xff]   ;;  %v9209_v6 = vld [vmem:[#allocation8 + $0x168] ss:$16 sps:$4 sm:$0xff]   ;;  %vm2101_vm3 = vcmp.ge.f32.partialorder %v9122_v16, 0.0 }
 0x18c   :  { %v9133_v40 = vadd.f32 %v2076_v32, %v1866_v23  ;;  %v2122_v34 = vpack.c.bf16 %v2114_v28, %v2114_v28  ;;  %v9179_v32 = vld [vmem:[#allocation8 + $0x8] ss:$16 sps:$4 sm:$0xff]   ;;  %11410 = vst [vmem:[#allocation21_spill] sm:$0xff] %v9205_v3  ;;  %11411 = vst [vmem:[#allocation22_spill] sm:$0xff] %v9209_v6  ;;  %v9211_v7 = vld [vmem:[#allocation8 + $0x14c] ss:$16 sps:$4 sm:$0xff]  }
 0x18d   :  { %11412 = vst [vmem:[#allocation23_spill] sm:$0xff] %v9211_v7  ;;  %v9219_v17 = vld [vmem:[#allocation8 + $0x148] ss:$16 sps:$4 sm:$0xff]   ;;  %v9222_v9 = vld [vmem:[#allocation8 + $0x12c] ss:$16 sps:$4 sm:$0xff]  }
 0x18e   :  { %2951 = vmatprep.mubr.bf16.mxu0 %v2122_v34  ;;  %11413 = vst [vmem:[#allocation24_spill] sm:$0xff] %v9219_v17  ;;  %11414 = vst [vmem:[#allocation25_spill] sm:$0xff] %v9222_v9  ;;  %vm2102_vm2 = vcmp.ge.f32.partialorder %v9133_v40, 0.0 }
 0x18f   :  { %2952 = vmatmul.mubr.bf16.vlgmr.msra.gmra.mxu0 %v9136_v39 }
 0x190   :  { %3002 = vmatpush1.bf16.msra.mxu0 %v9126_v26  ;;  %3033 = vmatprep.mubr.bf16.mxu0 %v2122_v34 }
 0x191   :  { %3003 = vmatprep.subr.bf16.mxu0 %v9130_v31 }
 0x194   :  { %3004 = vmatpush1.bf16.msra.mxu0 %v9140_v56 }
 0x195   :  { %3005 = vmatprep.subr.bf16.mxu0 %v9146_v22 }
 0x198   :  { %3006 = vmatpush1.bf16.msra.mxu0 %v9149_v41 }
 0x199   :  { %3007 = vmatprep.subr.bf16.mxu0 %v9151_v43 }
 0x19c   :  { %3008 = vmatpush1.bf16.msra.mxu0 %v9155_v42 }
 0x19d   :  { %3009 = vmatprep.subr.bf16.mxu0 %v9157_v44 }
 0x1a0   :  { %3010 = vmatpush1.bf16.msra.mxu0 %v9161_v45 }
 0x1a1   :  { %3011 = vmatprep.subr.bf16.mxu0 %v9163_v46 }
 0x1a4   :  { %3012 = vmatpush1.bf16.msra.mxu0 %v9167_v48 }
 0x1a5   :  { %3013 = vmatprep.subr.bf16.mxu0 %v9169_v49 }
 0x1a8   :  { %3014 = vmatpush1.bf16.msra.mxu0 %v9173_v52 }
 0x1a9   :  { %3015 = vmatprep.subr.bf16.mxu0 %v9175_v53 }
 0x1ac   :  { %3016 = vmatpush1.bf16.msra.mxu0 %v9179_v32 }
 0x1ad   :  { %3017 = vmatprep.subr.bf16.mxu0 %v9181_v33 }
 0x1b0   :  { %3018 = vmatpush2.bf16.msra.mxu0 %v9185_v58 }
 0x1b1   :  { %3019 = vmatprep.subr.bf16.mxu0 %v9187_v59 }
 0x1b4   :  { %3020 = vmatpush2.bf16.msra.mxu0 %v9191_v35 }
 0x1b5   :  { %3021 = vmatprep.subr.bf16.mxu0 %v9193_v36 }
 0x1b8   :  { %3022 = vmatpush2.bf16.msra.mxu0 %v9197_v62 }
 0x1b9   :  { %3023 = vmatprep.subr.bf16.mxu0 %v9199_v63 }
 0x1bc   :  { %3024 = vmatpush2.bf16.msra.mxu0 %v9203_v2  ;;  %v9240_v2 = vld [vmem:[#allocation8 + $0x108] ss:$16 sps:$4 sm:$0xff]  }
 0x1bd   :  { %3025 = vmatprep.subr.bf16.mxu0 %v9205_v3 }
 0x1c0   :  { %3026 = vmatpush2.bf16.msra.mxu0 %v9209_v6  ;;  %v9215_v12 = vpop.f32.mrf.mxu0  ;;  %v2110_v6 = vmul.f32 0.01, %v9133_v40 }
 0x1c1   :  { %v9217_v13 = vpop.f32.mrf.mxu1  ;;  %3027 = vmatprep.subr.bf16.mxu0 %v9211_v7 }
 0x1c2   :  { %v9224_v23 = vpop.f32.mrf.mxu0 }
 0x1c3   :  { %v9226_v28 = vpop.f32.mrf.mxu1 }
 0x1c4   :  { %3028 = vmatpush2.bf16.msra.mxu0 %v9219_v17  ;;  %v1906_v34 = vpop.f32.mrf.mxu0  ;;  %v8744_v17 = vld [vmem:[#allocation8 + $0xa4] ss:$16 sps:$4 sm:$0xff]  }
 0x1c5   :  { %v1949_v21 = vpop.f32.mrf.mxu1  ;;  %3029 = vmatprep.subr.bf16.mxu0 %v9222_v9 }
 0x1c6   :  { %v9231_v10 = vadd.f32 %v1949_v21, %v1906_v34  ;;  %v1908_v20 = vpop.f32.mrf.mxu0  ;;  %v2118_v21 = vsel %vm2102_vm2, %v9133_v40, %v2110_v6  ;;  %v8740_v34 = vld [vmem:[#allocation8 + $0xe4] ss:$16 sps:$4 sm:$0xff]   ;;  %v8747_v6 = vld [vmem:[#allocation8 + $0x80] ss:$16 sps:$4 sm:$0xff]  }
 0x1c7   :  { %v1951_v7 = vpop.f32.mrf.mxu1  ;;  %v9246_v9 = vpack.c.bf16 %v2118_v21, %v2118_v21  ;;  %v8746_v40 = vld [vmem:[#allocation8 + $0x84] ss:$16 sps:$4 sm:$0xff]  }
 0x1c8   :  { %v9237_v3 = vadd.f32 %v1951_v7, %v1908_v20  ;;  %3030 = vmatpush2.bf16.msra.mxu0 %v9229_v54  ;;  %v8741_v20 = vld [vmem:[#allocation8 + $0xe0] ss:$16 sps:$4 sm:$0xff]   ;;  %v8742_v7 = vld [vmem:[#allocation8 + $0xc4] ss:$16 sps:$4 sm:$0xff]  }
 0x1c9   :  { %3031 = vmatprep.subr.bf16.mxu0 %v9234_v27  ;;  %v8743_v54 = vld [vmem:[#allocation8 + $0xc0] ss:$16 sps:$4 sm:$0xff]   ;;  %v8748_v21 = vld [vmem:[#allocation8 + $0x64] ss:$16 sps:$4 sm:$0xff]  }
 0x1ca   :  { %v8745_v27 = vld [vmem:[#allocation8 + $0xa0] ss:$16 sps:$4 sm:$0xff]  }
 0x1cc   :  { %3032 = vmatpush2.bf16.msra.mxu0 %v9240_v2 }
 0x1cd   :  { %3091 = vmatprep.subr.bf16.mxu0 %v8740_v34  ;;  %v8749_v34 = vld [vmem:[#allocation8 + $0x60] ss:$16 sps:$4 sm:$0xff]  }
 0x1cf   :  { %3034 = vmatmul.mubr.bf16.vlgmr.msra.gmra.mxu0 %v9136_v39  ;;  %v8750_v39 = vld [vmem:[#allocation8 + $0x44] ss:$16 sps:$4 sm:$0xff]  }
 0x1d0   :  { %3092 = vmatpush1.bf16.msra.mxu0 %v8741_v20  ;;  %3123 = vmatprep.mubr.bf16.mxu0 %v9246_v9  ;;  %v8751_v20 = vld [vmem:[#allocation8 + $0x40] ss:$16 sps:$4 sm:$0xff]  }
 0x1d1   :  { %3093 = vmatprep.subr.bf16.mxu0 %v8742_v7 }
 0x1d4   :  { %3094 = vmatpush1.bf16.msra.mxu0 %v8743_v54 }
 0x1d5   :  { %3095 = vmatprep.subr.bf16.mxu0 %v8744_v17 }
 0x1d8   :  { %3096 = vmatpush1.bf16.msra.mxu0 %v8745_v27 }
 0x1d9   :  { %3097 = vmatprep.subr.bf16.mxu0 %v8746_v40 }
 0x1dc   :  { %3098 = vmatpush1.bf16.msra.mxu0 %v8747_v6 }
 0x1dd   :  { %3099 = vmatprep.subr.bf16.mxu0 %v8748_v21 }
 0x1e0   :  { %3100 = vmatpush1.bf16.msra.mxu0 %v8749_v34 }
 0x1e1   :  { %3101 = vmatprep.subr.bf16.mxu0 %v8750_v39 }
 0x1e4   :  { %3102 = vmatpush1.bf16.msra.mxu0 %v8751_v20 }
 0x1e5   :  { %3103 = vmatprep.subr.bf16.mxu0 %v9039_v47  ;;  %v9264_v47 = vsub.s32 2, %v9098_v37 }
 0x1e7   :  { %11417 = vst [vmem:[#allocation28_spill] sm:$0xff] %v9264_v47 }
 0x1e8   :  { %3104 = vmatpush1.bf16.msra.mxu0 %v9041_v50  ;;  %v1946_v50 = vadd.f32 %v9217_v13, %v9215_v12 }
 0x1e9   :  { %3105 = vmatprep.subr.bf16.mxu0 %v9043_v51  ;;  %v9269_v51 = vsub.s32 3, %v9098_v37 }
 0x1eb   :  { %11418 = vst [vmem:[#allocation29_spill] sm:$0xff] %v9269_v51 }
 0x1ec   :  { %3106 = vmatpush1.bf16.msra.mxu0 %v9046_v55 }
 0x1ed   :  { %3107 = vmatprep.subr.bf16.mxu0 %v9048_v57 }
 0x1f0   :  { %3108 = vmatpush2.bf16.msra.mxu0 %v9052_v60  ;;  %v1948_v60 = vadd.f32 %v9226_v28, %v9224_v23 }
 0x1f1   :  { %3109 = vmatprep.subr.bf16.mxu0 %v9054_v61 }
 0x1f4   :  { %3110 = vmatpush2.bf16.msra.mxu0 %v9058_v0  ;;  %v2080_v0 = vrot.slane %v9102_v38, %v9264_v47 }
 0x1f5   :  { %3111 = vmatprep.subr.bf16.mxu0 %v9060_v1 }
 0x1f8   :  { %3112 = vmatpush2.bf16.msra.mxu0 %v9064_v4 }
 0x1f9   :  { %3113 = vmatprep.subr.bf16.mxu0 %v9066_v5 }
 0x1fc   :  { %3114 = vmatpush2.bf16.msra.mxu0 %v9070_v8 }
 0x1fd   :  { %3115 = vmatprep.subr.bf16.mxu0 %v9072_v11  ;;  %v2084_v11 = vrot.slane %v9102_v38, %v9269_v51 }
 0x200   :  { %3116 = vmatpush2.bf16.msra.mxu0 %v9076_v14  ;;  %v1988_v55 = vpop.f32.mrf.mxu0 }
 0x201   :  { %v2031_v57 = vpop.f32.mrf.mxu1  ;;  %v1989_v61 = vadd.f32 %v1988_v55, %v1946_v50  ;;  %3117 = vmatprep.subr.bf16.mxu0 %v9078_v15  ;;  %v2109_v15 = vmul.f32 0.01, %v9122_v16  ;;  %v9395_v50 = vld [vmem:[#allocation8 + $0x368] ss:$16 sps:$4 sm:$0xff]   ;;  %v9399_v55 = vld [vmem:[#allocation8 + $0x34c] ss:$16 sps:$4 sm:$0xff]  }
 0x202   :  { %v1990_v1 = vpop.f32.mrf.mxu0 }
 0x203   :  { %v2033_v4 = vpop.f32.mrf.mxu1  ;;  %v2032_v5 = vadd.f32 %v2031_v57, %v1989_v61  ;;  %v1991_v8 = vadd.f32 %v1990_v1, %v1948_v60  ;;  %v9403_v57 = vld [vmem:[#allocation8 + $0x348] ss:$16 sps:$4 sm:$0xff]   ;;  %v9407_v60 = vld [vmem:[#allocation8 + $0x32c] ss:$16 sps:$4 sm:$0xff]  }
 0x204   :  { %3118 = vmatpush2.bf16.msra.mxu0 %v9082_v18  ;;  %v1992_v14 = vpop.f32.mrf.mxu0  ;;  %v11423_v61 = vld [vmem:[#allocation24_spill] sm:$0xff]  ;;  %v11424_v1 = vld [vmem:[#allocation25_spill] sm:$0xff] }
 0x205   :  { %v2091_v37 = vadd.f32 %v2080_v0, %v2032_v5  ;;  %v2034_v54 = vadd.f32 %v2033_v4, %v1991_v8  ;;  %v1993_v27 = vadd.f32 %v1992_v14, %v9231_v10  ;;  %v2035_v12 = vpop.f32.mrf.mxu1  ;;  %3119 = vmatprep.subr.bf16.mxu0 %v9084_v19  ;;  %v2117_v19 = vsel %vm2101_vm3, %v9122_v16, %v2109_v15  ;;  %v9309_v16 = vld [vmem:[#allocation8 + $0x2ac] ss:$16 sps:$4 sm:$0xff]   ;;  %v11426_v14 = vld [vmem:[#allocation27_spill] sm:$0xff] }
 0x206   :  { %v1994_v13 = vpop.f32.mrf.mxu0  ;;  %v9415_v4 = vld [vmem:[#allocation8 + $0x30c] ss:$16 sps:$4 sm:$0xff]  }
 0x207   :  { %vm2099_vm4 = vcmp.ge.f32.partialorder %v2091_v37, 0.0  ;;  %v2107_v17 = vmul.f32 0.01, %v2091_v37  ;;  %v2092_v23 = vadd.f32 %v2084_v11, %v2034_v54  ;;  %v2036_v28 = vadd.f32 %v2035_v12, %v1993_v27  ;;  %v2037_v10 = vpop.f32.mrf.mxu1  ;;  %v11425_v8 = vld [vmem:[#allocation26_spill] sm:$0xff]  ;;  %v8752_v27 = vld [vmem:[#allocation8 + $0x2e4] ss:$16 sps:$4 sm:$0xff]  }
 0x208   :  { %v1995_v38 = vadd.f32 %v1994_v13, %v9237_v3  ;;  %3120 = vmatpush2.bf16.msra.mxu0 %v9088_v24  ;;  %v9293_v3 = vld [vmem:[#allocation8 + $0x2e8] ss:$16 sps:$4 sm:$0xff]   ;;  %v9295_v24 = vpack.c.bf16 %v2117_v19, %v2117_v19  ;;  %v9430_v12 = vld [vmem:[#allocation8 + $0x4e0] ss:$16 sps:$4 sm:$0xff]   ;;  %v9435_v13 = vld [vmem:[#allocation8 + $0x4c4] ss:$16 sps:$4 sm:$0xff]  }
 0x209   :  { %v2108_v18 = vmul.f32 0.01, %v2092_v23  ;;  %v9286_v7 = vadd.f32 %v2080_v0, %v2036_v28  ;;  %3121 = vmatprep.subr.bf16.mxu0 %v9090_v25  ;;  %vm2100_vm5 = vcmp.ge.f32.partialorder %v2092_v23, 0.0  ;;  %v2115_v40 = vsel %vm2099_vm4, %v2091_v37, %v2107_v17  ;;  %v9300_v25 = vld [vmem:[#allocation8 + $0x2cc] ss:$16 sps:$4 sm:$0xff]  }
 0x20a   :  { %v2038_v6 = vadd.f32 %v2037_v10, %v1995_v38  ;;  %v9297_v20 = vpack.c.bf16 %v2115_v40, %v2115_v40  ;;  %v9411_v0 = vld [vmem:[#allocation8 + $0x328] ss:$16 sps:$4 sm:$0xff]   ;;  %v9425_v37 = vld [vmem:[#allocation8 + $0x4e4] ss:$16 sps:$4 sm:$0xff]   ;;  %v9445_v38 = vld [vmem:[#allocation8 + $0x4c0] ss:$16 sps:$4 sm:$0xff]  }
 0x20b   :  { %v2116_v21 = vsel %vm2100_vm5, %v2092_v23, %v2108_v18  ;;  %v8753_v23 = vld [vmem:[#allocation8 + $0x2e0] ss:$16 sps:$4 sm:$0xff]   ;;  %v8754_v28 = vld [vmem:[#allocation8 + $0x2c4] ss:$16 sps:$4 sm:$0xff]   ;;  %vm2103_vm7 = vcmp.ge.f32.partialorder %v9286_v7, 0.0 }
 0x20c   :  { %v9290_v34 = vadd.f32 %v2084_v11, %v2038_v6  ;;  %3122 = vmatpush2.bf16.msra.mxu0 %v9094_v29  ;;  %v2124_v39 = vpack.c.bf16 %v2116_v21, %v2116_v21  ;;  %v9306_v29 = vld [vmem:[#allocation8 + $0x2c8] ss:$16 sps:$4 sm:$0xff]   ;;  %v9448_v18 = vld [vmem:[#allocation8 + $0x4a4] ss:$16 sps:$4 sm:$0xff]   ;;  %v8755_v19 = vld [vmem:[#allocation8 + $0x2c0] ss:$16 sps:$4 sm:$0xff]  }
 0x20d   :  { %3173 = vmatprep.subr.bf16.mxu0 %v9096_v30  ;;  %v9315_v30 = vld [vmem:[#allocation8 + $0x2a8] ss:$16 sps:$4 sm:$0xff]   ;;  %v8756_v6 = vld [vmem:[#allocation8 + $0x2a4] ss:$16 sps:$4 sm:$0xff]   ;;  %v9451_v21 = vld [vmem:[#allocation8 + $0x4a0] ss:$16 sps:$4 sm:$0xff]  }
 0x20e   :  { %2992 = vmatprep.mubr.bf16.mxu1 %v2124_v39  ;;  %v2112_v5 = vmul.f32 0.01, %v9290_v34  ;;  %v9420_v11 = vld [vmem:[#allocation8 + $0x308] ss:$16 sps:$4 sm:$0xff]   ;;  %vm2104_vm6 = vcmp.ge.f32.partialorder %v9290_v34, 0.0 }
 0x20f   :  { %3124 = vmatmul.mubr.bf16.vlgmr.msra.gmra.mxu0 %v9295_v24  ;;  %2993 = vmatmul.mubr.bf16.vlgmr.msra.gmra.mxu1 %v9297_v20 }
 0x210   :  { %3043 = vmatpush1.bf16.msra.mxu1 %v9293_v3  ;;  %3174 = vmatpush1.bf16.msra.mxu0 %v9126_v26  ;;  %v9319_v26 = vld [vmem:[#allocation8 + $0x28c] ss:$16 sps:$4 sm:$0xff]   ;;  %v2120_v54 = vsel %vm2104_vm6, %v9290_v34, %v2112_v5  ;;  %v9454_v34 = vld [vmem:[#allocation8 + $0x484] ss:$16 sps:$4 sm:$0xff]  }
 0x211   :  { %3205 = vmatprep.mubr.bf16.mxu0 %v9246_v9  ;;  %3074 = vmatprep.mubr.bf16.mxu1 %v2124_v39  ;;  %v9323_v9 = vld [vmem:[#allocation8 + $0x288] ss:$16 sps:$4 sm:$0xff]   ;;  %v9433_v15 = vpack.c.bf16 %v2120_v54, %v2120_v54  ;;  %v8757_v39 = vld [vmem:[#allocation8 + $0x2a0] ss:$16 sps:$4 sm:$0xff]   ;;  %v8762_v5 = vld [vmem:[#allocation8 + $0x244] ss:$16 sps:$4 sm:$0xff]  }
 0x212   :  { %3044 = vmatprep.subr.bf16.mxu1 %v9300_v25  ;;  %3175 = vmatprep.subr.bf16.mxu0 %v9130_v31  ;;  %v9327_v31 = vld [vmem:[#allocation8 + $0x26c] ss:$16 sps:$4 sm:$0xff]   ;;  %v8763_v54 = vld [vmem:[#allocation8 + $0x240] ss:$16 sps:$4 sm:$0xff]  }
 0x214   :  { %3045 = vmatpush1.bf16.msra.mxu1 %v9306_v29  ;;  %3176 = vmatpush1.bf16.msra.mxu0 %v9140_v56  ;;  %v9331_v56 = vld [vmem:[#allocation8 + $0x268] ss:$16 sps:$4 sm:$0xff]  }
 0x215   :  { %3046 = vmatprep.subr.bf16.mxu1 %v9309_v16  ;;  %3177 = vmatprep.subr.bf16.mxu0 %v9146_v22  ;;  %v9335_v22 = vld [vmem:[#allocation8 + $0x24c] ss:$16 sps:$4 sm:$0xff]  }
 0x218   :  { %3047 = vmatpush1.bf16.msra.mxu1 %v9315_v30  ;;  %3178 = vmatpush1.bf16.msra.mxu0 %v9149_v41  ;;  %v9339_v41 = vld [vmem:[#allocation8 + $0x248] ss:$16 sps:$4 sm:$0xff]  }
 0x219   :  { %3048 = vmatprep.subr.bf16.mxu1 %v9319_v26  ;;  %3179 = vmatprep.subr.bf16.mxu0 %v9151_v43  ;;  %v9343_v43 = vld [vmem:[#allocation8 + $0x22c] ss:$16 sps:$4 sm:$0xff]  }
 0x21c   :  { %3049 = vmatpush1.bf16.msra.mxu1 %v9323_v9  ;;  %3180 = vmatpush1.bf16.msra.mxu0 %v9155_v42  ;;  %v9347_v42 = vld [vmem:[#allocation8 + $0x228] ss:$16 sps:$4 sm:$0xff]  }
 0x21d   :  { %3050 = vmatprep.subr.bf16.mxu1 %v9327_v31  ;;  %3181 = vmatprep.subr.bf16.mxu0 %v9157_v44  ;;  %v9351_v44 = vld [vmem:[#allocation8 + $0x20c] ss:$16 sps:$4 sm:$0xff]  }
 0x220   :  { %3051 = vmatpush1.bf16.msra.mxu1 %v9331_v56  ;;  %3182 = vmatpush1.bf16.msra.mxu0 %v9161_v45  ;;  %v9355_v45 = vld [vmem:[#allocation8 + $0x208] ss:$16 sps:$4 sm:$0xff]  }
 0x221   :  { %3052 = vmatprep.subr.bf16.mxu1 %v9335_v22  ;;  %3183 = vmatprep.subr.bf16.mxu0 %v9163_v46  ;;  %v9359_v46 = vld [vmem:[#allocation8 + $0x3ec] ss:$16 sps:$4 sm:$0xff]  }
 0x224   :  { %3053 = vmatpush1.bf16.msra.mxu1 %v9339_v41  ;;  %3184 = vmatpush1.bf16.msra.mxu0 %v9167_v48  ;;  %v9363_v48 = vld [vmem:[#allocation8 + $0x3e8] ss:$16 sps:$4 sm:$0xff]  }
 0x225   :  { %3054 = vmatprep.subr.bf16.mxu1 %v9343_v43  ;;  %3185 = vmatprep.subr.bf16.mxu0 %v9169_v49  ;;  %v9367_v49 = vld [vmem:[#allocation8 + $0x3cc] ss:$16 sps:$4 sm:$0xff]  }
 0x228   :  { %3055 = vmatpush1.bf16.msra.mxu1 %v9347_v42  ;;  %3186 = vmatpush1.bf16.msra.mxu0 %v9173_v52  ;;  %v9371_v52 = vld [vmem:[#allocation8 + $0x3c8] ss:$16 sps:$4 sm:$0xff]  }
 0x229   :  { %3056 = vmatprep.subr.bf16.mxu1 %v9351_v44  ;;  %3187 = vmatprep.subr.bf16.mxu0 %v9175_v53  ;;  %v9375_v53 = vld [vmem:[#allocation8 + $0x3ac] ss:$16 sps:$4 sm:$0xff]  }
 0x22c   :  { %3057 = vmatpush1.bf16.msra.mxu1 %v9355_v45  ;;  %3188 = vmatpush1.bf16.msra.mxu0 %v9179_v32  ;;  %v9379_v32 = vld [vmem:[#allocation8 + $0x3a8] ss:$16 sps:$4 sm:$0xff]  }
 0x22d   :  { %3058 = vmatprep.subr.bf16.mxu1 %v9359_v46  ;;  %3189 = vmatprep.subr.bf16.mxu0 %v9181_v33  ;;  %v9383_v33 = vld [vmem:[#allocation8 + $0x38c] ss:$16 sps:$4 sm:$0xff]  }
 0x230   :  { %3059 = vmatpush2.bf16.msra.mxu1 %v9363_v48  ;;  %3190 = vmatpush2.bf16.msra.mxu0 %v9185_v58  ;;  %v9387_v58 = vld [vmem:[#allocation8 + $0x388] ss:$16 sps:$4 sm:$0xff]  }
 0x231   :  { %3060 = vmatprep.subr.bf16.mxu1 %v9367_v49  ;;  %3191 = vmatprep.subr.bf16.mxu0 %v9187_v59  ;;  %v9391_v59 = vld [vmem:[#allocation8 + $0x36c] ss:$16 sps:$4 sm:$0xff]  }
 0x234   :  { %3061 = vmatpush2.bf16.msra.mxu1 %v9371_v52  ;;  %3192 = vmatpush2.bf16.msra.mxu0 %v9191_v35  ;;  %v11419_v35 = vld [vmem:[#allocation20_spill] sm:$0xff] }
 0x235   :  { %3062 = vmatprep.subr.bf16.mxu1 %v9375_v53  ;;  %3193 = vmatprep.subr.bf16.mxu0 %v9193_v36  ;;  %v11420_v36 = vld [vmem:[#allocation21_spill] sm:$0xff] }
 0x238   :  { %3063 = vmatpush2.bf16.msra.mxu1 %v9379_v32  ;;  %3194 = vmatpush2.bf16.msra.mxu0 %v9197_v62  ;;  %v11421_v62 = vld [vmem:[#allocation22_spill] sm:$0xff] }
 0x239   :  { %3064 = vmatprep.subr.bf16.mxu1 %v9383_v33  ;;  %3195 = vmatprep.subr.bf16.mxu0 %v9199_v63  ;;  %v11422_v63 = vld [vmem:[#allocation23_spill] sm:$0xff] }
 0x23c   :  { %3065 = vmatpush2.bf16.msra.mxu1 %v9387_v58  ;;  %3196 = vmatpush2.bf16.msra.mxu0 %v11419_v35  ;;  %v9460_v35 = vld [vmem:[#allocation8 + $0x464] ss:$16 sps:$4 sm:$0xff]  }
 0x23d   :  { %3066 = vmatprep.subr.bf16.mxu1 %v9391_v59  ;;  %3197 = vmatprep.subr.bf16.mxu0 %v11420_v36  ;;  %v8759_v36 = vld [vmem:[#allocation8 + $0x280] ss:$16 sps:$4 sm:$0xff]  }
 0x240   :  { %3067 = vmatpush2.bf16.msra.mxu1 %v9395_v50  ;;  %3198 = vmatpush2.bf16.msra.mxu0 %v11421_v62  ;;  %v8760_v62 = vld [vmem:[#allocation8 + $0x264] ss:$16 sps:$4 sm:$0xff]  }
 0x241   :  { %3068 = vmatprep.subr.bf16.mxu1 %v9399_v55  ;;  %3199 = vmatprep.subr.bf16.mxu0 %v11422_v63  ;;  %v9463_v63 = vld [vmem:[#allocation8 + $0x460] ss:$16 sps:$4 sm:$0xff]  }
 0x244   :  { %3069 = vmatpush2.bf16.msra.mxu1 %v9403_v57  ;;  %3200 = vmatpush2.bf16.msra.mxu0 %v11423_v61  ;;  %v9466_v61 = vld [vmem:[#allocation8 + $0x444] ss:$16 sps:$4 sm:$0xff]  }
 0x245   :  { %3070 = vmatprep.subr.bf16.mxu1 %v9407_v60  ;;  %3201 = vmatprep.subr.bf16.mxu0 %v11424_v1  ;;  %v8761_v1 = vld [vmem:[#allocation8 + $0x260] ss:$16 sps:$4 sm:$0xff]  }
 0x248   :  { %3071 = vmatpush2.bf16.msra.mxu1 %v9411_v0  ;;  %3202 = vmatpush2.bf16.msra.mxu0 %v11425_v8  ;;  %v9469_v8 = vld [vmem:[#allocation8 + $0x440] ss:$16 sps:$4 sm:$0xff]  }
 0x249   :  { %3072 = vmatprep.subr.bf16.mxu1 %v9415_v4  ;;  %3203 = vmatprep.subr.bf16.mxu0 %v11426_v14  ;;  %v9472_v14 = vld [vmem:[#allocation8 + $0x424] ss:$16 sps:$4 sm:$0xff]  }
 0x24c   :  { %3073 = vmatpush2.bf16.msra.mxu1 %v9420_v11  ;;  %3204 = vmatpush2.bf16.msra.mxu0 %v9240_v2 }
 0x24d   :  { %3132 = vmatprep.subr.bf16.mxu1 %v8752_v27  ;;  %4055 = vmatprep.subr.bf16.mxu0 %v9425_v37  ;;  %v8764_v27 = vld [vmem:[#allocation8 + $0x224] ss:$16 sps:$4 sm:$0xff]  }
 0x24f   :  { %3075 = vmatmul.mubr.bf16.vlgmr.msra.gmra.mxu1 %v9297_v20  ;;  %3206 = vmatmul.mubr.bf16.vlgmr.msra.gmra.mxu0 %v9295_v24  ;;  %v9439_v17 = vpop.f32.mrf.mxu0  ;;  %v8758_v24 = vld [vmem:[#allocation8 + $0x284] ss:$16 sps:$4 sm:$0xff]   ;;  %v9457_v20 = vld [vmem:[#allocation8 + $0x480] ss:$16 sps:$4 sm:$0xff]  }
 0x250   :  { %3133 = vmatpush1.bf16.msra.mxu1 %v8753_v23  ;;  %3164 = vmatprep.mubr.bf16.mxu1 %v9433_v15  ;;  %v9475_v23 = vld [vmem:[#allocation8 + $0x420] ss:$16 sps:$4 sm:$0xff]  }
 0x251   :  { %v9442_v2 = vpop.f32.mrf.mxu0  ;;  %3134 = vmatprep.subr.bf16.mxu1 %v8754_v28  ;;  %4056 = vmatpush1.bf16.msra.mxu0 %v9430_v12  ;;  %v9478_v28 = vld [vmem:[#allocation8 + $0x404] ss:$16 sps:$4 sm:$0xff]  }
 0x252   :  { %4057 = vmatprep.subr.bf16.mxu0 %v9435_v13 }
 0x253   :  { %v2957_v10 = vpop.f32.mrf.mxu0 }
 0x254   :  { %3135 = vmatpush1.bf16.msra.mxu1 %v8755_v19  ;;  %v8765_v10 = vld [vmem:[#allocation8 + $0x220] ss:$16 sps:$4 sm:$0xff]   ;;  %v8766_v19 = vld [vmem:[#allocation8 + $0x204] ss:$16 sps:$4 sm:$0xff]  }
 0x255   :  { %v2958_v40 = vpop.f32.mrf.mxu0  ;;  %3136 = vmatprep.subr.bf16.mxu1 %v8756_v6  ;;  %4058 = vmatpush1.bf16.msra.mxu0 %v9445_v38  ;;  %v9484_v6 = vld [vmem:[#allocation8 + $0x5e4] ss:$16 sps:$4 sm:$0xff]  }
 0x256   :  { %4059 = vmatprep.subr.bf16.mxu0 %v9448_v18  ;;  %v9481_v40 = vld [vmem:[#allocation8 + $0x400] ss:$16 sps:$4 sm:$0xff]   ;;  %11427 = vst [vmem:[#allocation20_spill] sm:$0xff] %v9484_v6 }
 0x258   :  { %3137 = vmatpush1.bf16.msra.mxu1 %v8757_v39  ;;  %v8767_v39 = vld [vmem:[#allocation8 + $0x200] ss:$16 sps:$4 sm:$0xff]  }
 0x259   :  { %3138 = vmatprep.subr.bf16.mxu1 %v8758_v24  ;;  %4060 = vmatpush1.bf16.msra.mxu0 %v9451_v21  ;;  %v8768_v24 = vld [vmem:[#allocation8 + $0x3e4] ss:$16 sps:$4 sm:$0xff]  }
 0x25a   :  { %4061 = vmatprep.subr.bf16.mxu0 %v9454_v34 }
 0x25c   :  { %3139 = vmatpush1.bf16.msra.mxu1 %v8759_v36  ;;  %v9487_v36 = vld [vmem:[#allocation8 + $0x5e0] ss:$16 sps:$4 sm:$0xff]  }
 0x25d   :  { %3140 = vmatprep.subr.bf16.mxu1 %v8760_v62  ;;  %4062 = vmatpush1.bf16.msra.mxu0 %v9457_v20  ;;  %11428 = vst [vmem:[#allocation21_spill] sm:$0xff] %v9487_v36  ;;  %v9490_v62 = vld [vmem:[#allocation8 + $0x5c4] ss:$16 sps:$4 sm:$0xff]  }
 0x25e   :  { %4063 = vmatprep.subr.bf16.mxu0 %v9460_v35  ;;  %11429 = vst [vmem:[#allocation22_spill] sm:$0xff] %v9490_v62 }
 0x260   :  { %3141 = vmatpush1.bf16.msra.mxu1 %v8761_v1  ;;  %v8769_v1 = vld [vmem:[#allocation8 + $0x3e0] ss:$16 sps:$4 sm:$0xff]  }
 0x261   :  { %3142 = vmatprep.subr.bf16.mxu1 %v8762_v5  ;;  %4064 = vmatpush1.bf16.msra.mxu0 %v9463_v63  ;;  %v8770_v5 = vld [vmem:[#allocation8 + $0x3c4] ss:$16 sps:$4 sm:$0xff]  }
 0x262   :  { %4065 = vmatprep.subr.bf16.mxu0 %v9466_v61 }
 0x264   :  { %3143 = vmatpush1.bf16.msra.mxu1 %v8763_v54  ;;  %v9493_v54 = vld [vmem:[#allocation8 + $0x5c0] ss:$16 sps:$4 sm:$0xff]  }
 0x265   :  { %3144 = vmatprep.subr.bf16.mxu1 %v8764_v27  ;;  %4066 = vmatpush1.bf16.msra.mxu0 %v9469_v8  ;;  %11430 = vst [vmem:[#allocation23_spill] sm:$0xff] %v9493_v54  ;;  %v9496_v27 = vld [vmem:[#allocation8 + $0x5a4] ss:$16 sps:$4 sm:$0xff]  }
 0x266   :  { %4067 = vmatprep.subr.bf16.mxu0 %v9472_v14  ;;  %11431 = vst [vmem:[#allocation24_spill] sm:$0xff] %v9496_v27 }
 0x268   :  { %3145 = vmatpush1.bf16.msra.mxu1 %v8765_v10  ;;  %v8771_v10 = vld [vmem:[#allocation8 + $0x3c0] ss:$16 sps:$4 sm:$0xff]  }
 0x269   :  { %3146 = vmatprep.subr.bf16.mxu1 %v8766_v19  ;;  %4068 = vmatpush1.bf16.msra.mxu0 %v9475_v23  ;;  %v8772_v19 = vld [vmem:[#allocation8 + $0x3a4] ss:$16 sps:$4 sm:$0xff]  }
 0x26a   :  { %4069 = vmatprep.subr.bf16.mxu0 %v9478_v28 }
 0x26c   :  { %3147 = vmatpush1.bf16.msra.mxu1 %v8767_v39  ;;  %v9499_v39 = vld [vmem:[#allocation8 + $0x5a0] ss:$16 sps:$4 sm:$0xff]  }
 0x26d   :  { %3148 = vmatprep.subr.bf16.mxu1 %v8768_v24  ;;  %4070 = vmatpush1.bf16.msra.mxu0 %v9481_v40  ;;  %11432 = vst [vmem:[#allocation25_spill] sm:$0xff] %v9499_v39  ;;  %v9502_v24 = vld [vmem:[#allocation8 + $0x584] ss:$16 sps:$4 sm:$0xff]  }
 0x26e   :  { %4071 = vmatprep.subr.bf16.mxu0 %v9484_v6  ;;  %11433 = vst [vmem:[#allocation26_spill] sm:$0xff] %v9502_v24  ;;  %v11442_v6 = vld [vmem:[#allocation19_spill] sm:$0xff] }
 0x270   :  { %3149 = vmatpush2.bf16.msra.mxu1 %v8769_v1  ;;  %v8773_v1 = vld [vmem:[#allocation8 + $0x3a0] ss:$16 sps:$4 sm:$0xff]  }
 0x271   :  { %3150 = vmatprep.subr.bf16.mxu1 %v8770_v5  ;;  %4072 = vmatpush2.bf16.msra.mxu0 %v9487_v36  ;;  %v8774_v5 = vld [vmem:[#allocation8 + $0x384] ss:$16 sps:$4 sm:$0xff]   ;;  %v11441_v36 = vld [vmem:[#allocation18_spill] sm:$0xff] }
 0x272   :  { %4073 = vmatprep.subr.bf16.mxu0 %v9490_v62  ;;  %v9505_v62 = vld [vmem:[#allocation8 + $0x580] ss:$16 sps:$4 sm:$0xff]  }
 0x273   :  { %11434 = vst [vmem:[#allocation27_spill] sm:$0xff] %v9505_v62 }
 0x274   :  { %3151 = vmatpush2.bf16.msra.mxu1 %v8771_v10  ;;  %v9508_v10 = vld [vmem:[#allocation8 + $0x564] ss:$16 sps:$4 sm:$0xff]  }
 0x275   :  { %3152 = vmatprep.subr.bf16.mxu1 %v8772_v19  ;;  %4074 = vmatpush2.bf16.msra.mxu0 %v9493_v54  ;;  %11435 = vst [vmem:[#allocation30_spill] sm:$0xff] %v9508_v10  ;;  %v8775_v19 = vld [vmem:[#allocation8 + $0x380] ss:$16 sps:$4 sm:$0xff]   ;;  %v8776_v54 = vld [vmem:[#allocation8 + $0x364] ss:$16 sps:$4 sm:$0xff]  }
 0x276   :  { %4075 = vmatprep.subr.bf16.mxu0 %v9496_v27  ;;  %v9511_v27 = vld [vmem:[#allocation8 + $0x560] ss:$16 sps:$4 sm:$0xff]  }
 0x277   :  { %11436 = vst [vmem:[#allocation31_spill] sm:$0xff] %v9511_v27 }
 0x278   :  { %3153 = vmatpush2.bf16.msra.mxu1 %v8773_v1  ;;  %v9514_v1 = vld [vmem:[#allocation8 + $0x544] ss:$16 sps:$4 sm:$0xff]  }
 0x279   :  { %3154 = vmatprep.subr.bf16.mxu1 %v8774_v5  ;;  %4076 = vmatpush2.bf16.msra.mxu0 %v9499_v39  ;;  %11437 = vst [vmem:[#allocation32_spill] sm:$0xff] %v9514_v1  ;;  %v8777_v5 = vld [vmem:[#allocation8 + $0x360] ss:$16 sps:$4 sm:$0xff]   ;;  %v8778_v39 = vld [vmem:[#allocation8 + $0x344] ss:$16 sps:$4 sm:$0xff]  }
 0x27a   :  { %4077 = vmatprep.subr.bf16.mxu0 %v9502_v24  ;;  %v9517_v24 = vld [vmem:[#allocation8 + $0x540] ss:$16 sps:$4 sm:$0xff]  }
 0x27b   :  { %11438 = vst [vmem:[#allocation33_spill] sm:$0xff] %v9517_v24 }
 0x27c   :  { %3155 = vmatpush2.bf16.msra.mxu1 %v8775_v19  ;;  %v9520_v19 = vld [vmem:[#allocation8 + $0x524] ss:$16 sps:$4 sm:$0xff]  }
 0x27d   :  { %3156 = vmatprep.subr.bf16.mxu1 %v8776_v54  ;;  %4078 = vmatpush2.bf16.msra.mxu0 %v9505_v62  ;;  %11439 = vst [vmem:[#allocation34_spill] sm:$0xff] %v9520_v19  ;;  %v8779_v54 = vld [vmem:[#allocation8 + $0x340] ss:$16 sps:$4 sm:$0xff]   ;;  %v8780_v62 = vld [vmem:[#allocation8 + $0x324] ss:$16 sps:$4 sm:$0xff]  }
 0x27e   :  { %4079 = vmatprep.subr.bf16.mxu0 %v9508_v10  ;;  %v9523_v10 = vld [vmem:[#allocation8 + $0x520] ss:$16 sps:$4 sm:$0xff]  }
 0x280   :  { %3157 = vmatpush2.bf16.msra.mxu1 %v8777_v5  ;;  %v2111_v5 = vmul.f32 0.01, %v9286_v7 }
 0x281   :  { %3158 = vmatprep.subr.bf16.mxu1 %v8778_v39  ;;  %4080 = vmatpush2.bf16.msra.mxu0 %v9511_v27  ;;  %v9527_v39 = vld [vmem:[#allocation8 + $0x504] ss:$16 sps:$4 sm:$0xff]   ;;  %v8781_v27 = vld [vmem:[#allocation8 + $0x320] ss:$16 sps:$4 sm:$0xff]  }
 0x282   :  { %4081 = vmatprep.subr.bf16.mxu0 %v9514_v1  ;;  %v11440_v1 = vld [vmem:[#allocation17_spill] sm:$0xff] }
 0x284   :  { %3159 = vmatpush2.bf16.msra.mxu1 %v8779_v54  ;;  %v9532_v54 = vld [vmem:[#allocation8 + $0x500] ss:$16 sps:$4 sm:$0xff]  }
 0x285   :  { %3160 = vmatprep.subr.bf16.mxu1 %v8780_v62  ;;  %4082 = vmatpush2.bf16.msra.mxu0 %v9517_v24  ;;  %v2119_v62 = vsel %vm2103_vm7, %v9286_v7, %v2111_v5  ;;  %v9536_v24 = vld [vmem:[#allocation8 + $0x4ec] ss:$16 sps:$4 sm:$0xff]  }
 0x286   :  { %4083 = vmatprep.subr.bf16.mxu0 %v9520_v19  ;;  %v2127_v19 = vpack.c.bf16 %v2119_v62, %v2119_v62  ;;  %v9643_v62 = vld [vmem:[#allocation8 + $0x604] ss:$16 sps:$4 sm:$0xff]  }
 0x287   :  { %11447 = vst [vmem:[#allocation19_spill] sm:$0xff] %v9643_v62 }
 0x288   :  { %3161 = vmatpush2.bf16.msra.mxu1 %v8781_v27 }
 0x289   :  { %3162 = vmatprep.subr.bf16.mxu1 %v11440_v1  ;;  %4084 = vmatpush2.bf16.msra.mxu0 %v9523_v10 }
 0x28a   :  { %4085 = vmatprep.subr.bf16.mxu0 %v9527_v39 }
 0x28c   :  { %3163 = vmatpush2.bf16.msra.mxu1 %v11441_v36 }
 0x28d   :  { %3214 = vmatprep.subr.bf16.mxu1 %v11442_v6  ;;  %4086 = vmatpush2.bf16.msra.mxu0 %v9532_v54  ;;  %v9635_v6 = vld [vmem:[#allocation8 + $0x4cc] ss:$16 sps:$4 sm:$0xff]  }
 0x28e   :  { %4137 = vmatprep.subr.bf16.mxu0 %v9536_v24 }
 0x28f   :  { %v9542_v27 = vpop.f32.mrf.mxu0  ;;  %3165 = vmatmul.mubr.bf16.vlgmr.msra.gmra.mxu1 %v2127_v19 }
 0x290   :  { %3215 = vmatpush1.bf16.msra.mxu1 %v9293_v3  ;;  %3246 = vmatprep.mubr.bf16.mxu1 %v9433_v15  ;;  %v9575_v3 = vld [vmem:[#allocation9] sm:$0xf]  ;;  %v9631_v15 = vld [vmem:[#allocation8 + $0x624] ss:$16 sps:$4 sm:$0xff]  }
 0x291   :  { %v9546_v7 = vpop.f32.mrf.mxu0  ;;  %3216 = vmatprep.subr.bf16.mxu1 %v9300_v25  ;;  %v9579_v25 = vld [vmem:[#allocation8 + $0x6e4] ss:$16 sps:$4 sm:$0xff]   ;;  %11445 = vst [vmem:[#allocation17_spill] sm:$0xff] %v9631_v15 }
 0x293   :  { %v3039_v1 = vpop.f32.mrf.mxu0 }
 0x294   :  { %3217 = vmatpush1.bf16.msra.mxu1 %v9306_v29  ;;  %v11443_v29 = vld [vmem:[#allocation15_spill] sm:$0xff] }
 0x295   :  { %v3040_v36 = vpop.f32.mrf.mxu0  ;;  %3218 = vmatprep.subr.bf16.mxu1 %v9309_v16  ;;  %v9583_v16 = vrot.slane %v9575_v3, %v11443_v29  ;;  %v9647_v1 = vld [vmem:[#allocation8 + $0x4c8] ss:$16 sps:$4 sm:$0xff]  }
 0x296   :  { %v9650_v36 = vld [vmem:[#allocation8 + $0x4ac] ss:$16 sps:$4 sm:$0xff]   ;;  %v9695_v29 = vld [vmem:[#allocation8 + $0x448] ss:$16 sps:$4 sm:$0xff]  }
 0x297   :  { %11456 = vst [vmem:[#allocation43_spill] sm:$0xff] %v9695_v29 }
 0x298   :  { %3219 = vmatpush1.bf16.msra.mxu1 %v9315_v30  ;;  %v11444_v30 = vld [vmem:[#allocation16_spill] sm:$0xff] }
 0x299   :  { %3220 = vmatprep.subr.bf16.mxu1 %v9319_v26  ;;  %v9587_v26 = vrot.slane %v9575_v3, %v11444_v30  ;;  %v9692_v30 = vld [vmem:[#allocation8 + $0x784] ss:$16 sps:$4 sm:$0xff]  }
 0x29a   :  { %11455 = vst [vmem:[#allocation42_spill] sm:$0xff] %v9692_v30 }
 0x29c   :  { %3221 = vmatpush1.bf16.msra.mxu1 %v9323_v9  ;;  %v9590_v9 = vld [vmem:[#allocation8 + $0x6e0] ss:$16 sps:$4 sm:$0xff]  }
 0x29d   :  { %3222 = vmatprep.subr.bf16.mxu1 %v9327_v31  ;;  %v9593_v31 = vld [vmem:[#allocation8 + $0x6c4] ss:$16 sps:$4 sm:$0xff]  }
 0x2a0   :  { %3223 = vmatpush1.bf16.msra.mxu1 %v9331_v56  ;;  %v2954_v56 = vadd.f32 %v9439_v17, %v9583_v16  ;;  %v9633_v17 = vld [vmem:[#allocation8 + $0x4e8] ss:$16 sps:$4 sm:$0xff]  }
 0x2a1   :  { %3224 = vmatprep.subr.bf16.mxu1 %v9335_v22 }
 0x2a4   :  { %3225 = vmatpush1.bf16.msra.mxu1 %v9339_v41 }
 0x2a5   :  { %3226 = vmatprep.subr.bf16.mxu1 %v9343_v43  ;;  %v2956_v43 = vadd.f32 %v9442_v2, %v9587_v26 }
 0x2a8   :  { %3227 = vmatpush1.bf16.msra.mxu1 %v9347_v42 }
 0x2a9   :  { %3228 = vmatprep.subr.bf16.mxu1 %v9351_v44  ;;  %v9602_v44 = vld [vmem:[#allocation8 + $0x6c0] ss:$16 sps:$4 sm:$0xff]  }
 0x2ac   :  { %3229 = vmatpush1.bf16.msra.mxu1 %v9355_v45 }
 0x2ad   :  { %3230 = vmatprep.subr.bf16.mxu1 %v9359_v46 }
 0x2b0   :  { %3231 = vmatpush2.bf16.msra.mxu1 %v9363_v48  ;;  %v9607_v48 = vld [vmem:[#allocation8 + $0x6a4] ss:$16 sps:$4 sm:$0xff]  }
 0x2b1   :  { %3232 = vmatprep.subr.bf16.mxu1 %v9367_v49 }
 0x2b4   :  { %3233 = vmatpush2.bf16.msra.mxu1 %v9371_v52 }
 0x2b5   :  { %3234 = vmatprep.subr.bf16.mxu1 %v9375_v53 }
 0x2b8   :  { %3235 = vmatpush2.bf16.msra.mxu1 %v9379_v32 }
 0x2b9   :  { %3236 = vmatprep.subr.bf16.mxu1 %v9383_v33 }
 0x2bc   :  { %3237 = vmatpush2.bf16.msra.mxu1 %v9387_v58  ;;  %v9610_v58 = vld [vmem:[#allocation8 + $0x6a0] ss:$16 sps:$4 sm:$0xff]  }
 0x2bd   :  { %3238 = vmatprep.subr.bf16.mxu1 %v9391_v59 }
 0x2c0   :  { %3239 = vmatpush2.bf16.msra.mxu1 %v9395_v50 }
 0x2c1   :  { %3240 = vmatprep.subr.bf16.mxu1 %v9399_v55  ;;  %v9613_v55 = vld [vmem:[#allocation8 + $0x684] ss:$16 sps:$4 sm:$0xff]  }
 0x2c4   :  { %3241 = vmatpush2.bf16.msra.mxu1 %v9403_v57  ;;  %v9616_v57 = vld [vmem:[#allocation8 + $0x680] ss:$16 sps:$4 sm:$0xff]  }
 0x2c5   :  { %3242 = vmatprep.subr.bf16.mxu1 %v9407_v60  ;;  %v9619_v60 = vld [vmem:[#allocation8 + $0x664] ss:$16 sps:$4 sm:$0xff]  }
 0x2c8   :  { %3243 = vmatpush2.bf16.msra.mxu1 %v9411_v0  ;;  %v9622_v0 = vld [vmem:[#allocation8 + $0x660] ss:$16 sps:$4 sm:$0xff]  }
 0x2c9   :  { %3244 = vmatprep.subr.bf16.mxu1 %v9415_v4  ;;  %v9625_v4 = vld [vmem:[#allocation8 + $0x644] ss:$16 sps:$4 sm:$0xff]  }
 0x2cc   :  { %3245 = vmatpush2.bf16.msra.mxu1 %v9420_v11  ;;  %v9628_v11 = vld [vmem:[#allocation8 + $0x640] ss:$16 sps:$4 sm:$0xff]  }
 0x2cd   :  { %4096 = vmatprep.subr.bf16.mxu1 %v9579_v25 }
 0x2cf   :  { %v9597_v22 = vpop.f32.mrf.mxu0  ;;  %3247 = vmatmul.mubr.bf16.vlgmr.msra.gmra.mxu1 %v2127_v19  ;;  %v2994_v41 = vpop.f32.mrf.mxu1  ;;  %v9638_v19 = vld [vmem:[#allocation8 + $0x620] ss:$16 sps:$4 sm:$0xff]  }
 0x2d0   :  { %v2995_v42 = vadd.f32 %v2994_v41, %v2954_v56  ;;  %4097 = vmatpush1.bf16.msra.mxu1 %v9590_v9  ;;  %11446 = vst [vmem:[#allocation18_spill] sm:$0xff] %v9638_v19  ;;  %v9653_v56 = vld [vmem:[#allocation8 + $0x600] ss:$16 sps:$4 sm:$0xff]   ;;  %v9656_v41 = vld [vmem:[#allocation8 + $0x7e4] ss:$16 sps:$4 sm:$0xff]  }
 0x2d1   :  { %v9604_v45 = vpop.f32.mrf.mxu0  ;;  %v2996_v46 = vpop.f32.mrf.mxu1  ;;  %4098 = vmatprep.subr.bf16.mxu1 %v9593_v31  ;;  %11448 = vst [vmem:[#allocation35_spill] sm:$0xff] %v9653_v56  ;;  %11449 = vst [vmem:[#allocation36_spill] sm:$0xff] %v9656_v41 }
 0x2d2   :  { %v2997_v49 = vadd.f32 %v2996_v46, %v2956_v43  ;;  %v3083_v52 = vpack.c.bf16 %v2995_v42, %v2995_v42  ;;  %v9659_v43 = vld [vmem:[#allocation8 + $0x4a8] ss:$16 sps:$4 sm:$0xff]   ;;  %v9662_v42 = vld [vmem:[#allocation8 + $0x48c] ss:$16 sps:$4 sm:$0xff]   ;;  %v9665_v46 = vld [vmem:[#allocation8 + $0x7e0] ss:$16 sps:$4 sm:$0xff]  }
 0x2d3   :  { %v3129_v53 = vpop.f32.mrf.mxu0  ;;  %v2998_v32 = vpop.f32.mrf.mxu1  ;;  %11450 = vst [vmem:[#allocation37_spill] sm:$0xff] %v9665_v46 }
 0x2d4   :  { %v3084_v33 = vpack.c.bf16 %v2997_v49, %v2997_v49  ;;  %4099 = vmatpush1.bf16.msra.mxu1 %v9602_v44  ;;  %v9668_v49 = vld [vmem:[#allocation8 + $0x7c4] ss:$16 sps:$4 sm:$0xff]   ;;  %v9674_v53 = vld [vmem:[#allocation8 + $0x46c] ss:$16 sps:$4 sm:$0xff]   ;;  %v9677_v32 = vld [vmem:[#allocation8 + $0x7c0] ss:$16 sps:$4 sm:$0xff]  }
 0x2d5   :  { %v3130_v59 = vpop.f32.mrf.mxu0  ;;  %v2999_v50 = vpop.f32.mrf.mxu1  ;;  %4100 = vmatprep.subr.bf16.mxu1 %v9607_v48  ;;  %11451 = vst [vmem:[#allocation38_spill] sm:$0xff] %v9668_v49  ;;  %11452 = vst [vmem:[#allocation39_spill] sm:$0xff] %v9677_v32 }
 0x2d6   :  { %8676 = vtanh.bf16 %v3084_v33  ;;  %v9680_v33 = vld [vmem:[#allocation8 + $0x7a4] ss:$16 sps:$4 sm:$0xff]   ;;  %v9683_v59 = vld [vmem:[#allocation8 + $0x468] ss:$16 sps:$4 sm:$0xff]   ;;  %v9686_v50 = vld [vmem:[#allocation8 + $0x44c] ss:$16 sps:$4 sm:$0xff]  }
 0x2d7   :  { %8678 = vtanh.bf16 %v3083_v52  ;;  %v9671_v52 = vld [vmem:[#allocation8 + $0x488] ss:$16 sps:$4 sm:$0xff]   ;;  %11453 = vst [vmem:[#allocation40_spill] sm:$0xff] %v9680_v33 }
 0x2d8   :  { %4101 = vmatpush1.bf16.msra.mxu1 %v9610_v58 }
 0x2d9   :  { %4102 = vmatprep.subr.bf16.mxu1 %v9613_v55 }
 0x2dc   :  { %4103 = vmatpush1.bf16.msra.mxu1 %v9616_v57 }
 0x2dd   :  { %4104 = vmatprep.subr.bf16.mxu1 %v9619_v60 }
 0x2e0   :  { %4105 = vmatpush1.bf16.msra.mxu1 %v9622_v0 }
 0x2e1   :  { %4106 = vmatprep.subr.bf16.mxu1 %v9625_v4 }
 0x2e4   :  { %v8677_v2 = vpop.eup %8676  ;;  %4107 = vmatpush1.bf16.msra.mxu1 %v9628_v11 }
 0x2e5   :  { %v9640_v5 = vpop.eup %8678  ;;  %4087 = vmatprep.mubr.bf16.mxu0 %v8677_v2  ;;  %4108 = vmatprep.subr.bf16.mxu1 %v9631_v15 }
 0x2e6   :  { %4088 = vmatmul.mubr.bf16.vlgmr.msra.gmra.mxu0 %v9640_v5 }
 0x2e7   :  { %4138 = vmatpush1.bf16.msra.mxu0 %v9633_v17  ;;  %4169 = vmatprep.mubr.bf16.mxu0 %v8677_v2  ;;  %v9689_v2 = vld [vmem:[#allocation8 + $0x7a0] ss:$16 sps:$4 sm:$0xff]  }
 0x2e8   :  { %4139 = vmatprep.subr.bf16.mxu0 %v9635_v6  ;;  %4109 = vmatpush1.bf16.msra.mxu1 %v9638_v19  ;;  %11454 = vst [vmem:[#allocation41_spill] sm:$0xff] %v9689_v2  ;;  %v9725_v19 = vld [vmem:[#allocation8 + $0x740] ss:$16 sps:$4 sm:$0xff]  }
 0x2e9   :  { %4110 = vmatprep.subr.bf16.mxu1 %v9643_v62  ;;  %v9722_v62 = vld [vmem:[#allocation8 + $0x5ec] ss:$16 sps:$4 sm:$0xff]   ;;  %11466 = vst [vmem:[#allocation53_spill] sm:$0xff] %v9725_v19 }
 0x2ea   :  { %11465 = vst [vmem:[#allocation52_spill] sm:$0xff] %v9722_v62 }
 0x2eb   :  { %4140 = vmatpush1.bf16.msra.mxu0 %v9647_v1 }
 0x2ec   :  { %4141 = vmatprep.subr.bf16.mxu0 %v9650_v36  ;;  %4111 = vmatpush1.bf16.msra.mxu1 %v9653_v56  ;;  %v9713_v56 = vld [vmem:[#allocation8 + $0x760] ss:$16 sps:$4 sm:$0xff]  }
 0x2ed   :  { %4112 = vmatprep.subr.bf16.mxu1 %v9656_v41  ;;  %v9710_v41 = vld [vmem:[#allocation8 + $0x40c] ss:$16 sps:$4 sm:$0xff]   ;;  %11462 = vst [vmem:[#allocation49_spill] sm:$0xff] %v9713_v56 }
 0x2ee   :  { %11461 = vst [vmem:[#allocation48_spill] sm:$0xff] %v9710_v41 }
 0x2ef   :  { %4142 = vmatpush1.bf16.msra.mxu0 %v9659_v43 }
 0x2f0   :  { %4143 = vmatprep.subr.bf16.mxu0 %v9662_v42  ;;  %4113 = vmatpush2.bf16.msra.mxu1 %v9665_v46  ;;  %v9701_v46 = vld [vmem:[#allocation8 + $0x780] ss:$16 sps:$4 sm:$0xff]  }
 0x2f1   :  { %4114 = vmatprep.subr.bf16.mxu1 %v9668_v49  ;;  %v9698_v49 = vld [vmem:[#allocation8 + $0x42c] ss:$16 sps:$4 sm:$0xff]   ;;  %11458 = vst [vmem:[#allocation45_spill] sm:$0xff] %v9701_v46 }
 0x2f2   :  { %11457 = vst [vmem:[#allocation44_spill] sm:$0xff] %v9698_v49 }
 0x2f3   :  { %4144 = vmatpush1.bf16.msra.mxu0 %v9671_v52 }
 0x2f4   :  { %4145 = vmatprep.subr.bf16.mxu0 %v9674_v53  ;;  %4115 = vmatpush2.bf16.msra.mxu1 %v9677_v32  ;;  %v9704_v32 = vld [vmem:[#allocation8 + $0x764] ss:$16 sps:$4 sm:$0xff]  }
 0x2f5   :  { %4116 = vmatprep.subr.bf16.mxu1 %v9680_v33  ;;  %11459 = vst [vmem:[#allocation46_spill] sm:$0xff] %v9704_v32  ;;  %v9707_v33 = vld [vmem:[#allocation8 + $0x428] ss:$16 sps:$4 sm:$0xff]  }
 0x2f6   :  { %11460 = vst [vmem:[#allocation47_spill] sm:$0xff] %v9707_v33 }
 0x2f7   :  { %4146 = vmatpush1.bf16.msra.mxu0 %v9683_v59 }
 0x2f8   :  { %4147 = vmatprep.subr.bf16.mxu0 %v9686_v50  ;;  %4117 = vmatpush2.bf16.msra.mxu1 %v9689_v2  ;;  %v9716_v2 = vld [vmem:[#allocation8 + $0x744] ss:$16 sps:$4 sm:$0xff]  }
 0x2f9   :  { %4118 = vmatprep.subr.bf16.mxu1 %v9692_v30  ;;  %11463 = vst [vmem:[#allocation50_spill] sm:$0xff] %v9716_v2  ;;  %v9719_v30 = vld [vmem:[#allocation8 + $0x408] ss:$16 sps:$4 sm:$0xff]  }
 0x2fa   :  { %11464 = vst [vmem:[#allocation51_spill] sm:$0xff] %v9719_v30 }
 0x2fb   :  { %4148 = vmatpush1.bf16.msra.mxu0 %v9695_v29 }
 0x2fc   :  { %4149 = vmatprep.subr.bf16.mxu0 %v9698_v49  ;;  %4119 = vmatpush2.bf16.msra.mxu1 %v9701_v46  ;;  %v9728_v46 = vld [vmem:[#allocation8 + $0x724] ss:$16 sps:$4 sm:$0xff]  }
 0x2fd   :  { %4120 = vmatprep.subr.bf16.mxu1 %v9704_v32  ;;  %11467 = vst [vmem:[#allocation54_spill] sm:$0xff] %v9728_v46  ;;  %v9731_v32 = vld [vmem:[#allocation8 + $0x5e8] ss:$16 sps:$4 sm:$0xff]  }
 0x2fe   :  { %11468 = vst [vmem:[#allocation55_spill] sm:$0xff] %v9731_v32 }
 0x2ff   :  { %4150 = vmatpush1.bf16.msra.mxu0 %v9707_v33  ;;  %v9734_v33 = vld [vmem:[#allocation8 + $0x5cc] ss:$16 sps:$4 sm:$0xff]  }
 0x300   :  { %4151 = vmatprep.subr.bf16.mxu0 %v9710_v41  ;;  %4121 = vmatpush2.bf16.msra.mxu1 %v9713_v56  ;;  %11469 = vst [vmem:[#allocation56_spill] sm:$0xff] %v9734_v33  ;;  %v9737_v41 = vld [vmem:[#allocation8 + $0x720] ss:$16 sps:$4 sm:$0xff]   ;;  %v9740_v56 = vld [vmem:[#allocation8 + $0x704] ss:$16 sps:$4 sm:$0xff]  }
 0x301   :  { %4122 = vmatprep.subr.bf16.mxu1 %v9716_v2  ;;  %11470 = vst [vmem:[#allocation57_spill] sm:$0xff] %v9737_v41  ;;  %11471 = vst [vmem:[#allocation58_spill] sm:$0xff] %v9740_v56  ;;  %v9743_v2 = vld [vmem:[#allocation8 + $0x5c8] ss:$16 sps:$4 sm:$0xff]  }
 0x302   :  { %11472 = vst [vmem:[#allocation59_spill] sm:$0xff] %v9743_v2 }
 0x303   :  { %4152 = vmatpush1.bf16.msra.mxu0 %v9719_v30  ;;  %v9746_v30 = vld [vmem:[#allocation8 + $0x5ac] ss:$16 sps:$4 sm:$0xff]  }
 0x304   :  { %4153 = vmatprep.subr.bf16.mxu0 %v9722_v62  ;;  %4123 = vmatpush2.bf16.msra.mxu1 %v9725_v19  ;;  %11473 = vst [vmem:[#allocation60_spill] sm:$0xff] %v9746_v30  ;;  %v9749_v62 = vld [vmem:[#allocation8 + $0x700] ss:$16 sps:$4 sm:$0xff]   ;;  %v9752_v19 = vld [vmem:[#allocation8 + $0x6ec] ss:$16 sps:$4 sm:$0xff]  }
 0x305   :  { %4124 = vmatprep.subr.bf16.mxu1 %v9728_v46  ;;  %11474 = vst [vmem:[#allocation61_spill] sm:$0xff] %v9749_v62  ;;  %11475 = vst [vmem:[#allocation62_spill] sm:$0xff] %v9752_v19  ;;  %v9756_v46 = vrot.slane %v9575_v3, %v9264_v47 }
 0x307   :  { %4154 = vmatpush2.bf16.msra.mxu0 %v9731_v32  ;;  %11476 = vst [vmem:[#allocation63_spill] sm:$0xff] %v9756_v46  ;;  %v9759_v32 = vld [vmem:[#allocation8 + $0x5a8] ss:$16 sps:$4 sm:$0xff]   ;;  %v3036_v47 = vadd.f32 %v9542_v27, %v9756_v46 }
 0x308   :  { %4155 = vmatprep.subr.bf16.mxu0 %v9734_v33  ;;  %4125 = vmatpush2.bf16.msra.mxu1 %v9737_v41  ;;  %11477 = vst [vmem:[#allocation64_spill] sm:$0xff] %v9759_v32  ;;  %v9763_v33 = vrot.slane %v9575_v3, %v9269_v51  ;;  %v9766_v41 = vld [vmem:[#allocation8 + $0x58c] ss:$16 sps:$4 sm:$0xff]  }
 0x309   :  { %4126 = vmatprep.subr.bf16.mxu1 %v9740_v56  ;;  %11478 = vst [vmem:[#allocation65_spill] sm:$0xff] %v9766_v41 }
 0x30a   :  { %v3038_v3 = vadd.f32 %v9546_v7, %v9763_v33  ;;  %v9788_v7 = vld [vmem:[#allocation8 + $0x54c] ss:$16 sps:$4 sm:$0xff]  }
 0x30b   :  { %4156 = vmatpush2.bf16.msra.mxu0 %v9743_v2  ;;  %v9775_v2 = vld [vmem:[#allocation8 + $0x588] ss:$16 sps:$4 sm:$0xff]  }
 0x30c   :  { %4157 = vmatprep.subr.bf16.mxu0 %v9746_v30  ;;  %4127 = vmatpush2.bf16.msra.mxu1 %v9749_v62  ;;  %v9780_v30 = vld [vmem:[#allocation8 + $0x56c] ss:$16 sps:$4 sm:$0xff]  }
 0x30d   :  { %4178 = vmatprep.subr.bf16.mxu1 %v9752_v19 }
 0x30f   :  { %v3076_v56 = vpop.f32.mrf.mxu1  ;;  %v9772_v49 = vpop.f32.mrf.mxu0  ;;  %4158 = vmatpush2.bf16.msra.mxu0 %v9759_v32  ;;  %v9785_v32 = vld [vmem:[#allocation8 + $0x568] ss:$16 sps:$4 sm:$0xff]  }
 0x310   :  { %11479 = vst [vmem:[#allocation66_spill] sm:$0xff] %v9772_v49  ;;  %v3077_v51 = vadd.f32 %v3076_v56, %v3036_v47  ;;  %4159 = vmatprep.subr.bf16.mxu0 %v9766_v41  ;;  %v9791_v41 = vld [vmem:[#allocation8 + $0x548] ss:$16 sps:$4 sm:$0xff]  }
 0x311   :  { %v3078_v62 = vpop.f32.mrf.mxu1  ;;  %v9782_v19 = vpop.f32.mrf.mxu0 }
 0x312   :  { %v3079_v15 = vadd.f32 %v3078_v62, %v3038_v3  ;;  %v3085_v27 = vpack.c.bf16 %v3077_v51, %v3077_v51  ;;  %v9794_v51 = vld [vmem:[#allocation8 + $0x52c] ss:$16 sps:$4 sm:$0xff]   ;;  %v9803_v62 = vld [vmem:[#allocation8 + $0x508] ss:$16 sps:$4 sm:$0xff]  }
 0x313   :  { %v3080_v46 = vpop.f32.mrf.mxu1  ;;  %v3211_v29 = vpop.f32.mrf.mxu0  ;;  %4160 = vmatpush2.bf16.msra.mxu0 %v9775_v2  ;;  %v9810_v3 = vld [vmem:[#allocation8 + $0x6cc] ss:$16 sps:$4 sm:$0xff]  }
 0x314   :  { %v3086_v49 = vpack.c.bf16 %v3079_v15, %v3079_v15  ;;  %4161 = vmatprep.subr.bf16.mxu0 %v9780_v30  ;;  %v9797_v29 = vld [vmem:[#allocation8 + $0x528] ss:$16 sps:$4 sm:$0xff]   ;;  %v9800_v15 = vld [vmem:[#allocation8 + $0x50c] ss:$16 sps:$4 sm:$0xff]  }
 0x315   :  { %v3081_v47 = vpop.f32.mrf.mxu1  ;;  %v3212_v56 = vpop.f32.mrf.mxu0  ;;  %v9807_v46 = vld [vmem:[#allocation8 + $0x6e8] ss:$16 sps:$4 sm:$0xff]  }
 0x316   :  { %8680 = vtanh.bf16 %v3086_v49  ;;  %v9817_v47 = vld [vmem:[#allocation8 + $0x6c8] ss:$16 sps:$4 sm:$0xff]   ;;  %v9821_v56 = vld [vmem:[#allocation8 + $0x6ac] ss:$16 sps:$4 sm:$0xff]  }
 0x317   :  { %8682 = vtanh.bf16 %v3085_v27  ;;  %4162 = vmatpush2.bf16.msra.mxu0 %v9785_v32 }
 0x318   :  { %4163 = vmatprep.subr.bf16.mxu0 %v9788_v7 }
 0x31b   :  { %4164 = vmatpush2.bf16.msra.mxu0 %v9791_v41 }
 0x31c   :  { %4165 = vmatprep.subr.bf16.mxu0 %v9794_v51 }
 0x31f   :  { %4166 = vmatpush2.bf16.msra.mxu0 %v9797_v29 }
 0x320   :  { %4167 = vmatprep.subr.bf16.mxu0 %v9800_v15 }
 0x323   :  { %4168 = vmatpush2.bf16.msra.mxu0 %v9803_v62 }
 0x324   :  { %v8681_v49 = vpop.eup %8680  ;;  %4227 = vmatprep.subr.bf16.mxu0 %v9425_v37  ;;  %v9825_v37 = vld [vmem:[#allocation8 + $0x6a8] ss:$16 sps:$4 sm:$0xff]  }
 0x325   :  { %v9812_v27 = vpop.eup %8682  ;;  %4128 = vmatprep.mubr.bf16.mxu1 %v8681_v49 }
 0x326   :  { %4129 = vmatmul.mubr.bf16.vlgmr.msra.gmra.mxu1 %v9812_v27  ;;  %4170 = vmatmul.mubr.bf16.vlgmr.msra.gmra.mxu0 %v9640_v5  ;;  %v9829_v5 = vld [vmem:[#allocation8 + $0x68c] ss:$16 sps:$4 sm:$0xff]  }
 0x327   :  { %4179 = vmatpush1.bf16.msra.mxu1 %v9807_v46  ;;  %4210 = vmatprep.mubr.bf16.mxu1 %v8681_v49  ;;  %v11490_v49 = vld [vmem:[#allocation20_spill] sm:$0xff] }
 0x328   :  { %4228 = vmatpush1.bf16.msra.mxu0 %v9430_v12  ;;  %4180 = vmatprep.subr.bf16.mxu1 %v9810_v3  ;;  %v9833_v12 = vld [vmem:[#allocation8 + $0x688] ss:$16 sps:$4 sm:$0xff]  }
 0x329   :  { %4229 = vmatprep.subr.bf16.mxu0 %v9435_v13  ;;  %v9837_v13 = vld [vmem:[#allocation8 + $0x66c] ss:$16 sps:$4 sm:$0xff]  }
 0x32b   :  { %4181 = vmatpush1.bf16.msra.mxu1 %v9817_v47 }
 0x32c   :  { %4230 = vmatpush1.bf16.msra.mxu0 %v9445_v38  ;;  %4182 = vmatprep.subr.bf16.mxu1 %v9821_v56  ;;  %v9841_v38 = vld [vmem:[#allocation8 + $0x668] ss:$16 sps:$4 sm:$0xff]  }
 0x32d   :  { %4231 = vmatprep.subr.bf16.mxu0 %v9448_v18  ;;  %11480 = vst [vmem:[#allocation67_spill] sm:$0xff] %v9841_v38  ;;  %v9845_v18 = vld [vmem:[#allocation8 + $0x64c] ss:$16 sps:$4 sm:$0xff]  }
 0x32e   :  { %11481 = vst [vmem:[#allocation68_spill] sm:$0xff] %v9845_v18 }
 0x32f   :  { %4183 = vmatpush1.bf16.msra.mxu1 %v9825_v37 }
 0x330   :  { %4232 = vmatpush1.bf16.msra.mxu0 %v9451_v21  ;;  %4184 = vmatprep.subr.bf16.mxu1 %v9829_v5  ;;  %v9849_v21 = vld [vmem:[#allocation8 + $0x648] ss:$16 sps:$4 sm:$0xff]  }
 0x331   :  { %4233 = vmatprep.subr.bf16.mxu0 %v9454_v34  ;;  %11482 = vst [vmem:[#allocation69_spill] sm:$0xff] %v9849_v21  ;;  %v9853_v34 = vld [vmem:[#allocation8 + $0x62c] ss:$16 sps:$4 sm:$0xff]  }
 0x332   :  { %11483 = vst [vmem:[#allocation70_spill] sm:$0xff] %v9853_v34 }
 0x333   :  { %4185 = vmatpush1.bf16.msra.mxu1 %v9833_v12 }
 0x334   :  { %4234 = vmatpush1.bf16.msra.mxu0 %v9457_v20  ;;  %4186 = vmatprep.subr.bf16.mxu1 %v9837_v13  ;;  %v9857_v20 = vld [vmem:[#allocation8 + $0x628] ss:$16 sps:$4 sm:$0xff]  }
 0x335   :  { %4235 = vmatprep.subr.bf16.mxu0 %v9460_v35  ;;  %11484 = vst [vmem:[#allocation71_spill] sm:$0xff] %v9857_v20  ;;  %v9861_v35 = vld [vmem:[#allocation8 + $0x60c] ss:$16 sps:$4 sm:$0xff]  }
 0x336   :  { %11485 = vst [vmem:[#allocation72_spill] sm:$0xff] %v9861_v35 }
 0x337   :  { %4187 = vmatpush1.bf16.msra.mxu1 %v9841_v38  ;;  %v11500_v38 = vld [vmem:[#allocation27_spill] sm:$0xff] }
 0x338   :  { %4236 = vmatpush1.bf16.msra.mxu0 %v9463_v63  ;;  %4188 = vmatprep.subr.bf16.mxu1 %v9845_v18  ;;  %v9865_v63 = vld [vmem:[#allocation8 + $0x608] ss:$16 sps:$4 sm:$0xff]  }
 0x339   :  { %4237 = vmatprep.subr.bf16.mxu0 %v9466_v61  ;;  %11486 = vst [vmem:[#allocation73_spill] sm:$0xff] %v9865_v63  ;;  %v9869_v61 = vld [vmem:[#allocation8 + $0x7ec] ss:$16 sps:$4 sm:$0xff]  }
 0x33a   :  { %11487 = vst [vmem:[#allocation74_spill] sm:$0xff] %v9869_v61 }
 0x33b   :  { %4189 = vmatpush1.bf16.msra.mxu1 %v9849_v21 }
 0x33c   :  { %4238 = vmatpush1.bf16.msra.mxu0 %v9469_v8  ;;  %4190 = vmatprep.subr.bf16.mxu1 %v9853_v34  ;;  %v9873_v8 = vld [vmem:[#allocation8 + $0x7e8] ss:$16 sps:$4 sm:$0xff]  }
 0x33d   :  { %4239 = vmatprep.subr.bf16.mxu0 %v9472_v14  ;;  %11488 = vst [vmem:[#allocation75_spill] sm:$0xff] %v9873_v8  ;;  %v9877_v14 = vld [vmem:[#allocation8 + $0x7cc] ss:$16 sps:$4 sm:$0xff]   ;;  %v11498_v34 = vld [vmem:[#allocation25_spill] sm:$0xff] }
 0x33e   :  { %11489 = vst [vmem:[#allocation76_spill] sm:$0xff] %v9877_v14 }
 0x33f   :  { %4191 = vmatpush1.bf16.msra.mxu1 %v9857_v20  ;;  %v9899_v20 = vld [vmem:[#allocation8 + $0x788] ss:$16 sps:$4 sm:$0xff]  }
 0x340   :  { %4240 = vmatpush1.bf16.msra.mxu0 %v9475_v23  ;;  %4192 = vmatprep.subr.bf16.mxu1 %v9861_v35  ;;  %v9881_v23 = vld [vmem:[#allocation8 + $0x7c8] ss:$16 sps:$4 sm:$0xff]  }
 0x341   :  { %4241 = vmatprep.subr.bf16.mxu0 %v9478_v28  ;;  %11491 = vst [vmem:[#allocation20_spill] sm:$0xff] %v9881_v23  ;;  %v11492_v35 = vld [vmem:[#allocation21_spill] sm:$0xff]  ;;  %v9885_v28 = vld [vmem:[#allocation8 + $0x7ac] ss:$16 sps:$4 sm:$0xff]  }
 0x342   :  { %11493 = vst [vmem:[#allocation21_spill] sm:$0xff] %v9885_v28 }
 0x343   :  { %4193 = vmatpush1.bf16.msra.mxu1 %v9865_v63  ;;  %v11494_v63 = vld [vmem:[#allocation22_spill] sm:$0xff] }
 0x344   :  { %4242 = vmatpush1.bf16.msra.mxu0 %v9481_v40  ;;  %4194 = vmatprep.subr.bf16.mxu1 %v9869_v61  ;;  %v9889_v40 = vld [vmem:[#allocation8 + $0x7a8] ss:$16 sps:$4 sm:$0xff]  }
 0x345   :  { %4243 = vmatprep.subr.bf16.mxu0 %v11490_v49  ;;  %11495 = vst [vmem:[#allocation22_spill] sm:$0xff] %v9889_v40  ;;  %v11496_v61 = vld [vmem:[#allocation23_spill] sm:$0xff]  ;;  %v9893_v49 = vld [vmem:[#allocation8 + $0x78c] ss:$16 sps:$4 sm:$0xff]  }
 0x347   :  { %4195 = vmatpush2.bf16.msra.mxu1 %v9873_v8  ;;  %v11497_v8 = vld [vmem:[#allocation24_spill] sm:$0xff] }
 0x348   :  { %4244 = vmatpush2.bf16.msra.mxu0 %v11492_v35  ;;  %4196 = vmatprep.subr.bf16.mxu1 %v9877_v14  ;;  %v3126_v35 = vadd.f32 %v9597_v22, %v9583_v16  ;;  %v9909_v22 = vld [vmem:[#allocation8 + $0x768] ss:$16 sps:$4 sm:$0xff]  }
 0x349   :  { %4245 = vmatprep.subr.bf16.mxu0 %v11494_v63  ;;  %v3128_v63 = vadd.f32 %v9604_v45, %v9587_v26  ;;  %v9913_v26 = vld [vmem:[#allocation8 + $0x74c] ss:$16 sps:$4 sm:$0xff]  }
 0x34b   :  { %4197 = vmatpush2.bf16.msra.mxu1 %v9881_v23 }
 0x34c   :  { %4246 = vmatpush2.bf16.msra.mxu0 %v11496_v61  ;;  %4198 = vmatprep.subr.bf16.mxu1 %v9885_v28  ;;  %v9905_v61 = vld [vmem:[#allocation8 + $0x76c] ss:$16 sps:$4 sm:$0xff]  }
 0x34d   :  { %4247 = vmatprep.subr.bf16.mxu0 %v11497_v8  ;;  %v11499_v8 = vld [vmem:[#allocation26_spill] sm:$0xff] }
 0x34f   :  { %4199 = vmatpush2.bf16.msra.mxu1 %v9889_v40  ;;  %v3166_v14 = vpop.f32.mrf.mxu1 }
 0x350   :  { %v3167_v23 = vadd.f32 %v3166_v14, %v3126_v35  ;;  %4248 = vmatpush2.bf16.msra.mxu0 %v11498_v34  ;;  %4200 = vmatprep.subr.bf16.mxu1 %v9893_v49  ;;  %v11501_v34 = vld [vmem:[#allocation30_spill] sm:$0xff]  ;;  %v9917_v14 = vld [vmem:[#allocation8 + $0x748] ss:$16 sps:$4 sm:$0xff]  }
 0x351   :  { %v3168_v28 = vpop.f32.mrf.mxu1  ;;  %4249 = vmatprep.subr.bf16.mxu0 %v11499_v8  ;;  %v11504_v35 = vld [vmem:[#allocation33_spill] sm:$0xff] }
 0x352   :  { %v3169_v21 = vadd.f32 %v3168_v28, %v3128_v63  ;;  %v3255_v40 = vpack.c.bf16 %v3167_v23, %v3167_v23  ;;  %v11502_v28 = vld [vmem:[#allocation31_spill] sm:$0xff]  ;;  %v11505_v63 = vld [vmem:[#allocation34_spill] sm:$0xff] }
 0x353   :  { %4201 = vmatpush2.bf16.msra.mxu1 %v9899_v20  ;;  %v3170_v16 = vpop.f32.mrf.mxu1  ;;  %v9925_v23 = vld [vmem:[#allocation8 + $0x728] ss:$16 sps:$4 sm:$0xff]  }
 0x354   :  { %v3256_v18 = vpack.c.bf16 %v3169_v21, %v3169_v21  ;;  %4250 = vmatpush2.bf16.msra.mxu0 %v11500_v38  ;;  %4202 = vmatprep.subr.bf16.mxu1 %v9905_v61  ;;  %v9921_v21 = vld [vmem:[#allocation8 + $0x72c] ss:$16 sps:$4 sm:$0xff]  }
 0x355   :  { %v3171_v45 = vpop.f32.mrf.mxu1  ;;  %4251 = vmatprep.subr.bf16.mxu0 %v11501_v34  ;;  %v11503_v38 = vld [vmem:[#allocation32_spill] sm:$0xff] }
 0x356   :  { %8684 = vtanh.bf16 %v3256_v18  ;;  %v9929_v18 = vld [vmem:[#allocation8 + $0x70c] ss:$16 sps:$4 sm:$0xff]  }
 0x357   :  { %4203 = vmatpush2.bf16.msra.mxu1 %v9909_v22  ;;  %8686 = vtanh.bf16 %v3255_v40  ;;  %v9933_v40 = vld [vmem:[#allocation8 + $0x708] ss:$16 sps:$4 sm:$0xff]   ;;  %v11529_v45 = vld [vmem:[#allocation42_spill] sm:$0xff] }
 0x358   :  { %4252 = vmatpush2.bf16.msra.mxu0 %v11502_v28  ;;  %4204 = vmatprep.subr.bf16.mxu1 %v9913_v26  ;;  %v11530_v28 = vld [vmem:[#allocation65_spill] sm:$0xff] }
 0x359   :  { %4253 = vmatprep.subr.bf16.mxu0 %v11503_v38 }
 0x35b   :  { %4205 = vmatpush2.bf16.msra.mxu1 %v9917_v14 }
 0x35c   :  { %4254 = vmatpush2.bf16.msra.mxu0 %v11504_v35  ;;  %4206 = vmatprep.subr.bf16.mxu1 %v9921_v21 }
 0x35d   :  { %4255 = vmatprep.subr.bf16.mxu0 %v11505_v63  ;;  %v11531_v63 = vld [vmem:[#allocation45_spill] sm:$0xff] }
 0x35f   :  { %4207 = vmatpush2.bf16.msra.mxu1 %v9925_v23 }
 0x360   :  { %4256 = vmatpush2.bf16.msra.mxu0 %v9523_v10  ;;  %4208 = vmatprep.subr.bf16.mxu1 %v9929_v18  ;;  %v11507_v10 = vld [vmem:[#allocation17_spill] sm:$0xff] }
 0x361   :  { %4257 = vmatprep.subr.bf16.mxu0 %v9527_v39  ;;  %v11508_v39 = vld [vmem:[#allocation44_spill] sm:$0xff] }
 0x363   :  { %4209 = vmatpush2.bf16.msra.mxu1 %v9933_v40 }
 0x364   :  { %v8685_v8 = vpop.eup %8684  ;;  %4258 = vmatpush2.bf16.msra.mxu0 %v9532_v54  ;;  %4268 = vmatprep.subr.bf16.mxu1 %v9579_v25  ;;  %v11509_v54 = vld [vmem:[#allocation18_spill] sm:$0xff]  ;;  %v11510_v25 = vld [vmem:[#allocation47_spill] sm:$0xff] }
 0x365   :  { %4259 = vmatprep.mubr.bf16.mxu0 %v8685_v8  ;;  %4309 = vmatprep.subr.bf16.mxu0 %v9536_v24  ;;  %v9942_v16 = vpop.eup %8686  ;;  %v11506_v24 = vld [vmem:[#allocation43_spill] sm:$0xff] }
 0x366   :  { %4211 = vmatmul.mubr.bf16.vlgmr.msra.gmra.mxu1 %v9812_v27  ;;  %v11528_v27 = vld [vmem:[#allocation64_spill] sm:$0xff] }
 0x367   :  { %4260 = vmatmul.mubr.bf16.vlgmr.msra.gmra.mxu0 %v9942_v16  ;;  %4269 = vmatpush1.bf16.msra.mxu1 %v9590_v9  ;;  %v11511_v9 = vld [vmem:[#allocation19_spill] sm:$0xff] }
 0x368   :  { %4310 = vmatpush1.bf16.msra.mxu0 %v9633_v17  ;;  %4341 = vmatprep.mubr.bf16.mxu0 %v8685_v8  ;;  %v11522_v17 = vld [vmem:[#allocation59_spill] sm:$0xff] }
 0x369   :  { %4270 = vmatprep.subr.bf16.mxu1 %v9593_v31  ;;  %4311 = vmatprep.subr.bf16.mxu0 %v9635_v6  ;;  %v11512_v31 = vld [vmem:[#allocation48_spill] sm:$0xff] }
 0x36a   :  { %v11523_v6 = vld [vmem:[#allocation40_spill] sm:$0xff] }
 0x36b   :  { %4271 = vmatpush1.bf16.msra.mxu1 %v9602_v44  ;;  %v11513_v44 = vld [vmem:[#allocation35_spill] sm:$0xff] }
 0x36c   :  { %4312 = vmatpush1.bf16.msra.mxu0 %v9647_v1  ;;  %4272 = vmatprep.subr.bf16.mxu1 %v9607_v48  ;;  %v11514_v48 = vld [vmem:[#allocation51_spill] sm:$0xff]  ;;  %v11524_v1 = vld [vmem:[#allocation60_spill] sm:$0xff] }
 0x36d   :  { %4313 = vmatprep.subr.bf16.mxu0 %v9650_v36  ;;  %v11525_v36 = vld [vmem:[#allocation63_spill] sm:$0xff] }
 0x36f   :  { %4273 = vmatpush1.bf16.msra.mxu1 %v9610_v58  ;;  %v11515_v58 = vld [vmem:[#allocation36_spill] sm:$0xff] }
 0x370   :  { %4314 = vmatpush1.bf16.msra.mxu0 %v9659_v43  ;;  %4274 = vmatprep.subr.bf16.mxu1 %v9613_v55  ;;  %v11516_v55 = vld [vmem:[#allocation52_spill] sm:$0xff]  ;;  %v11526_v43 = vld [vmem:[#allocation66_spill] sm:$0xff] }
 0x371   :  { %4315 = vmatprep.subr.bf16.mxu0 %v9662_v42  ;;  %v3208_v42 = vadd.f32 %v11526_v43, %v11525_v36  ;;  %v10082_v36 = vld [vmem:[#allocation8 + $0x9e4] ss:$16 sps:$4 sm:$0xff]  }
 0x372   :  { %v11547_v43 = vld [vmem:[#allocation73_spill] sm:$0xff] }
 0x373   :  { %4275 = vmatpush1.bf16.msra.mxu1 %v9616_v57  ;;  %v11517_v57 = vld [vmem:[#allocation37_spill] sm:$0xff] }
 0x374   :  { %4316 = vmatpush1.bf16.msra.mxu0 %v9671_v52  ;;  %4276 = vmatprep.subr.bf16.mxu1 %v9619_v60  ;;  %v11518_v60 = vld [vmem:[#allocation55_spill] sm:$0xff]  ;;  %v11527_v52 = vld [vmem:[#allocation41_spill] sm:$0xff] }
 0x375   :  { %4317 = vmatprep.subr.bf16.mxu0 %v9674_v53 }
 0x377   :  { %4277 = vmatpush1.bf16.msra.mxu1 %v9622_v0  ;;  %v11519_v0 = vld [vmem:[#allocation38_spill] sm:$0xff] }
 0x378   :  { %4318 = vmatpush1.bf16.msra.mxu0 %v9683_v59  ;;  %4278 = vmatprep.subr.bf16.mxu1 %v9625_v4  ;;  %v11520_v4 = vld [vmem:[#allocation56_spill] sm:$0xff]  ;;  %v3210_v59 = vadd.f32 %v9782_v19, %v9763_v33  ;;  %v11533_v19 = vld [vmem:[#allocation49_spill] sm:$0xff]  ;;  %v11534_v33 = vld [vmem:[#allocation50_spill] sm:$0xff] }
 0x379   :  { %4319 = vmatprep.subr.bf16.mxu0 %v9686_v50 }
 0x37b   :  { %4279 = vmatpush1.bf16.msra.mxu1 %v9628_v11  ;;  %v11521_v11 = vld [vmem:[#allocation39_spill] sm:$0xff] }
 0x37c   :  { %4320 = vmatpush1.bf16.msra.mxu0 %v11506_v24  ;;  %4280 = vmatprep.subr.bf16.mxu1 %v11507_v10  ;;  %v11532_v10 = vld [vmem:[#allocation46_spill] sm:$0xff] }
 0x37d   :  { %4321 = vmatprep.subr.bf16.mxu0 %v11508_v39 }
 0x37f   :  { %4281 = vmatpush1.bf16.msra.mxu1 %v11509_v54  ;;  %v11535_v54 = vld [vmem:[#allocation53_spill] sm:$0xff] }
 0x380   :  { %4322 = vmatpush1.bf16.msra.mxu0 %v11510_v25  ;;  %4282 = vmatprep.subr.bf16.mxu1 %v11511_v9  ;;  %v11537_v25 = vld [vmem:[#allocation57_spill] sm:$0xff] }
 0x381   :  { %4323 = vmatprep.subr.bf16.mxu0 %v11512_v31  ;;  %v11539_v9 = vld [vmem:[#allocation61_spill] sm:$0xff] }
 0x383   :  { %4283 = vmatpush1.bf16.msra.mxu1 %v11513_v44  ;;  %v10031_v44 = vld [vmem:[#allocation8 + $0x8c0] ss:$16 sps:$4 sm:$0xff]  }
 0x384   :  { %4324 = vmatpush1.bf16.msra.mxu0 %v11514_v48  ;;  %4284 = vmatprep.subr.bf16.mxu1 %v11515_v58  ;;  %v10034_v58 = vld [vmem:[#allocation8 + $0x8a4] ss:$16 sps:$4 sm:$0xff]  }
 0x385   :  { %4325 = vmatprep.subr.bf16.mxu0 %v11516_v55 }
 0x387   :  { %4285 = vmatpush2.bf16.msra.mxu1 %v11517_v57  ;;  %v11542_v57 = vld [vmem:[#allocation68_spill] sm:$0xff] }
 0x388   :  { %4326 = vmatpush2.bf16.msra.mxu0 %v11518_v60  ;;  %4286 = vmatprep.subr.bf16.mxu1 %v11519_v0  ;;  %v10063_v60 = vld [vmem:[#allocation8 + $0x840] ss:$16 sps:$4 sm:$0xff]  }
 0x389   :  { %4327 = vmatprep.subr.bf16.mxu0 %v11520_v4  ;;  %v11544_v0 = vld [vmem:[#allocation70_spill] sm:$0xff] }
 0x38a   :  { %v10071_v4 = vld [vmem:[#allocation8 + $0x820] ss:$16 sps:$4 sm:$0xff]  }
 0x38b   :  { %4287 = vmatpush2.bf16.msra.mxu1 %v11521_v11  ;;  %v10074_v11 = vld [vmem:[#allocation8 + $0x804] ss:$16 sps:$4 sm:$0xff]  }
 0x38c   :  { %4328 = vmatpush2.bf16.msra.mxu0 %v11522_v17  ;;  %4288 = vmatprep.subr.bf16.mxu1 %v11523_v6  ;;  %v11545_v17 = vld [vmem:[#allocation71_spill] sm:$0xff]  ;;  %v11546_v6 = vld [vmem:[#allocation72_spill] sm:$0xff] }
 0x38d   :  { %4329 = vmatprep.subr.bf16.mxu0 %v11524_v1  ;;  %v10079_v1 = vld [vmem:[#allocation8 + $0x800] ss:$16 sps:$4 sm:$0xff]  }
 0x38f   :  { %4289 = vmatpush2.bf16.msra.mxu1 %v11527_v52  ;;  %v3248_v53 = vpop.f32.mrf.mxu1  ;;  %v10087_v52 = vld [vmem:[#allocation8 + $0x9e0] ss:$16 sps:$4 sm:$0xff]  }
 0x390   :  { %v3249_v50 = vadd.f32 %v3248_v53, %v3208_v42  ;;  %4330 = vmatpush2.bf16.msra.mxu0 %v11528_v27  ;;  %4290 = vmatprep.subr.bf16.mxu1 %v11529_v45  ;;  %v11548_v42 = vld [vmem:[#allocation74_spill] sm:$0xff]  ;;  %v10090_v53 = vld [vmem:[#allocation8 + $0x9c4] ss:$16 sps:$4 sm:$0xff]  }
 0x391   :  { %v3250_v34 = vpop.f32.mrf.mxu1  ;;  %4331 = vmatprep.subr.bf16.mxu0 %v11530_v28  ;;  %v10095_v27 = vld [vmem:[#allocation8 + $0x9c0] ss:$16 sps:$4 sm:$0xff]   ;;  %v10098_v45 = vld [vmem:[#allocation8 + $0x9a4] ss:$16 sps:$4 sm:$0xff]  }
 0x392   :  { %v3251_v38 = vadd.f32 %v3250_v34, %v3210_v59  ;;  %v3257_v35 = vpack.c.bf16 %v3249_v50, %v3249_v50  ;;  %v11549_v59 = vld [vmem:[#allocation75_spill] sm:$0xff]  ;;  %v11550_v50 = vld [vmem:[#allocation76_spill] sm:$0xff]  ;;  %v11552_v28 = vld [vmem:[#allocation21_spill] sm:$0xff] }
 0x393   :  { %4291 = vmatpush2.bf16.msra.mxu1 %v11531_v63  ;;  %v3252_v8 = vpop.f32.mrf.mxu1  ;;  %v11551_v34 = vld [vmem:[#allocation20_spill] sm:$0xff]  ;;  %v11553_v63 = vld [vmem:[#allocation22_spill] sm:$0xff] }
 0x394   :  { %v3258_v24 = vpack.c.bf16 %v3251_v38, %v3251_v38  ;;  %4332 = vmatpush2.bf16.msra.mxu0 %v9775_v2  ;;  %4292 = vmatprep.subr.bf16.mxu1 %v11532_v10  ;;  %v11536_v2 = vld [vmem:[#allocation54_spill] sm:$0xff] }
 0x395   :  { %v3253_v39 = vpop.f32.mrf.mxu1  ;;  %4333 = vmatprep.subr.bf16.mxu0 %v9780_v30  ;;  %v11538_v30 = vld [vmem:[#allocation58_spill] sm:$0xff] }
 0x396   :  { %8688 = vtanh.bf16 %v3258_v24  ;;  %v10103_v38 = vld [vmem:[#allocation8 + $0x9a0] ss:$16 sps:$4 sm:$0xff]   ;;  %v10114_v24 = vld [vmem:[#allocation8 + $0x964] ss:$16 sps:$4 sm:$0xff]  }
 0x397   :  { %8690 = vtanh.bf16 %v3257_v35  ;;  %4293 = vmatpush2.bf16.msra.mxu1 %v11533_v19  ;;  %v10106_v35 = vld [vmem:[#allocation8 + $0x984] ss:$16 sps:$4 sm:$0xff]   ;;  %v10111_v8 = vld [vmem:[#allocation8 + $0x980] ss:$16 sps:$4 sm:$0xff]  }
 0x398   :  { %4334 = vmatpush2.bf16.msra.mxu0 %v9785_v32  ;;  %4294 = vmatprep.subr.bf16.mxu1 %v11534_v33  ;;  %v10010_v32 = vld [vmem:[#allocation8 + $0x8e4] ss:$16 sps:$4 sm:$0xff]   ;;  %v10119_v10 = vld [vmem:[#allocation8 + $0x960] ss:$16 sps:$4 sm:$0xff]  }
 0x399   :  { %4335 = vmatprep.subr.bf16.mxu0 %v9788_v7  ;;  %v10122_v39 = vld [vmem:[#allocation8 + $0x944] ss:$16 sps:$4 sm:$0xff]  }
 0x39a   :  { %v10137_v19 = vld [vmem:[#allocation9 + $0x4] sm:$0xf]  ;;  %v11554_v33 = vld [vmem:[#allocation15_spill] sm:$0xff] }
 0x39b   :  { %4295 = vmatpush2.bf16.msra.mxu1 %v11535_v54  ;;  %v10154_v54 = vld [vmem:[#allocation8 + $0x8ec] ss:$16 sps:$4 sm:$0xff]  }
 0x39c   :  { %4336 = vmatpush2.bf16.msra.mxu0 %v9791_v41  ;;  %4296 = vmatprep.subr.bf16.mxu1 %v11536_v2  ;;  %v11540_v41 = vld [vmem:[#allocation62_spill] sm:$0xff]  ;;  %v11555_v2 = vld [vmem:[#allocation16_spill] sm:$0xff] }
 0x39d   :  { %4337 = vmatprep.subr.bf16.mxu0 %v9794_v51  ;;  %v10017_v51 = vld [vmem:[#allocation8 + $0x8e0] ss:$16 sps:$4 sm:$0xff]  }
 0x39f   :  { %4297 = vmatpush2.bf16.msra.mxu1 %v11537_v25  ;;  %v10158_v25 = vrot.slane %v10137_v19, %v11555_v2  ;;  %v10239_v2 = vld [vmem:[#allocation8 + $0xbe0] ss:$16 sps:$4 sm:$0xff]  }
 0x3a0   :  { %4338 = vmatpush2.bf16.msra.mxu0 %v9797_v29  ;;  %4298 = vmatprep.subr.bf16.mxu1 %v11538_v30  ;;  %11569 = vst [vmem:[#allocation18_spill] sm:$0xff] %v10239_v2 }
 0x3a1   :  { %4339 = vmatprep.subr.bf16.mxu0 %v9800_v15  ;;  %v10023_v15 = vld [vmem:[#allocation8 + $0x8c4] ss:$16 sps:$4 sm:$0xff]  }
 0x3a3   :  { %4299 = vmatpush2.bf16.msra.mxu1 %v11539_v9 }
 0x3a4   :  { %v8689_v7 = vpop.eup %8688  ;;  %4340 = vmatpush2.bf16.msra.mxu0 %v9803_v62  ;;  %4350 = vmatprep.subr.bf16.mxu1 %v11540_v41 }
 0x3a5   :  { %v10015_v31 = vpop.eup %8690  ;;  %4300 = vmatprep.mubr.bf16.mxu1 %v8689_v7  ;;  %5191 = vmatprep.subr.bf16.mxu0 %v10010_v32 }
 0x3a6   :  { %4301 = vmatmul.mubr.bf16.vlgmr.msra.gmra.mxu1 %v10015_v31  ;;  %v10021_v29 = vpop.f32.mrf.mxu0 }
 0x3a7   :  { %4342 = vmatmul.mubr.bf16.vlgmr.msra.gmra.mxu0 %v9942_v16  ;;  %4351 = vmatpush1.bf16.msra.mxu1 %v9807_v46  ;;  %v10039_v46 = vld [vmem:[#allocation8 + $0x8a0] ss:$16 sps:$4 sm:$0xff]  }
 0x3a8   :  { %4382 = vmatprep.mubr.bf16.mxu1 %v8689_v7  ;;  %v10027_v62 = vpop.f32.mrf.mxu0  ;;  %4352 = vmatprep.subr.bf16.mxu1 %v9810_v3  ;;  %v10042_v3 = vld [vmem:[#allocation8 + $0x884] ss:$16 sps:$4 sm:$0xff]   ;;  %v10047_v16 = vld [vmem:[#allocation8 + $0x880] ss:$16 sps:$4 sm:$0xff]  }
 0x3a9   :  { %5192 = vmatpush1.bf16.msra.mxu0 %v10017_v51 }
 0x3aa   :  { %v4093_v48 = vpop.f32.mrf.mxu0  ;;  %5193 = vmatprep.subr.bf16.mxu0 %v10023_v15 }
 0x3ab   :  { %4353 = vmatpush1.bf16.msra.mxu1 %v9817_v47  ;;  %v10050_v47 = vld [vmem:[#allocation8 + $0x864] ss:$16 sps:$4 sm:$0xff]   ;;  %v10176_v48 = vld [vmem:[#allocation8 + $0xac0] ss:$16 sps:$4 sm:$0xff]  }
 0x3ac   :  { %v4094_v55 = vpop.f32.mrf.mxu0  ;;  %4354 = vmatprep.subr.bf16.mxu1 %v9821_v56  ;;  %v10055_v56 = vld [vmem:[#allocation8 + $0x860] ss:$16 sps:$4 sm:$0xff]  }
 0x3ad   :  { %5194 = vmatpush1.bf16.msra.mxu0 %v10031_v44 }
 0x3ae   :  { %5195 = vmatprep.subr.bf16.mxu0 %v10034_v58 }
 0x3af   :  { %4355 = vmatpush1.bf16.msra.mxu1 %v9825_v37  ;;  %v10058_v37 = vld [vmem:[#allocation8 + $0x844] ss:$16 sps:$4 sm:$0xff]  }
 0x3b0   :  { %4356 = vmatprep.subr.bf16.mxu1 %v9829_v5  ;;  %v11541_v5 = vld [vmem:[#allocation67_spill] sm:$0xff] }
 0x3b1   :  { %5196 = vmatpush1.bf16.msra.mxu0 %v10039_v46 }
 0x3b2   :  { %5197 = vmatprep.subr.bf16.mxu0 %v10042_v3 }
 0x3b3   :  { %4357 = vmatpush1.bf16.msra.mxu1 %v9833_v12  ;;  %v10066_v12 = vld [vmem:[#allocation8 + $0x824] ss:$16 sps:$4 sm:$0xff]  }
 0x3b4   :  { %4358 = vmatprep.subr.bf16.mxu1 %v9837_v13  ;;  %v11543_v13 = vld [vmem:[#allocation69_spill] sm:$0xff] }
 0x3b5   :  { %5198 = vmatpush1.bf16.msra.mxu0 %v10047_v16 }
 0x3b6   :  { %5199 = vmatprep.subr.bf16.mxu0 %v10050_v47 }
 0x3b7   :  { %4359 = vmatpush1.bf16.msra.mxu1 %v11541_v5 }
 0x3b8   :  { %4360 = vmatprep.subr.bf16.mxu1 %v11542_v57 }
 0x3b9   :  { %5200 = vmatpush1.bf16.msra.mxu0 %v10055_v56 }
 0x3ba   :  { %5201 = vmatprep.subr.bf16.mxu0 %v10058_v37 }
 0x3bb   :  { %4361 = vmatpush1.bf16.msra.mxu1 %v11543_v13 }
 0x3bc   :  { %4362 = vmatprep.subr.bf16.mxu1 %v11544_v0 }
 0x3bd   :  { %5202 = vmatpush1.bf16.msra.mxu0 %v10063_v60 }
 0x3be   :  { %5203 = vmatprep.subr.bf16.mxu0 %v10066_v12 }
 0x3bf   :  { %4363 = vmatpush1.bf16.msra.mxu1 %v11545_v17 }
 0x3c0   :  { %4364 = vmatprep.subr.bf16.mxu1 %v11546_v6 }
 0x3c1   :  { %5204 = vmatpush1.bf16.msra.mxu0 %v10071_v4 }
 0x3c2   :  { %5205 = vmatprep.subr.bf16.mxu0 %v10074_v11 }
 0x3c3   :  { %4365 = vmatpush1.bf16.msra.mxu1 %v11547_v43 }
 0x3c4   :  { %4366 = vmatprep.subr.bf16.mxu1 %v11548_v42  ;;  %v10187_v42 = vld [vmem:[#allocation8 + $0xa84] ss:$16 sps:$4 sm:$0xff]  }
 0x3c5   :  { %5206 = vmatpush1.bf16.msra.mxu0 %v10079_v1  ;;  %11556 = vst [vmem:[#allocation23_spill] sm:$0xff] %v10187_v42 }
 0x3c6   :  { %5207 = vmatprep.subr.bf16.mxu0 %v10082_v36 }
 0x3c7   :  { %4367 = vmatpush2.bf16.msra.mxu1 %v11549_v59  ;;  %v10190_v59 = vld [vmem:[#allocation8 + $0xa80] ss:$16 sps:$4 sm:$0xff]  }
 0x3c8   :  { %4368 = vmatprep.subr.bf16.mxu1 %v11550_v50  ;;  %11557 = vst [vmem:[#allocation24_spill] sm:$0xff] %v10190_v59  ;;  %v10193_v50 = vld [vmem:[#allocation8 + $0xa64] ss:$16 sps:$4 sm:$0xff]  }
 0x3c9   :  { %5208 = vmatpush2.bf16.msra.mxu0 %v10087_v52  ;;  %11558 = vst [vmem:[#allocation25_spill] sm:$0xff] %v10193_v50 }
 0x3ca   :  { %5209 = vmatprep.subr.bf16.mxu0 %v10090_v53 }
 0x3cb   :  { %4369 = vmatpush2.bf16.msra.mxu1 %v11551_v34  ;;  %v10196_v34 = vld [vmem:[#allocation8 + $0xa60] ss:$16 sps:$4 sm:$0xff]  }
 0x3cc   :  { %4370 = vmatprep.subr.bf16.mxu1 %v11552_v28  ;;  %11559 = vst [vmem:[#allocation26_spill] sm:$0xff] %v10196_v34  ;;  %v10199_v28 = vld [vmem:[#allocation8 + $0xa44] ss:$16 sps:$4 sm:$0xff]  }
 0x3cd   :  { %5210 = vmatpush2.bf16.msra.mxu0 %v10095_v27  ;;  %11560 = vst [vmem:[#allocation27_spill] sm:$0xff] %v10199_v28 }
 0x3ce   :  { %5211 = vmatprep.subr.bf16.mxu0 %v10098_v45 }
 0x3cf   :  { %4371 = vmatpush2.bf16.msra.mxu1 %v11553_v63  ;;  %v10202_v63 = vld [vmem:[#allocation8 + $0xa40] ss:$16 sps:$4 sm:$0xff]  }
 0x3d0   :  { %4372 = vmatprep.subr.bf16.mxu1 %v9893_v49  ;;  %v10127_v49 = vld [vmem:[#allocation8 + $0x940] ss:$16 sps:$4 sm:$0xff]   ;;  %11561 = vst [vmem:[#allocation30_spill] sm:$0xff] %v10202_v63 }
 0x3d1   :  { %5212 = vmatpush2.bf16.msra.mxu0 %v10103_v38 }
 0x3d2   :  { %5213 = vmatprep.subr.bf16.mxu0 %v10106_v35 }
 0x3d3   :  { %4373 = vmatpush2.bf16.msra.mxu1 %v9899_v20  ;;  %v10130_v20 = vld [vmem:[#allocation8 + $0x924] ss:$16 sps:$4 sm:$0xff]  }
 0x3d4   :  { %4374 = vmatprep.subr.bf16.mxu1 %v9905_v61  ;;  %v10135_v61 = vld [vmem:[#allocation8 + $0x920] ss:$16 sps:$4 sm:$0xff]  }
 0x3d5   :  { %5214 = vmatpush2.bf16.msra.mxu0 %v10111_v8 }
 0x3d6   :  { %5215 = vmatprep.subr.bf16.mxu0 %v10114_v24 }
 0x3d7   :  { %4375 = vmatpush2.bf16.msra.mxu1 %v9909_v22  ;;  %v10140_v22 = vld [vmem:[#allocation8 + $0x904] ss:$16 sps:$4 sm:$0xff]  }
 0x3d8   :  { %4376 = vmatprep.subr.bf16.mxu1 %v9913_v26  ;;  %v10144_v26 = vld [vmem:[#allocation8 + $0xae4] ss:$16 sps:$4 sm:$0xff]  }
 0x3d9   :  { %5216 = vmatpush2.bf16.msra.mxu0 %v10119_v10 }
 0x3da   :  { %5217 = vmatprep.subr.bf16.mxu0 %v10122_v39 }
 0x3db   :  { %4377 = vmatpush2.bf16.msra.mxu1 %v9917_v14  ;;  %v10148_v14 = vrot.slane %v10137_v19, %v11554_v33  ;;  %v10242_v33 = vld [vmem:[#allocation8 + $0xbc4] ss:$16 sps:$4 sm:$0xff]  }
 0x3dc   :  { %4378 = vmatprep.subr.bf16.mxu1 %v9921_v21  ;;  %v10151_v21 = vld [vmem:[#allocation8 + $0x900] ss:$16 sps:$4 sm:$0xff]   ;;  %11570 = vst [vmem:[#allocation47_spill] sm:$0xff] %v10242_v33 }
 0x3dd   :  { %5218 = vmatpush2.bf16.msra.mxu0 %v10127_v49  ;;  %v4090_v30 = vadd.f32 %v10021_v29, %v10148_v14  ;;  %v10181_v29 = vld [vmem:[#allocation8 + $0xaa4] ss:$16 sps:$4 sm:$0xff]  }
 0x3de   :  { %5219 = vmatprep.subr.bf16.mxu0 %v10130_v20 }
 0x3df   :  { %4379 = vmatpush2.bf16.msra.mxu1 %v9925_v23  ;;  %v10161_v23 = vld [vmem:[#allocation8 + $0xae0] ss:$16 sps:$4 sm:$0xff]  }
 0x3e0   :  { %4380 = vmatprep.subr.bf16.mxu1 %v9929_v18  ;;  %v10164_v18 = vld [vmem:[#allocation8 + $0xac4] ss:$16 sps:$4 sm:$0xff]  }
 0x3e1   :  { %5220 = vmatpush2.bf16.msra.mxu0 %v10135_v61 }
 0x3e2   :  { %5221 = vmatprep.subr.bf16.mxu0 %v10140_v22 }
 0x3e3   :  { %4381 = vmatpush2.bf16.msra.mxu1 %v9933_v40  ;;  %v4092_v40 = vadd.f32 %v10027_v62, %v10158_v25  ;;  %v10184_v62 = vld [vmem:[#allocation8 + $0xaa0] ss:$16 sps:$4 sm:$0xff]  }
 0x3e4   :  { %5232 = vmatprep.subr.bf16.mxu1 %v10144_v26 }
 0x3e5   :  { %5222 = vmatpush2.bf16.msra.mxu0 %v10151_v21 }
 0x3e6   :  { %4383 = vmatmul.mubr.bf16.vlgmr.msra.gmra.mxu1 %v10015_v31  ;;  %v4130_v9 = vpop.f32.mrf.mxu1  ;;  %v10170_v7 = vpop.f32.mrf.mxu0  ;;  %5273 = vmatprep.subr.bf16.mxu0 %v10154_v54 }
 0x3e7   :  { %v4131_v41 = vadd.f32 %v4130_v9, %v4090_v30  ;;  %5233 = vmatpush1.bf16.msra.mxu1 %v10161_v23  ;;  %v10205_v30 = vld [vmem:[#allocation8 + $0xa24] ss:$16 sps:$4 sm:$0xff]   ;;  %v10207_v9 = vld [vmem:[#allocation8 + $0x8e8] ss:$16 sps:$4 sm:$0xff]  }
 0x3e8   :  { %v4132_v55 = vpop.f32.mrf.mxu1  ;;  %v10178_v5 = vpop.f32.mrf.mxu0  ;;  %5234 = vmatprep.subr.bf16.mxu1 %v10164_v18  ;;  %11562 = vst [vmem:[#allocation31_spill] sm:$0xff] %v10205_v30 }
 0x3e9   :  { %v4133_v31 = vadd.f32 %v4132_v55, %v4092_v40  ;;  %v4219_v57 = vpack.c.bf16 %v4131_v41, %v4131_v41  ;;  %v10209_v41 = vld [vmem:[#allocation8 + $0x8cc] ss:$16 sps:$4 sm:$0xff]   ;;  %v10212_v55 = vld [vmem:[#allocation8 + $0xa20] ss:$16 sps:$4 sm:$0xff]  }
 0x3ea   :  { %v4134_v13 = vpop.f32.mrf.mxu1  ;;  %v4175_v0 = vpop.f32.mrf.mxu0  ;;  %11563 = vst [vmem:[#allocation32_spill] sm:$0xff] %v10212_v55 }
 0x3eb   :  { %v4220_v17 = vpack.c.bf16 %v4133_v31, %v4133_v31  ;;  %5235 = vmatpush1.bf16.msra.mxu1 %v10176_v48  ;;  %v10221_v13 = vld [vmem:[#allocation8 + $0x8c8] ss:$16 sps:$4 sm:$0xff]   ;;  %v10224_v0 = vld [vmem:[#allocation8 + $0x8ac] ss:$16 sps:$4 sm:$0xff]  }
 0x3ec   :  { %v4135_v6 = vpop.f32.mrf.mxu1  ;;  %v4176_v43 = vpop.f32.mrf.mxu0  ;;  %5236 = vmatprep.subr.bf16.mxu1 %v10181_v29 }
 0x3ed   :  { %8692 = vtanh.bf16 %v4220_v17  ;;  %v10227_v17 = vld [vmem:[#allocation8 + $0xa00] ss:$16 sps:$4 sm:$0xff]   ;;  %v10230_v6 = vld [vmem:[#allocation8 + $0xbe4] ss:$16 sps:$4 sm:$0xff]   ;;  %v10233_v43 = vld [vmem:[#allocation8 + $0x8a8] ss:$16 sps:$4 sm:$0xff]  }
 0x3ee   :  { %8694 = vtanh.bf16 %v4219_v57  ;;  %v10217_v57 = vld [vmem:[#allocation8 + $0xa04] ss:$16 sps:$4 sm:$0xff]   ;;  %11565 = vst [vmem:[#allocation34_spill] sm:$0xff] %v10227_v17  ;;  %11566 = vst [vmem:[#allocation43_spill] sm:$0xff] %v10230_v6 }
 0x3ef   :  { %5237 = vmatpush1.bf16.msra.mxu1 %v10184_v62  ;;  %11564 = vst [vmem:[#allocation33_spill] sm:$0xff] %v10217_v57  ;;  %11567 = vst [vmem:[#allocation17_spill] sm:$0xff] %v10233_v43 }
 0x3f0   :  { %5238 = vmatprep.subr.bf16.mxu1 %v10187_v42 }
 0x3f3   :  { %5239 = vmatpush1.bf16.msra.mxu1 %v10190_v59 }
 0x3f4   :  { %5240 = vmatprep.subr.bf16.mxu1 %v10193_v50  ;;  %v11599_v50 = vld [vmem:[#allocation28_spill] sm:$0xff] }
 0x3f7   :  { %5241 = vmatpush1.bf16.msra.mxu1 %v10196_v34  ;;  %v10272_v34 = vld [vmem:[#allocation8 + $0x82c] ss:$16 sps:$4 sm:$0xff]  }
 0x3f8   :  { %5242 = vmatprep.subr.bf16.mxu1 %v10199_v28  ;;  %v10263_v28 = vld [vmem:[#allocation8 + $0xba0] ss:$16 sps:$4 sm:$0xff]   ;;  %11580 = vst [vmem:[#allocation56_spill] sm:$0xff] %v10272_v34 }
 0x3f9   :  { %11577 = vst [vmem:[#allocation37_spill] sm:$0xff] %v10263_v28 }
 0x3fb   :  { %v8693_v40 = vpop.eup %8692  ;;  %5243 = vmatpush1.bf16.msra.mxu1 %v10202_v63  ;;  %v10260_v63 = vld [vmem:[#allocation8 + $0x84c] ss:$16 sps:$4 sm:$0xff]  }
 0x3fc   :  { %v10214_v31 = vpop.eup %8694  ;;  %5223 = vmatprep.mubr.bf16.mxu0 %v8693_v40  ;;  %5244 = vmatprep.subr.bf16.mxu1 %v10205_v30  ;;  %v10251_v30 = vld [vmem:[#allocation8 + $0xbc0] ss:$16 sps:$4 sm:$0xff]   ;;  %11576 = vst [vmem:[#allocation52_spill] sm:$0xff] %v10260_v63 }
 0x3fd   :  { %5224 = vmatmul.mubr.bf16.vlgmr.msra.gmra.mxu0 %v10214_v31  ;;  %11573 = vst [vmem:[#allocation35_spill] sm:$0xff] %v10251_v30 }
 0x3fe   :  { %5274 = vmatpush1.bf16.msra.mxu0 %v10207_v9  ;;  %5305 = vmatprep.mubr.bf16.mxu0 %v8693_v40  ;;  %v10236_v40 = vld [vmem:[#allocation8 + $0x88c] ss:$16 sps:$4 sm:$0xff]  }
 0x3ff   :  { %5275 = vmatprep.subr.bf16.mxu0 %v10209_v41  ;;  %5245 = vmatpush1.bf16.msra.mxu1 %v10212_v55  ;;  %11568 = vst [vmem:[#allocation44_spill] sm:$0xff] %v10236_v40  ;;  %v10248_v55 = vld [vmem:[#allocation8 + $0x86c] ss:$16 sps:$4 sm:$0xff]  }
 0x400   :  { %5246 = vmatprep.subr.bf16.mxu1 %v10217_v57  ;;  %v10245_v57 = vld [vmem:[#allocation8 + $0x888] ss:$16 sps:$4 sm:$0xff]   ;;  %11572 = vst [vmem:[#allocation48_spill] sm:$0xff] %v10248_v55 }
 0x401   :  { %11571 = vst [vmem:[#allocation19_spill] sm:$0xff] %v10245_v57 }
 0x402   :  { %5276 = vmatpush1.bf16.msra.mxu0 %v10221_v13 }
 0x403   :  { %5277 = vmatprep.subr.bf16.mxu0 %v10224_v0  ;;  %5247 = vmatpush1.bf16.msra.mxu1 %v10227_v17  ;;  %v10254_v17 = vld [vmem:[#allocation8 + $0xba4] ss:$16 sps:$4 sm:$0xff]  }
 0x404   :  { %5248 = vmatprep.subr.bf16.mxu1 %v10230_v6  ;;  %11574 = vst [vmem:[#allocation51_spill] sm:$0xff] %v10254_v17  ;;  %v10257_v6 = vld [vmem:[#allocation8 + $0x868] ss:$16 sps:$4 sm:$0xff]  }
 0x405   :  { %11575 = vst [vmem:[#allocation36_spill] sm:$0xff] %v10257_v6 }
 0x406   :  { %5278 = vmatpush1.bf16.msra.mxu0 %v10233_v43 }
 0x407   :  { %5279 = vmatprep.subr.bf16.mxu0 %v10236_v40  ;;  %5249 = vmatpush2.bf16.msra.mxu1 %v10239_v2  ;;  %v10266_v2 = vld [vmem:[#allocation8 + $0xb84] ss:$16 sps:$4 sm:$0xff]  }
 0x408   :  { %5250 = vmatprep.subr.bf16.mxu1 %v10242_v33  ;;  %11578 = vst [vmem:[#allocation55_spill] sm:$0xff] %v10266_v2  ;;  %v10269_v33 = vld [vmem:[#allocation8 + $0x848] ss:$16 sps:$4 sm:$0xff]  }
 0x409   :  { %11579 = vst [vmem:[#allocation38_spill] sm:$0xff] %v10269_v33 }
 0x40a   :  { %5280 = vmatpush1.bf16.msra.mxu0 %v10245_v57  ;;  %v11602_v57 = vld [vmem:[#allocation29_spill] sm:$0xff] }
 0x40b   :  { %5281 = vmatprep.subr.bf16.mxu0 %v10248_v55  ;;  %5251 = vmatpush2.bf16.msra.mxu1 %v10251_v30  ;;  %v10275_v55 = vld [vmem:[#allocation8 + $0xb80] ss:$16 sps:$4 sm:$0xff]   ;;  %v10278_v30 = vld [vmem:[#allocation8 + $0xb64] ss:$16 sps:$4 sm:$0xff]  }
 0x40c   :  { %5252 = vmatprep.subr.bf16.mxu1 %v10254_v17  ;;  %11581 = vst [vmem:[#allocation39_spill] sm:$0xff] %v10275_v55  ;;  %11582 = vst [vmem:[#allocation59_spill] sm:$0xff] %v10278_v30  ;;  %v10281_v17 = vld [vmem:[#allocation8 + $0x828] ss:$16 sps:$4 sm:$0xff]  }
 0x40d   :  { %11583 = vst [vmem:[#allocation40_spill] sm:$0xff] %v10281_v17 }
 0x40e   :  { %5282 = vmatpush1.bf16.msra.mxu0 %v10257_v6  ;;  %v10284_v6 = vld [vmem:[#allocation8 + $0x80c] ss:$16 sps:$4 sm:$0xff]  }
 0x40f   :  { %5283 = vmatprep.subr.bf16.mxu0 %v10260_v63  ;;  %5253 = vmatpush2.bf16.msra.mxu1 %v10263_v28  ;;  %11584 = vst [vmem:[#allocation60_spill] sm:$0xff] %v10284_v6  ;;  %v10287_v63 = vld [vmem:[#allocation8 + $0xb60] ss:$16 sps:$4 sm:$0xff]   ;;  %v10290_v28 = vld [vmem:[#allocation8 + $0xb44] ss:$16 sps:$4 sm:$0xff]  }
 0x410   :  { %5254 = vmatprep.subr.bf16.mxu1 %v10266_v2  ;;  %11585 = vst [vmem:[#allocation63_spill] sm:$0xff] %v10287_v63  ;;  %11586 = vst [vmem:[#allocation66_spill] sm:$0xff] %v10290_v28  ;;  %v10293_v2 = vld [vmem:[#allocation8 + $0x808] ss:$16 sps:$4 sm:$0xff]  }
 0x411   :  { %11587 = vst [vmem:[#allocation41_spill] sm:$0xff] %v10293_v2 }
 0x412   :  { %5284 = vmatpush1.bf16.msra.mxu0 %v10269_v33  ;;  %v10296_v33 = vld [vmem:[#allocation8 + $0x9ec] ss:$16 sps:$4 sm:$0xff]  }
 0x413   :  { %5285 = vmatprep.subr.bf16.mxu0 %v10272_v34  ;;  %5255 = vmatpush2.bf16.msra.mxu1 %v10275_v55  ;;  %11588 = vst [vmem:[#allocation64_spill] sm:$0xff] %v10296_v33  ;;  %v10299_v34 = vld [vmem:[#allocation8 + $0xb40] ss:$16 sps:$4 sm:$0xff]   ;;  %v10302_v55 = vld [vmem:[#allocation8 + $0xb24] ss:$16 sps:$4 sm:$0xff]  }
 0x414   :  { %5256 = vmatprep.subr.bf16.mxu1 %v10278_v30  ;;  %11589 = vst [vmem:[#allocation42_spill] sm:$0xff] %v10299_v34  ;;  %11590 = vst [vmem:[#allocation65_spill] sm:$0xff] %v10302_v55  ;;  %v10305_v30 = vld [vmem:[#allocation8 + $0x9e8] ss:$16 sps:$4 sm:$0xff]  }
 0x415   :  { %11591 = vst [vmem:[#allocation45_spill] sm:$0xff] %v10305_v30 }
 0x416   :  { %5286 = vmatpush1.bf16.msra.mxu0 %v10281_v17  ;;  %v10308_v17 = vld [vmem:[#allocation8 + $0x9cc] ss:$16 sps:$4 sm:$0xff]  }
 0x417   :  { %5287 = vmatprep.subr.bf16.mxu0 %v10284_v6  ;;  %5257 = vmatpush2.bf16.msra.mxu1 %v10287_v63  ;;  %11592 = vst [vmem:[#allocation46_spill] sm:$0xff] %v10308_v17  ;;  %v10311_v6 = vld [vmem:[#allocation8 + $0xb20] ss:$16 sps:$4 sm:$0xff]   ;;  %v10314_v63 = vld [vmem:[#allocation8 + $0xb04] ss:$16 sps:$4 sm:$0xff]  }
 0x418   :  { %5258 = vmatprep.subr.bf16.mxu1 %v10290_v28  ;;  %11593 = vst [vmem:[#allocation49_spill] sm:$0xff] %v10311_v6  ;;  %11594 = vst [vmem:[#allocation50_spill] sm:$0xff] %v10314_v63  ;;  %v10317_v28 = vld [vmem:[#allocation8 + $0x9c8] ss:$16 sps:$4 sm:$0xff]  }
 0x419   :  { %11595 = vst [vmem:[#allocation53_spill] sm:$0xff] %v10317_v28 }
 0x41a   :  { %5288 = vmatpush1.bf16.msra.mxu0 %v10293_v2  ;;  %v10320_v2 = vld [vmem:[#allocation8 + $0x9ac] ss:$16 sps:$4 sm:$0xff]  }
 0x41b   :  { %5289 = vmatprep.subr.bf16.mxu0 %v10296_v33  ;;  %5259 = vmatpush2.bf16.msra.mxu1 %v10299_v34  ;;  %11596 = vst [vmem:[#allocation54_spill] sm:$0xff] %v10320_v2  ;;  %v10323_v33 = vld [vmem:[#allocation8 + $0xb00] ss:$16 sps:$4 sm:$0xff]   ;;  %v10326_v34 = vld [vmem:[#allocation8 + $0xaec] ss:$16 sps:$4 sm:$0xff]  }
 0x41c   :  { %5260 = vmatprep.subr.bf16.mxu1 %v10302_v55  ;;  %11597 = vst [vmem:[#allocation57_spill] sm:$0xff] %v10323_v33  ;;  %11598 = vst [vmem:[#allocation58_spill] sm:$0xff] %v10326_v34  ;;  %v10330_v55 = vrot.slane %v10137_v19, %v11599_v50 }
 0x41e   :  { %5290 = vmatpush2.bf16.msra.mxu0 %v10305_v30  ;;  %11600 = vst [vmem:[#allocation61_spill] sm:$0xff] %v10330_v55  ;;  %v10333_v30 = vld [vmem:[#allocation8 + $0x9a8] ss:$16 sps:$4 sm:$0xff]   ;;  %v4172_v50 = vadd.f32 %v10170_v7, %v10330_v55 }
 0x41f   :  { %5291 = vmatprep.subr.bf16.mxu0 %v10308_v17  ;;  %5261 = vmatpush2.bf16.msra.mxu1 %v10311_v6  ;;  %11601 = vst [vmem:[#allocation62_spill] sm:$0xff] %v10333_v30  ;;  %v10337_v17 = vrot.slane %v10137_v19, %v11602_v57  ;;  %v10340_v6 = vld [vmem:[#allocation8 + $0x98c] ss:$16 sps:$4 sm:$0xff]  }
 0x420   :  { %5262 = vmatprep.subr.bf16.mxu1 %v10314_v63 }
 0x421   :  { %v4174_v19 = vadd.f32 %v10178_v5, %v10337_v17  ;;  %v10362_v5 = vld [vmem:[#allocation8 + $0x94c] ss:$16 sps:$4 sm:$0xff]  }
 0x422   :  { %5292 = vmatpush2.bf16.msra.mxu0 %v10317_v28  ;;  %v10347_v28 = vld [vmem:[#allocation8 + $0x988] ss:$16 sps:$4 sm:$0xff]  }
 0x423   :  { %5293 = vmatprep.subr.bf16.mxu0 %v10320_v2  ;;  %5263 = vmatpush2.bf16.msra.mxu1 %v10323_v33  ;;  %v10354_v2 = vld [vmem:[#allocation8 + $0x96c] ss:$16 sps:$4 sm:$0xff]  }
 0x424   :  { %5314 = vmatprep.subr.bf16.mxu1 %v10326_v34 }
 0x426   :  { %v4212_v63 = vpop.f32.mrf.mxu1  ;;  %5294 = vmatpush2.bf16.msra.mxu0 %v10333_v30  ;;  %v10359_v30 = vld [vmem:[#allocation8 + $0x968] ss:$16 sps:$4 sm:$0xff]  }
 0x427   :  { %v4213_v57 = vadd.f32 %v4212_v63, %v4172_v50  ;;  %v10351_v59 = vpop.f32.mrf.mxu0  ;;  %5295 = vmatprep.subr.bf16.mxu0 %v10340_v6 }
 0x428   :  { %v4214_v33 = vpop.f32.mrf.mxu1 }
 0x429   :  { %v4215_v34 = vadd.f32 %v4214_v33, %v4174_v19  ;;  %v10356_v40 = vpop.f32.mrf.mxu0  ;;  %v4221_v7 = vpack.c.bf16 %v4213_v57, %v4213_v57  ;;  %v10365_v33 = vld [vmem:[#allocation8 + $0x948] ss:$16 sps:$4 sm:$0xff]   ;;  %v10374_v57 = vld [vmem:[#allocation8 + $0x90c] ss:$16 sps:$4 sm:$0xff]  }
 0x42a   :  { %v4216_v55 = vpop.f32.mrf.mxu1  ;;  %5296 = vmatpush2.bf16.msra.mxu0 %v10347_v28 }
 0x42b   :  { %v4222_v42 = vpack.c.bf16 %v4215_v34, %v4215_v34  ;;  %v4265_v43 = vpop.f32.mrf.mxu0  ;;  %5297 = vmatprep.subr.bf16.mxu0 %v10354_v2  ;;  %v10368_v55 = vld [vmem:[#allocation8 + $0x92c] ss:$16 sps:$4 sm:$0xff]   ;;  %v10371_v34 = vld [vmem:[#allocation8 + $0x928] ss:$16 sps:$4 sm:$0xff]  }
 0x42c   :  { %v4217_v50 = vpop.f32.mrf.mxu1  ;;  %v10381_v43 = vld [vmem:[#allocation8 + $0xae8] ss:$16 sps:$4 sm:$0xff]  }
 0x42d   :  { %8696 = vtanh.bf16 %v4222_v42  ;;  %v4266_v63 = vpop.f32.mrf.mxu0  ;;  %v10377_v42 = vld [vmem:[#allocation8 + $0x908] ss:$16 sps:$4 sm:$0xff]  }
 0x42e   :  { %8698 = vtanh.bf16 %v4221_v7  ;;  %5298 = vmatpush2.bf16.msra.mxu0 %v10359_v30  ;;  %11603 = vst [vmem:[#allocation67_spill] sm:$0xff] %v10377_v42  ;;  %v10384_v7 = vld [vmem:[#allocation8 + $0xacc] ss:$16 sps:$4 sm:$0xff]   ;;  %v10391_v63 = vld [vmem:[#allocation8 + $0xac8] ss:$16 sps:$4 sm:$0xff]  }
 0x42f   :  { %5299 = vmatprep.subr.bf16.mxu0 %v10362_v5 }
 0x432   :  { %5300 = vmatpush2.bf16.msra.mxu0 %v10365_v33 }
 0x433   :  { %5301 = vmatprep.subr.bf16.mxu0 %v10368_v55 }
 0x436   :  { %5302 = vmatpush2.bf16.msra.mxu0 %v10371_v34 }
 0x437   :  { %5303 = vmatprep.subr.bf16.mxu0 %v10374_v57 }
 0x43a   :  { %5304 = vmatpush2.bf16.msra.mxu0 %v10377_v42  ;;  %v10395_v42 = vld [vmem:[#allocation8 + $0xaac] ss:$16 sps:$4 sm:$0xff]  }
 0x43b   :  { %v8697_v19 = vpop.eup %8696  ;;  %5363 = vmatprep.subr.bf16.mxu0 %v10010_v32  ;;  %v10399_v32 = vld [vmem:[#allocation8 + $0xaa8] ss:$16 sps:$4 sm:$0xff]  }
 0x43c   :  { %v10386_v50 = vpop.eup %8698  ;;  %5264 = vmatprep.mubr.bf16.mxu1 %v8697_v19 }
 0x43d   :  { %5265 = vmatmul.mubr.bf16.vlgmr.msra.gmra.mxu1 %v10386_v50  ;;  %5306 = vmatmul.mubr.bf16.vlgmr.msra.gmra.mxu0 %v10214_v31  ;;  %v10403_v31 = vld [vmem:[#allocation8 + $0xa8c] ss:$16 sps:$4 sm:$0xff]  }
 0x43e   :  { %5315 = vmatpush1.bf16.msra.mxu1 %v10381_v43  ;;  %5346 = vmatprep.mubr.bf16.mxu1 %v8697_v19 }
 0x43f   :  { %5364 = vmatpush1.bf16.msra.mxu0 %v10017_v51  ;;  %5316 = vmatprep.subr.bf16.mxu1 %v10384_v7  ;;  %v10407_v51 = vld [vmem:[#allocation8 + $0xa88] ss:$16 sps:$4 sm:$0xff]  }
 0x440   :  { %5365 = vmatprep.subr.bf16.mxu0 %v10023_v15  ;;  %v10411_v15 = vld [vmem:[#allocation8 + $0xa6c] ss:$16 sps:$4 sm:$0xff]  }
 0x442   :  { %5317 = vmatpush1.bf16.msra.mxu1 %v10391_v63 }
 0x443   :  { %5366 = vmatpush1.bf16.msra.mxu0 %v10031_v44  ;;  %5318 = vmatprep.subr.bf16.mxu1 %v10395_v42  ;;  %v10415_v44 = vld [vmem:[#allocation8 + $0xa68] ss:$16 sps:$4 sm:$0xff]  }
 0x444   :  { %5367 = vmatprep.subr.bf16.mxu0 %v10034_v58  ;;  %v10419_v58 = vld [vmem:[#allocation8 + $0xa4c] ss:$16 sps:$4 sm:$0xff]  }
 0x446   :  { %5319 = vmatpush1.bf16.msra.mxu1 %v10399_v32 }
 0x447   :  { %5368 = vmatpush1.bf16.msra.mxu0 %v10039_v46  ;;  %5320 = vmatprep.subr.bf16.mxu1 %v10403_v31  ;;  %v10423_v46 = vld [vmem:[#allocation8 + $0xa48] ss:$16 sps:$4 sm:$0xff]  }
 0x448   :  { %5369 = vmatprep.subr.bf16.mxu0 %v10042_v3  ;;  %v10427_v3 = vld [vmem:[#allocation8 + $0xa2c] ss:$16 sps:$4 sm:$0xff]  }
 0x44a   :  { %5321 = vmatpush1.bf16.msra.mxu1 %v10407_v51 }
 0x44b   :  { %5370 = vmatpush1.bf16.msra.mxu0 %v10047_v16  ;;  %5322 = vmatprep.subr.bf16.mxu1 %v10411_v15  ;;  %v10431_v16 = vld [vmem:[#allocation8 + $0xa28] ss:$16 sps:$4 sm:$0xff]  }
 0x44c   :  { %5371 = vmatprep.subr.bf16.mxu0 %v10050_v47  ;;  %v10435_v47 = vld [vmem:[#allocation8 + $0xa0c] ss:$16 sps:$4 sm:$0xff]  }
 0x44e   :  { %5323 = vmatpush1.bf16.msra.mxu1 %v10415_v44 }
 0x44f   :  { %5372 = vmatpush1.bf16.msra.mxu0 %v10055_v56  ;;  %5324 = vmatprep.subr.bf16.mxu1 %v10419_v58  ;;  %v10439_v56 = vld [vmem:[#allocation8 + $0xa08] ss:$16 sps:$4 sm:$0xff]  }
 0x450   :  { %5373 = vmatprep.subr.bf16.mxu0 %v10058_v37  ;;  %v10443_v37 = vld [vmem:[#allocation8 + $0xbec] ss:$16 sps:$4 sm:$0xff]  }
 0x452   :  { %5325 = vmatpush1.bf16.msra.mxu1 %v10423_v46 }
 0x453   :  { %5374 = vmatpush1.bf16.msra.mxu0 %v10063_v60  ;;  %5326 = vmatprep.subr.bf16.mxu1 %v10427_v3  ;;  %v10447_v60 = vld [vmem:[#allocation8 + $0xbe8] ss:$16 sps:$4 sm:$0xff]  }
 0x454   :  { %5375 = vmatprep.subr.bf16.mxu0 %v10066_v12  ;;  %11604 = vst [vmem:[#allocation68_spill] sm:$0xff] %v10447_v60  ;;  %v10451_v12 = vld [vmem:[#allocation8 + $0xbcc] ss:$16 sps:$4 sm:$0xff]  }
 0x455   :  { %11605 = vst [vmem:[#allocation69_spill] sm:$0xff] %v10451_v12 }
 0x456   :  { %5327 = vmatpush1.bf16.msra.mxu1 %v10431_v16 }
 0x457   :  { %5376 = vmatpush1.bf16.msra.mxu0 %v10071_v4  ;;  %5328 = vmatprep.subr.bf16.mxu1 %v10435_v47  ;;  %v10455_v4 = vld [vmem:[#allocation8 + $0xbc8] ss:$16 sps:$4 sm:$0xff]  }
 0x458   :  { %5377 = vmatprep.subr.bf16.mxu0 %v10074_v11  ;;  %11606 = vst [vmem:[#allocation70_spill] sm:$0xff] %v10455_v4  ;;  %v10459_v11 = vld [vmem:[#allocation8 + $0xbac] ss:$16 sps:$4 sm:$0xff]  }
 0x459   :  { %11607 = vst [vmem:[#allocation71_spill] sm:$0xff] %v10459_v11 }
 0x45a   :  { %5329 = vmatpush1.bf16.msra.mxu1 %v10439_v56 }
 0x45b   :  { %5378 = vmatpush1.bf16.msra.mxu0 %v10079_v1  ;;  %5330 = vmatprep.subr.bf16.mxu1 %v10443_v37  ;;  %v10463_v1 = vld [vmem:[#allocation8 + $0xba8] ss:$16 sps:$4 sm:$0xff]  }
 0x45c   :  { %5379 = vmatprep.subr.bf16.mxu0 %v10082_v36  ;;  %11608 = vst [vmem:[#allocation72_spill] sm:$0xff] %v10463_v1  ;;  %v10467_v36 = vld [vmem:[#allocation8 + $0xb8c] ss:$16 sps:$4 sm:$0xff]  }
 0x45e   :  { %5331 = vmatpush2.bf16.msra.mxu1 %v10447_v60  ;;  %v10487_v60 = vld [vmem:[#allocation8 + $0xb68] ss:$16 sps:$4 sm:$0xff]  }
 0x45f   :  { %5380 = vmatpush2.bf16.msra.mxu0 %v10087_v52  ;;  %5332 = vmatprep.subr.bf16.mxu1 %v10451_v12  ;;  %v4262_v52 = vadd.f32 %v10351_v59, %v10148_v14  ;;  %v10473_v12 = vld [vmem:[#allocation8 + $0xb88] ss:$16 sps:$4 sm:$0xff]  }
 0x460   :  { %5381 = vmatprep.subr.bf16.mxu0 %v10090_v53  ;;  %v4264_v53 = vadd.f32 %v10356_v40, %v10158_v25 }
 0x462   :  { %5333 = vmatpush2.bf16.msra.mxu1 %v10455_v4 }
 0x463   :  { %5382 = vmatpush2.bf16.msra.mxu0 %v10095_v27  ;;  %5334 = vmatprep.subr.bf16.mxu1 %v10459_v11  ;;  %v10481_v11 = vld [vmem:[#allocation8 + $0xb6c] ss:$16 sps:$4 sm:$0xff]  }
 0x464   :  { %5383 = vmatprep.subr.bf16.mxu0 %v10098_v45 }
 0x466   :  { %5335 = vmatpush2.bf16.msra.mxu1 %v10463_v1  ;;  %v4302_v19 = vpop.f32.mrf.mxu1 }
 0x467   :  { %5384 = vmatpush2.bf16.msra.mxu0 %v10103_v38  ;;  %v4303_v27 = vadd.f32 %v4302_v19, %v4262_v52  ;;  %v10478_v4 = vpop.f32.mrf.mxu0  ;;  %5336 = vmatprep.subr.bf16.mxu1 %v10467_v36  ;;  %v10491_v52 = vld [vmem:[#allocation8 + $0xb4c] ss:$16 sps:$4 sm:$0xff]  }
 0x468   :  { %v4304_v45 = vpop.f32.mrf.mxu1  ;;  %5385 = vmatprep.subr.bf16.mxu0 %v10106_v35 }
 0x469   :  { %v4305_v14 = vadd.f32 %v4304_v45, %v4264_v53  ;;  %v10484_v59 = vpop.f32.mrf.mxu0  ;;  %v4391_v25 = vpack.c.bf16 %v4303_v27, %v4303_v27  ;;  %v10495_v53 = vld [vmem:[#allocation8 + $0xb48] ss:$16 sps:$4 sm:$0xff]   ;;  %v11625_v27 = vld [vmem:[#allocation40_spill] sm:$0xff] }
 0x46a   :  { %5337 = vmatpush2.bf16.msra.mxu1 %v10473_v12  ;;  %v4306_v1 = vpop.f32.mrf.mxu1  ;;  %v11626_v45 = vld [vmem:[#allocation33_spill] sm:$0xff] }
 0x46b   :  { %v4392_v38 = vpack.c.bf16 %v4305_v14, %v4305_v14  ;;  %5386 = vmatpush2.bf16.msra.mxu0 %v10111_v8  ;;  %v4347_v40 = vpop.f32.mrf.mxu0  ;;  %5338 = vmatprep.subr.bf16.mxu1 %v10481_v11  ;;  %v10499_v8 = vld [vmem:[#allocation8 + $0xb2c] ss:$16 sps:$4 sm:$0xff]   ;;  %v10503_v1 = vld [vmem:[#allocation8 + $0xb28] ss:$16 sps:$4 sm:$0xff]  }
 0x46c   :  { %v4307_v19 = vpop.f32.mrf.mxu1  ;;  %5387 = vmatprep.subr.bf16.mxu0 %v10114_v24  ;;  %v10507_v24 = vld [vmem:[#allocation8 + $0xb0c] ss:$16 sps:$4 sm:$0xff]   ;;  %v11630_v40 = vld [vmem:[#allocation43_spill] sm:$0xff] }
 0x46d   :  { %8700 = vtanh.bf16 %v4392_v38  ;;  %v4348_v35 = vpop.f32.mrf.mxu0  ;;  %v11627_v14 = vld [vmem:[#allocation60_spill] sm:$0xff]  ;;  %v11629_v38 = vld [vmem:[#allocation41_spill] sm:$0xff] }
 0x46e   :  { %5339 = vmatpush2.bf16.msra.mxu1 %v10487_v60  ;;  %8702 = vtanh.bf16 %v4391_v25  ;;  %v11628_v25 = vld [vmem:[#allocation34_spill] sm:$0xff]  ;;  %v11631_v19 = vld [vmem:[#allocation64_spill] sm:$0xff] }
 0x46f   :  { %5388 = vmatpush2.bf16.msra.mxu0 %v10119_v10  ;;  %5340 = vmatprep.subr.bf16.mxu1 %v10491_v52  ;;  %v10511_v10 = vld [vmem:[#allocation8 + $0xb08] ss:$16 sps:$4 sm:$0xff]   ;;  %v11632_v35 = vld [vmem:[#allocation18_spill] sm:$0xff] }
 0x470   :  { %5389 = vmatprep.subr.bf16.mxu0 %v10122_v39 }
 0x472   :  { %5341 = vmatpush2.bf16.msra.mxu1 %v10495_v53 }
 0x473   :  { %5390 = vmatpush2.bf16.msra.mxu0 %v10127_v49  ;;  %5342 = vmatprep.subr.bf16.mxu1 %v10499_v8 }
 0x474   :  { %5391 = vmatprep.subr.bf16.mxu0 %v10130_v20  ;;  %v11609_v20 = vld [vmem:[#allocation17_spill] sm:$0xff] }
 0x476   :  { %5343 = vmatpush2.bf16.msra.mxu1 %v10503_v1 }
 0x477   :  { %5392 = vmatpush2.bf16.msra.mxu0 %v10135_v61  ;;  %5344 = vmatprep.subr.bf16.mxu1 %v10507_v24  ;;  %v11610_v61 = vld [vmem:[#allocation23_spill] sm:$0xff] }
 0x478   :  { %5393 = vmatprep.subr.bf16.mxu0 %v10140_v22  ;;  %v11611_v22 = vld [vmem:[#allocation44_spill] sm:$0xff] }
 0x47a   :  { %5345 = vmatpush2.bf16.msra.mxu1 %v10511_v10 }
 0x47b   :  { %v8701_v39 = vpop.eup %8700  ;;  %5394 = vmatpush2.bf16.msra.mxu0 %v10151_v21  ;;  %5404 = vmatprep.subr.bf16.mxu1 %v10144_v26  ;;  %v11612_v26 = vld [vmem:[#allocation24_spill] sm:$0xff]  ;;  %v11613_v21 = vld [vmem:[#allocation19_spill] sm:$0xff] }
 0x47c   :  { %5395 = vmatprep.mubr.bf16.mxu0 %v8701_v39  ;;  %5445 = vmatprep.subr.bf16.mxu0 %v10154_v54  ;;  %v10520_v49 = vpop.eup %8702  ;;  %v11614_v54 = vld [vmem:[#allocation25_spill] sm:$0xff] }
 0x47d   :  { %5347 = vmatmul.mubr.bf16.vlgmr.msra.gmra.mxu1 %v10386_v50  ;;  %v11624_v50 = vld [vmem:[#allocation32_spill] sm:$0xff] }
 0x47e   :  { %5405 = vmatpush1.bf16.msra.mxu1 %v10161_v23  ;;  %5396 = vmatmul.mubr.bf16.vlgmr.msra.gmra.mxu0 %v10520_v49  ;;  %v11615_v23 = vld [vmem:[#allocation48_spill] sm:$0xff] }
 0x47f   :  { %5446 = vmatpush1.bf16.msra.mxu0 %v10207_v9  ;;  %5477 = vmatprep.mubr.bf16.mxu0 %v8701_v39  ;;  %v11620_v9 = vld [vmem:[#allocation30_spill] sm:$0xff]  ;;  %v11633_v39 = vld [vmem:[#allocation45_spill] sm:$0xff] }
 0x480   :  { %5406 = vmatprep.subr.bf16.mxu1 %v10164_v18  ;;  %5447 = vmatprep.subr.bf16.mxu0 %v10209_v41  ;;  %v11616_v18 = vld [vmem:[#allocation26_spill] sm:$0xff] }
 0x481   :  { %v11621_v41 = vld [vmem:[#allocation38_spill] sm:$0xff] }
 0x482   :  { %5407 = vmatpush1.bf16.msra.mxu1 %v10176_v48  ;;  %v11617_v48 = vld [vmem:[#allocation36_spill] sm:$0xff] }
 0x483   :  { %5448 = vmatpush1.bf16.msra.mxu0 %v10221_v13  ;;  %5408 = vmatprep.subr.bf16.mxu1 %v10181_v29  ;;  %v11618_v29 = vld [vmem:[#allocation27_spill] sm:$0xff] }
 0x484   :  { %5449 = vmatprep.subr.bf16.mxu0 %v10224_v0  ;;  %v11622_v13 = vld [vmem:[#allocation31_spill] sm:$0xff]  ;;  %v11623_v0 = vld [vmem:[#allocation56_spill] sm:$0xff] }
 0x486   :  { %5409 = vmatpush1.bf16.msra.mxu1 %v10184_v62  ;;  %v11619_v62 = vld [vmem:[#allocation52_spill] sm:$0xff] }
 0x487   :  { %5450 = vmatpush1.bf16.msra.mxu0 %v11609_v20  ;;  %5410 = vmatprep.subr.bf16.mxu1 %v11610_v61  ;;  %v11634_v20 = vld [vmem:[#allocation47_spill] sm:$0xff]  ;;  %v11635_v61 = vld [vmem:[#allocation46_spill] sm:$0xff] }
 0x488   :  { %5451 = vmatprep.subr.bf16.mxu0 %v11611_v22  ;;  %v11636_v22 = vld [vmem:[#allocation35_spill] sm:$0xff] }
 0x48a   :  { %5411 = vmatpush1.bf16.msra.mxu1 %v11612_v26  ;;  %v11637_v26 = vld [vmem:[#allocation53_spill] sm:$0xff] }
 0x48b   :  { %5452 = vmatpush1.bf16.msra.mxu0 %v11613_v21  ;;  %5412 = vmatprep.subr.bf16.mxu1 %v11614_v54  ;;  %v11638_v21 = vld [vmem:[#allocation51_spill] sm:$0xff]  ;;  %v11639_v54 = vld [vmem:[#allocation54_spill] sm:$0xff] }
 0x48c   :  { %5453 = vmatprep.subr.bf16.mxu0 %v11615_v23  ;;  %v11640_v23 = vld [vmem:[#allocation61_spill] sm:$0xff] }
 0x48e   :  { %5413 = vmatpush1.bf16.msra.mxu1 %v11616_v18  ;;  %v4344_v18 = vadd.f32 %v10478_v4, %v11640_v23  ;;  %v10673_v23 = vld [vmem:[#allocation8 + $0xdc0] ss:$16 sps:$4 sm:$0xff]  }
 0x48f   :  { %5454 = vmatpush1.bf16.msra.mxu0 %v11617_v48  ;;  %5414 = vmatprep.subr.bf16.mxu1 %v11618_v29  ;;  %v11641_v48 = vld [vmem:[#allocation37_spill] sm:$0xff] }
 0x490   :  { %5455 = vmatprep.subr.bf16.mxu0 %v11619_v62  ;;  %v4346_v62 = vadd.f32 %v10484_v59, %v10337_v17  ;;  %v11646_v17 = vld [vmem:[#allocation63_spill] sm:$0xff]  ;;  %v11648_v59 = vld [vmem:[#allocation42_spill] sm:$0xff] }
 0x492   :  { %5415 = vmatpush1.bf16.msra.mxu1 %v11620_v9 }
 0x493   :  { %5456 = vmatpush1.bf16.msra.mxu0 %v11621_v41  ;;  %5416 = vmatprep.subr.bf16.mxu1 %v11622_v13  ;;  %v11642_v41 = vld [vmem:[#allocation62_spill] sm:$0xff]  ;;  %v11643_v13 = vld [vmem:[#allocation55_spill] sm:$0xff] }
 0x494   :  { %5457 = vmatprep.subr.bf16.mxu0 %v11623_v0 }
 0x496   :  { %5417 = vmatpush1.bf16.msra.mxu1 %v11624_v50 }
 0x497   :  { %5458 = vmatpush1.bf16.msra.mxu0 %v11625_v27  ;;  %5418 = vmatprep.subr.bf16.mxu1 %v11626_v45  ;;  %v11644_v45 = vld [vmem:[#allocation39_spill] sm:$0xff] }
 0x498   :  { %5459 = vmatprep.subr.bf16.mxu0 %v11627_v14 }
 0x49a   :  { %5419 = vmatpush1.bf16.msra.mxu1 %v11628_v25  ;;  %v11645_v25 = vld [vmem:[#allocation59_spill] sm:$0xff] }
 0x49b   :  { %5460 = vmatpush1.bf16.msra.mxu0 %v11629_v38  ;;  %5420 = vmatprep.subr.bf16.mxu1 %v11630_v40  ;;  %v11650_v40 = vld [vmem:[#allocation49_spill] sm:$0xff] }
 0x49c   :  { %5461 = vmatprep.subr.bf16.mxu0 %v11631_v19  ;;  %v11652_v19 = vld [vmem:[#allocation57_spill] sm:$0xff] }
 0x49e   :  { %5421 = vmatpush2.bf16.msra.mxu1 %v11632_v35  ;;  %v11653_v35 = vld [vmem:[#allocation67_spill] sm:$0xff] }
 0x49f   :  { %5462 = vmatpush2.bf16.msra.mxu0 %v11633_v39  ;;  %5422 = vmatprep.subr.bf16.mxu1 %v11634_v20 }
 0x4a0   :  { %5463 = vmatprep.subr.bf16.mxu0 %v11635_v61  ;;  %v10609_v61 = vld [vmem:[#allocation8 + $0xcc0] ss:$16 sps:$4 sm:$0xff]  }
 0x4a2   :  { %5423 = vmatpush2.bf16.msra.mxu1 %v11636_v22 }
 0x4a3   :  { %5464 = vmatpush2.bf16.msra.mxu0 %v11637_v26  ;;  %5424 = vmatprep.subr.bf16.mxu1 %v11638_v21  ;;  %v10612_v26 = vld [vmem:[#allocation8 + $0xca4] ss:$16 sps:$4 sm:$0xff]  }
 0x4a4   :  { %5465 = vmatprep.subr.bf16.mxu0 %v11639_v54  ;;  %v11656_v54 = vld [vmem:[#allocation69_spill] sm:$0xff] }
 0x4a6   :  { %5425 = vmatpush2.bf16.msra.mxu1 %v11641_v48  ;;  %v4384_v29 = vpop.f32.mrf.mxu1  ;;  %v10681_v48 = vld [vmem:[#allocation8 + $0xda0] ss:$16 sps:$4 sm:$0xff]  }
 0x4a7   :  { %v4385_v9 = vadd.f32 %v4384_v29, %v4344_v18  ;;  %5466 = vmatpush2.bf16.msra.mxu0 %v11642_v41  ;;  %5426 = vmatprep.subr.bf16.mxu1 %v11643_v13  ;;  %v11658_v18 = vld [vmem:[#allocation71_spill] sm:$0xff]  ;;  %v10697_v13 = vld [vmem:[#allocation8 + $0xd60] ss:$16 sps:$4 sm:$0xff]  }
 0x4a8   :  { %v4386_v0 = vpop.f32.mrf.mxu1  ;;  %5467 = vmatprep.subr.bf16.mxu0 %v10340_v6  ;;  %v11647_v6 = vld [vmem:[#allocation66_spill] sm:$0xff]  ;;  %v10684_v29 = vld [vmem:[#allocation8 + $0xd84] ss:$16 sps:$4 sm:$0xff]  }
 0x4a9   :  { %v4387_v50 = vadd.f32 %v4386_v0, %v4346_v62  ;;  %v4393_v27 = vpack.c.bf16 %v4385_v9, %v4385_v9  ;;  %v11659_v62 = vld [vmem:[#allocation72_spill] sm:$0xff]  ;;  %v10692_v41 = vld [vmem:[#allocation8 + $0xd64] ss:$16 sps:$4 sm:$0xff]  }
 0x4aa   :  { %5427 = vmatpush2.bf16.msra.mxu1 %v11644_v45  ;;  %v4388_v14 = vpop.f32.mrf.mxu1  ;;  %v10689_v9 = vld [vmem:[#allocation8 + $0xd80] ss:$16 sps:$4 sm:$0xff]   ;;  %v10700_v0 = vld [vmem:[#allocation8 + $0xd44] ss:$16 sps:$4 sm:$0xff]   ;;  %v10732_v45 = vld [vmem:[#allocation8 + $0xcec] ss:$16 sps:$4 sm:$0xff]  }
 0x4ab   :  { %v4394_v4 = vpack.c.bf16 %v4387_v50, %v4387_v50  ;;  %5468 = vmatpush2.bf16.msra.mxu0 %v10347_v28  ;;  %5428 = vmatprep.subr.bf16.mxu1 %v11645_v25  ;;  %v11649_v28 = vld [vmem:[#allocation65_spill] sm:$0xff]  ;;  %v11661_v14 = vld [vmem:[#allocation16_spill] sm:$0xff] }
 0x4ac   :  { %v4389_v38 = vpop.f32.mrf.mxu1  ;;  %5469 = vmatprep.subr.bf16.mxu0 %v10354_v2  ;;  %v11651_v2 = vld [vmem:[#allocation50_spill] sm:$0xff]  ;;  %v10715_v50 = vld [vmem:[#allocation9 + $0x8] sm:$0xf] }
 0x4ad   :  { %8704 = vtanh.bf16 %v4394_v4  ;;  %v10736_v4 = vrot.slane %v10715_v50, %v11661_v14  ;;  %v10817_v14 = vld [vmem:[#allocation8 + $0xfe0] ss:$16 sps:$4 sm:$0xff]  }
 0x4ae   :  { %8706 = vtanh.bf16 %v4393_v27  ;;  %5429 = vmatpush2.bf16.msra.mxu1 %v11646_v17  ;;  %v11660_v27 = vld [vmem:[#allocation15_spill] sm:$0xff]  ;;  %11675 = vst [vmem:[#allocation48_spill] sm:$0xff] %v10817_v14 }
 0x4af   :  { %5470 = vmatpush2.bf16.msra.mxu0 %v10359_v30  ;;  %5430 = vmatprep.subr.bf16.mxu1 %v11647_v6  ;;  %v10588_v30 = vld [vmem:[#allocation8 + $0xce4] ss:$16 sps:$4 sm:$0xff]  }
 0x4b0   :  { %5471 = vmatprep.subr.bf16.mxu0 %v10362_v5 }
 0x4b2   :  { %5431 = vmatpush2.bf16.msra.mxu1 %v11648_v59  ;;  %v10754_v59 = vld [vmem:[#allocation8 + $0xec0] ss:$16 sps:$4 sm:$0xff]  }
 0x4b3   :  { %5472 = vmatpush2.bf16.msra.mxu0 %v10365_v33  ;;  %5432 = vmatprep.subr.bf16.mxu1 %v11649_v28  ;;  %v11654_v33 = vld [vmem:[#allocation58_spill] sm:$0xff] }
 0x4b4   :  { %5473 = vmatprep.subr.bf16.mxu0 %v10368_v55  ;;  %v10595_v55 = vld [vmem:[#allocation8 + $0xce0] ss:$16 sps:$4 sm:$0xff]  }
 0x4b6   :  { %5433 = vmatpush2.bf16.msra.mxu1 %v11650_v40 }
 0x4b7   :  { %5474 = vmatpush2.bf16.msra.mxu0 %v10371_v34  ;;  %5434 = vmatprep.subr.bf16.mxu1 %v11651_v2  ;;  %v10759_v2 = vld [vmem:[#allocation8 + $0xea4] ss:$16 sps:$4 sm:$0xff]  }
 0x4b8   :  { %5475 = vmatprep.subr.bf16.mxu0 %v10374_v57  ;;  %v10601_v57 = vld [vmem:[#allocation8 + $0xcc4] ss:$16 sps:$4 sm:$0xff]  }
 0x4ba   :  { %5435 = vmatpush2.bf16.msra.mxu1 %v11652_v19 }
 0x4bb   :  { %v8705_v5 = vpop.eup %8704  ;;  %5476 = vmatpush2.bf16.msra.mxu0 %v11653_v35  ;;  %5486 = vmatprep.subr.bf16.mxu1 %v11654_v33 }
 0x4bc   :  { %v10593_v39 = vpop.eup %8706  ;;  %5436 = vmatprep.mubr.bf16.mxu1 %v8705_v5  ;;  %6327 = vmatprep.subr.bf16.mxu0 %v10588_v30 }
 0x4bd   :  { %5437 = vmatmul.mubr.bf16.vlgmr.msra.gmra.mxu1 %v10593_v39  ;;  %v10599_v34 = vpop.f32.mrf.mxu0 }
 0x4be   :  { %5478 = vmatmul.mubr.bf16.vlgmr.msra.gmra.mxu0 %v10520_v49  ;;  %5487 = vmatpush1.bf16.msra.mxu1 %v10381_v43  ;;  %v10617_v43 = vld [vmem:[#allocation8 + $0xca0] ss:$16 sps:$4 sm:$0xff]  }
 0x4bf   :  { %5518 = vmatprep.mubr.bf16.mxu1 %v8705_v5  ;;  %v10605_v20 = vpop.f32.mrf.mxu0  ;;  %5488 = vmatprep.subr.bf16.mxu1 %v10384_v7  ;;  %v10620_v7 = vld [vmem:[#allocation8 + $0xc84] ss:$16 sps:$4 sm:$0xff]   ;;  %v10625_v49 = vld [vmem:[#allocation8 + $0xc80] ss:$16 sps:$4 sm:$0xff]  }
 0x4c0   :  { %6328 = vmatpush1.bf16.msra.mxu0 %v10595_v55 }
 0x4c1   :  { %v5229_v22 = vpop.f32.mrf.mxu0  ;;  %6329 = vmatprep.subr.bf16.mxu0 %v10601_v57 }
 0x4c2   :  { %5489 = vmatpush1.bf16.msra.mxu1 %v10391_v63  ;;  %v10628_v63 = vld [vmem:[#allocation8 + $0xc64] ss:$16 sps:$4 sm:$0xff]  }
 0x4c3   :  { %v5230_v21 = vpop.f32.mrf.mxu0  ;;  %5490 = vmatprep.subr.bf16.mxu1 %v10395_v42  ;;  %v10633_v42 = vld [vmem:[#allocation8 + $0xc60] ss:$16 sps:$4 sm:$0xff]  }
 0x4c4   :  { %6330 = vmatpush1.bf16.msra.mxu0 %v10609_v61  ;;  %v10765_v21 = vld [vmem:[#allocation8 + $0xe84] ss:$16 sps:$4 sm:$0xff]  }
 0x4c5   :  { %6331 = vmatprep.subr.bf16.mxu0 %v10612_v26  ;;  %11662 = vst [vmem:[#allocation73_spill] sm:$0xff] %v10765_v21 }
 0x4c6   :  { %5491 = vmatpush1.bf16.msra.mxu1 %v10399_v32  ;;  %v10636_v32 = vld [vmem:[#allocation8 + $0xc44] ss:$16 sps:$4 sm:$0xff]  }
 0x4c7   :  { %5492 = vmatprep.subr.bf16.mxu1 %v10403_v31  ;;  %v10641_v31 = vld [vmem:[#allocation8 + $0xc40] ss:$16 sps:$4 sm:$0xff]  }
 0x4c8   :  { %6332 = vmatpush1.bf16.msra.mxu0 %v10617_v43 }
 0x4c9   :  { %6333 = vmatprep.subr.bf16.mxu0 %v10620_v7 }
 0x4ca   :  { %5493 = vmatpush1.bf16.msra.mxu1 %v10407_v51  ;;  %v10644_v51 = vld [vmem:[#allocation8 + $0xc24] ss:$16 sps:$4 sm:$0xff]  }
 0x4cb   :  { %5494 = vmatprep.subr.bf16.mxu1 %v10411_v15  ;;  %v10649_v15 = vld [vmem:[#allocation8 + $0xc20] ss:$16 sps:$4 sm:$0xff]  }
 0x4cc   :  { %6334 = vmatpush1.bf16.msra.mxu0 %v10625_v49 }
 0x4cd   :  { %6335 = vmatprep.subr.bf16.mxu0 %v10628_v63 }
 0x4ce   :  { %5495 = vmatpush1.bf16.msra.mxu1 %v10415_v44  ;;  %v10652_v44 = vld [vmem:[#allocation8 + $0xc04] ss:$16 sps:$4 sm:$0xff]  }
 0x4cf   :  { %5496 = vmatprep.subr.bf16.mxu1 %v10419_v58  ;;  %v10657_v58 = vld [vmem:[#allocation8 + $0xc00] ss:$16 sps:$4 sm:$0xff]  }
 0x4d0   :  { %6336 = vmatpush1.bf16.msra.mxu0 %v10633_v42 }
 0x4d1   :  { %6337 = vmatprep.subr.bf16.mxu0 %v10636_v32 }
 0x4d2   :  { %5497 = vmatpush1.bf16.msra.mxu1 %v10423_v46  ;;  %v10660_v46 = vld [vmem:[#allocation8 + $0xde4] ss:$16 sps:$4 sm:$0xff]  }
 0x4d3   :  { %5498 = vmatprep.subr.bf16.mxu1 %v10427_v3  ;;  %v10665_v3 = vld [vmem:[#allocation8 + $0xde0] ss:$16 sps:$4 sm:$0xff]  }
 0x4d4   :  { %6338 = vmatpush1.bf16.msra.mxu0 %v10641_v31 }
 0x4d5   :  { %6339 = vmatprep.subr.bf16.mxu0 %v10644_v51 }
 0x4d6   :  { %5499 = vmatpush1.bf16.msra.mxu1 %v10431_v16  ;;  %v10668_v16 = vld [vmem:[#allocation8 + $0xdc4] ss:$16 sps:$4 sm:$0xff]  }
 0x4d7   :  { %5500 = vmatprep.subr.bf16.mxu1 %v10435_v47  ;;  %v11655_v47 = vld [vmem:[#allocation68_spill] sm:$0xff] }
 0x4d8   :  { %6340 = vmatpush1.bf16.msra.mxu0 %v10649_v15 }
 0x4d9   :  { %6341 = vmatprep.subr.bf16.mxu0 %v10652_v44 }
 0x4da   :  { %5501 = vmatpush1.bf16.msra.mxu1 %v10439_v56  ;;  %v10676_v56 = vld [vmem:[#allocation8 + $0xda4] ss:$16 sps:$4 sm:$0xff]  }
 0x4db   :  { %5502 = vmatprep.subr.bf16.mxu1 %v10443_v37  ;;  %v11657_v37 = vld [vmem:[#allocation70_spill] sm:$0xff] }
 0x4dc   :  { %6342 = vmatpush1.bf16.msra.mxu0 %v10657_v58 }
 0x4dd   :  { %6343 = vmatprep.subr.bf16.mxu0 %v10660_v46 }
 0x4de   :  { %5503 = vmatpush2.bf16.msra.mxu1 %v11655_v47  ;;  %v10768_v47 = vld [vmem:[#allocation8 + $0xe80] ss:$16 sps:$4 sm:$0xff]  }
 0x4df   :  { %5504 = vmatprep.subr.bf16.mxu1 %v11656_v54  ;;  %11663 = vst [vmem:[#allocation74_spill] sm:$0xff] %v10768_v47  ;;  %v10771_v54 = vld [vmem:[#allocation8 + $0xe64] ss:$16 sps:$4 sm:$0xff]  }
 0x4e0   :  { %6344 = vmatpush2.bf16.msra.mxu0 %v10665_v3  ;;  %11664 = vst [vmem:[#allocation75_spill] sm:$0xff] %v10771_v54 }
 0x4e1   :  { %6345 = vmatprep.subr.bf16.mxu0 %v10668_v16 }
 0x4e2   :  { %5505 = vmatpush2.bf16.msra.mxu1 %v11657_v37  ;;  %v10774_v37 = vld [vmem:[#allocation8 + $0xe60] ss:$16 sps:$4 sm:$0xff]  }
 0x4e3   :  { %5506 = vmatprep.subr.bf16.mxu1 %v11658_v18  ;;  %11665 = vst [vmem:[#allocation76_spill] sm:$0xff] %v10774_v37  ;;  %v10777_v18 = vld [vmem:[#allocation8 + $0xe44] ss:$16 sps:$4 sm:$0xff]  }
 0x4e4   :  { %6346 = vmatpush2.bf16.msra.mxu0 %v10673_v23  ;;  %11666 = vst [vmem:[#allocation20_spill] sm:$0xff] %v10777_v18 }
 0x4e5   :  { %6347 = vmatprep.subr.bf16.mxu0 %v10676_v56 }
 0x4e6   :  { %5507 = vmatpush2.bf16.msra.mxu1 %v11659_v62  ;;  %v10780_v62 = vld [vmem:[#allocation8 + $0xe40] ss:$16 sps:$4 sm:$0xff]  }
 0x4e7   :  { %5508 = vmatprep.subr.bf16.mxu1 %v10467_v36  ;;  %v10705_v36 = vld [vmem:[#allocation8 + $0xd40] ss:$16 sps:$4 sm:$0xff]   ;;  %11667 = vst [vmem:[#allocation21_spill] sm:$0xff] %v10780_v62 }
 0x4e8   :  { %6348 = vmatpush2.bf16.msra.mxu0 %v10681_v48 }
 0x4e9   :  { %6349 = vmatprep.subr.bf16.mxu0 %v10684_v29 }
 0x4ea   :  { %5509 = vmatpush2.bf16.msra.mxu1 %v10473_v12  ;;  %v10708_v12 = vld [vmem:[#allocation8 + $0xd24] ss:$16 sps:$4 sm:$0xff]  }
 0x4eb   :  { %5510 = vmatprep.subr.bf16.mxu1 %v10481_v11  ;;  %v10713_v11 = vld [vmem:[#allocation8 + $0xd20] ss:$16 sps:$4 sm:$0xff]  }
 0x4ec   :  { %6350 = vmatpush2.bf16.msra.mxu0 %v10689_v9 }
 0x4ed   :  { %6351 = vmatprep.subr.bf16.mxu0 %v10692_v41 }
 0x4ee   :  { %5511 = vmatpush2.bf16.msra.mxu1 %v10487_v60  ;;  %v10718_v60 = vld [vmem:[#allocation8 + $0xd04] ss:$16 sps:$4 sm:$0xff]  }
 0x4ef   :  { %5512 = vmatprep.subr.bf16.mxu1 %v10491_v52  ;;  %v10722_v52 = vld [vmem:[#allocation8 + $0xee4] ss:$16 sps:$4 sm:$0xff]  }
 0x4f0   :  { %6352 = vmatpush2.bf16.msra.mxu0 %v10697_v13 }
 0x4f1   :  { %6353 = vmatprep.subr.bf16.mxu0 %v10700_v0 }
 0x4f2   :  { %5513 = vmatpush2.bf16.msra.mxu1 %v10495_v53  ;;  %v10726_v53 = vrot.slane %v10715_v50, %v11660_v27  ;;  %v10820_v27 = vld [vmem:[#allocation8 + $0xfc4] ss:$16 sps:$4 sm:$0xff]  }
 0x4f3   :  { %5514 = vmatprep.subr.bf16.mxu1 %v10499_v8  ;;  %v10729_v8 = vld [vmem:[#allocation8 + $0xd00] ss:$16 sps:$4 sm:$0xff]   ;;  %11676 = vst [vmem:[#allocation26_spill] sm:$0xff] %v10820_v27 }
 0x4f4   :  { %6354 = vmatpush2.bf16.msra.mxu0 %v10705_v36  ;;  %v5226_v25 = vadd.f32 %v10599_v34, %v10726_v53  ;;  %v10762_v34 = vld [vmem:[#allocation8 + $0xea0] ss:$16 sps:$4 sm:$0xff]  }
 0x4f5   :  { %6355 = vmatprep.subr.bf16.mxu0 %v10708_v12 }
 0x4f6   :  { %5515 = vmatpush2.bf16.msra.mxu1 %v10503_v1  ;;  %v10739_v1 = vld [vmem:[#allocation8 + $0xee0] ss:$16 sps:$4 sm:$0xff]  }
 0x4f7   :  { %5516 = vmatprep.subr.bf16.mxu1 %v10507_v24  ;;  %v10742_v24 = vld [vmem:[#allocation8 + $0xec4] ss:$16 sps:$4 sm:$0xff]  }
 0x4f8   :  { %6356 = vmatpush2.bf16.msra.mxu0 %v10713_v11 }
 0x4f9   :  { %6357 = vmatprep.subr.bf16.mxu0 %v10718_v60 }
 0x4fa   :  { %5517 = vmatpush2.bf16.msra.mxu1 %v10511_v10  ;;  %v5228_v10 = vadd.f32 %v10605_v20, %v10736_v4 }
 0x4fb   :  { %6368 = vmatprep.subr.bf16.mxu1 %v10722_v52 }
 0x4fc   :  { %6358 = vmatpush2.bf16.msra.mxu0 %v10729_v8 }
 0x4fd   :  { %5519 = vmatmul.mubr.bf16.vlgmr.msra.gmra.mxu1 %v10593_v39  ;;  %v5266_v38 = vpop.f32.mrf.mxu1  ;;  %v10748_v17 = vpop.f32.mrf.mxu0  ;;  %6409 = vmatprep.subr.bf16.mxu0 %v10732_v45 }
 0x4fe   :  { %v5267_v6 = vadd.f32 %v5266_v38, %v5226_v25  ;;  %6369 = vmatpush1.bf16.msra.mxu1 %v10739_v1  ;;  %v10783_v25 = vld [vmem:[#allocation8 + $0xe24] ss:$16 sps:$4 sm:$0xff]   ;;  %v10785_v38 = vld [vmem:[#allocation8 + $0xce8] ss:$16 sps:$4 sm:$0xff]  }
 0x4ff   :  { %v5268_v28 = vpop.f32.mrf.mxu1  ;;  %v10756_v40 = vpop.f32.mrf.mxu0  ;;  %6370 = vmatprep.subr.bf16.mxu1 %v10742_v24  ;;  %11668 = vst [vmem:[#allocation22_spill] sm:$0xff] %v10783_v25 }
 0x500   :  { %v5269_v19 = vadd.f32 %v5268_v28, %v5228_v10  ;;  %v5355_v5 = vpack.c.bf16 %v5267_v6, %v5267_v6  ;;  %v10787_v6 = vld [vmem:[#allocation8 + $0xccc] ss:$16 sps:$4 sm:$0xff]   ;;  %v10790_v28 = vld [vmem:[#allocation8 + $0xe20] ss:$16 sps:$4 sm:$0xff]  }
 0x501   :  { %v5270_v35 = vpop.f32.mrf.mxu1  ;;  %v5311_v33 = vpop.f32.mrf.mxu0  ;;  %11669 = vst [vmem:[#allocation17_spill] sm:$0xff] %v10790_v28 }
 0x502   :  { %v5356_v39 = vpack.c.bf16 %v5269_v19, %v5269_v19  ;;  %6371 = vmatpush1.bf16.msra.mxu1 %v10754_v59  ;;  %v10799_v35 = vld [vmem:[#allocation8 + $0xcc8] ss:$16 sps:$4 sm:$0xff]   ;;  %v10802_v33 = vld [vmem:[#allocation8 + $0xcac] ss:$16 sps:$4 sm:$0xff]  }
 0x503   :  { %v5271_v20 = vpop.f32.mrf.mxu1  ;;  %v5312_v22 = vpop.f32.mrf.mxu0  ;;  %6372 = vmatprep.subr.bf16.mxu1 %v10759_v2 }
 0x504   :  { %8708 = vtanh.bf16 %v5356_v39  ;;  %v10805_v39 = vld [vmem:[#allocation8 + $0xe00] ss:$16 sps:$4 sm:$0xff]   ;;  %v10808_v20 = vld [vmem:[#allocation8 + $0xfe4] ss:$16 sps:$4 sm:$0xff]   ;;  %v10811_v22 = vld [vmem:[#allocation8 + $0xca8] ss:$16 sps:$4 sm:$0xff]  }
 0x505   :  { %8710 = vtanh.bf16 %v5355_v5  ;;  %v10795_v5 = vld [vmem:[#allocation8 + $0xe04] ss:$16 sps:$4 sm:$0xff]   ;;  %11671 = vst [vmem:[#allocation44_spill] sm:$0xff] %v10805_v39  ;;  %11672 = vst [vmem:[#allocation24_spill] sm:$0xff] %v10808_v20 }
 0x506   :  { %6373 = vmatpush1.bf16.msra.mxu1 %v10762_v34  ;;  %11670 = vst [vmem:[#allocation23_spill] sm:$0xff] %v10795_v5  ;;  %11673 = vst [vmem:[#allocation19_spill] sm:$0xff] %v10811_v22 }
 0x507   :  { %6374 = vmatprep.subr.bf16.mxu1 %v10765_v21 }
 0x50a   :  { %6375 = vmatpush1.bf16.msra.mxu1 %v10768_v47 }
 0x50b   :  { %6376 = vmatprep.subr.bf16.mxu1 %v10771_v54  ;;  %v11705_v54 = vld [vmem:[#allocation28_spill] sm:$0xff] }
 0x50e   :  { %6377 = vmatpush1.bf16.msra.mxu1 %v10774_v37  ;;  %v10850_v37 = vld [vmem:[#allocation8 + $0xc2c] ss:$16 sps:$4 sm:$0xff]  }
 0x50f   :  { %6378 = vmatprep.subr.bf16.mxu1 %v10777_v18  ;;  %v10841_v18 = vld [vmem:[#allocation8 + $0xfa0] ss:$16 sps:$4 sm:$0xff]   ;;  %11686 = vst [vmem:[#allocation33_spill] sm:$0xff] %v10850_v37 }
 0x510   :  { %11683 = vst [vmem:[#allocation56_spill] sm:$0xff] %v10841_v18 }
 0x512   :  { %v8709_v10 = vpop.eup %8708  ;;  %6379 = vmatpush1.bf16.msra.mxu1 %v10780_v62  ;;  %v10838_v62 = vld [vmem:[#allocation8 + $0xc4c] ss:$16 sps:$4 sm:$0xff]  }
 0x513   :  { %v10792_v19 = vpop.eup %8710  ;;  %6359 = vmatprep.mubr.bf16.mxu0 %v8709_v10  ;;  %6380 = vmatprep.subr.bf16.mxu1 %v10783_v25  ;;  %v10829_v25 = vld [vmem:[#allocation8 + $0xfc0] ss:$16 sps:$4 sm:$0xff]   ;;  %11682 = vst [vmem:[#allocation31_spill] sm:$0xff] %v10838_v62 }
 0x514   :  { %6360 = vmatmul.mubr.bf16.vlgmr.msra.gmra.mxu0 %v10792_v19  ;;  %11679 = vst [vmem:[#allocation52_spill] sm:$0xff] %v10829_v25 }
 0x515   :  { %6410 = vmatpush1.bf16.msra.mxu0 %v10785_v38  ;;  %6441 = vmatprep.mubr.bf16.mxu0 %v8709_v10  ;;  %v10814_v10 = vld [vmem:[#allocation8 + $0xc8c] ss:$16 sps:$4 sm:$0xff]  }
 0x516   :  { %6411 = vmatprep.subr.bf16.mxu0 %v10787_v6  ;;  %6381 = vmatpush1.bf16.msra.mxu1 %v10790_v28  ;;  %11674 = vst [vmem:[#allocation25_spill] sm:$0xff] %v10814_v10  ;;  %v10826_v28 = vld [vmem:[#allocation8 + $0xc6c] ss:$16 sps:$4 sm:$0xff]  }
 0x517   :  { %6382 = vmatprep.subr.bf16.mxu1 %v10795_v5  ;;  %v10823_v5 = vld [vmem:[#allocation8 + $0xc88] ss:$16 sps:$4 sm:$0xff]   ;;  %11678 = vst [vmem:[#allocation27_spill] sm:$0xff] %v10826_v28 }
 0x518   :  { %11677 = vst [vmem:[#allocation36_spill] sm:$0xff] %v10823_v5 }
 0x519   :  { %6412 = vmatpush1.bf16.msra.mxu0 %v10799_v35 }
 0x51a   :  { %6413 = vmatprep.subr.bf16.mxu0 %v10802_v33  ;;  %6383 = vmatpush1.bf16.msra.mxu1 %v10805_v39  ;;  %v10832_v39 = vld [vmem:[#allocation8 + $0xfa4] ss:$16 sps:$4 sm:$0xff]  }
 0x51b   :  { %6384 = vmatprep.subr.bf16.mxu1 %v10808_v20  ;;  %11680 = vst [vmem:[#allocation30_spill] sm:$0xff] %v10832_v39  ;;  %v10835_v20 = vld [vmem:[#allocation8 + $0xc68] ss:$16 sps:$4 sm:$0xff]  }
 0x51c   :  { %11681 = vst [vmem:[#allocation38_spill] sm:$0xff] %v10835_v20 }
 0x51d   :  { %6414 = vmatpush1.bf16.msra.mxu0 %v10811_v22 }
 0x51e   :  { %6415 = vmatprep.subr.bf16.mxu0 %v10814_v10  ;;  %6385 = vmatpush2.bf16.msra.mxu1 %v10817_v14  ;;  %v10844_v14 = vld [vmem:[#allocation8 + $0xf84] ss:$16 sps:$4 sm:$0xff]  }
 0x51f   :  { %6386 = vmatprep.subr.bf16.mxu1 %v10820_v27  ;;  %11684 = vst [vmem:[#allocation32_spill] sm:$0xff] %v10844_v14  ;;  %v10847_v27 = vld [vmem:[#allocation8 + $0xc48] ss:$16 sps:$4 sm:$0xff]  }
 0x520   :  { %11685 = vst [vmem:[#allocation40_spill] sm:$0xff] %v10847_v27 }
 0x521   :  { %6416 = vmatpush1.bf16.msra.mxu0 %v10823_v5  ;;  %v11708_v5 = vld [vmem:[#allocation29_spill] sm:$0xff] }
 0x522   :  { %6417 = vmatprep.subr.bf16.mxu0 %v10826_v28  ;;  %6387 = vmatpush2.bf16.msra.mxu1 %v10829_v25  ;;  %v10853_v28 = vld [vmem:[#allocation8 + $0xf80] ss:$16 sps:$4 sm:$0xff]   ;;  %v10856_v25 = vld [vmem:[#allocation8 + $0xf64] ss:$16 sps:$4 sm:$0xff]  }
 0x523   :  { %6388 = vmatprep.subr.bf16.mxu1 %v10832_v39  ;;  %11687 = vst [vmem:[#allocation60_spill] sm:$0xff] %v10853_v28  ;;  %11688 = vst [vmem:[#allocation34_spill] sm:$0xff] %v10856_v25  ;;  %v10859_v39 = vld [vmem:[#allocation8 + $0xc28] ss:$16 sps:$4 sm:$0xff]  }
 0x524   :  { %11689 = vst [vmem:[#allocation41_spill] sm:$0xff] %v10859_v39 }
 0x525   :  { %6418 = vmatpush1.bf16.msra.mxu0 %v10835_v20  ;;  %v10862_v20 = vld [vmem:[#allocation8 + $0xc0c] ss:$16 sps:$4 sm:$0xff]  }
 0x526   :  { %6419 = vmatprep.subr.bf16.mxu0 %v10838_v62  ;;  %6389 = vmatpush2.bf16.msra.mxu1 %v10841_v18  ;;  %11690 = vst [vmem:[#allocation43_spill] sm:$0xff] %v10862_v20  ;;  %v10865_v62 = vld [vmem:[#allocation8 + $0xf60] ss:$16 sps:$4 sm:$0xff]   ;;  %v10868_v18 = vld [vmem:[#allocation8 + $0xf44] ss:$16 sps:$4 sm:$0xff]  }
 0x527   :  { %6390 = vmatprep.subr.bf16.mxu1 %v10844_v14  ;;  %11691 = vst [vmem:[#allocation64_spill] sm:$0xff] %v10865_v62  ;;  %11692 = vst [vmem:[#allocation18_spill] sm:$0xff] %v10868_v18  ;;  %v10871_v14 = vld [vmem:[#allocation8 + $0xc08] ss:$16 sps:$4 sm:$0xff]  }
 0x528   :  { %11693 = vst [vmem:[#allocation45_spill] sm:$0xff] %v10871_v14 }
 0x529   :  { %6420 = vmatpush1.bf16.msra.mxu0 %v10847_v27  ;;  %v10874_v27 = vld [vmem:[#allocation8 + $0xdec] ss:$16 sps:$4 sm:$0xff]  }
 0x52a   :  { %6421 = vmatprep.subr.bf16.mxu0 %v10850_v37  ;;  %6391 = vmatpush2.bf16.msra.mxu1 %v10853_v28  ;;  %11694 = vst [vmem:[#allocation47_spill] sm:$0xff] %v10874_v27  ;;  %v10877_v37 = vld [vmem:[#allocation8 + $0xf40] ss:$16 sps:$4 sm:$0xff]   ;;  %v10880_v28 = vld [vmem:[#allocation8 + $0xf24] ss:$16 sps:$4 sm:$0xff]  }
 0x52b   :  { %6392 = vmatprep.subr.bf16.mxu1 %v10856_v25  ;;  %11695 = vst [vmem:[#allocation46_spill] sm:$0xff] %v10877_v37  ;;  %11696 = vst [vmem:[#allocation35_spill] sm:$0xff] %v10880_v28  ;;  %v10883_v25 = vld [vmem:[#allocation8 + $0xde8] ss:$16 sps:$4 sm:$0xff]  }
 0x52c   :  { %11697 = vst [vmem:[#allocation53_spill] sm:$0xff] %v10883_v25 }
 0x52d   :  { %6422 = vmatpush1.bf16.msra.mxu0 %v10859_v39  ;;  %v10886_v39 = vld [vmem:[#allocation8 + $0xdcc] ss:$16 sps:$4 sm:$0xff]  }
 0x52e   :  { %6423 = vmatprep.subr.bf16.mxu0 %v10862_v20  ;;  %6393 = vmatpush2.bf16.msra.mxu1 %v10865_v62  ;;  %11698 = vst [vmem:[#allocation51_spill] sm:$0xff] %v10886_v39  ;;  %v10889_v20 = vld [vmem:[#allocation8 + $0xf20] ss:$16 sps:$4 sm:$0xff]   ;;  %v10892_v62 = vld [vmem:[#allocation8 + $0xf04] ss:$16 sps:$4 sm:$0xff]  }
 0x52f   :  { %6394 = vmatprep.subr.bf16.mxu1 %v10868_v18  ;;  %11699 = vst [vmem:[#allocation54_spill] sm:$0xff] %v10889_v20  ;;  %11700 = vst [vmem:[#allocation61_spill] sm:$0xff] %v10892_v62  ;;  %v10895_v18 = vld [vmem:[#allocation8 + $0xdc8] ss:$16 sps:$4 sm:$0xff]  }
 0x530   :  { %11701 = vst [vmem:[#allocation37_spill] sm:$0xff] %v10895_v18 }
 0x531   :  { %6424 = vmatpush1.bf16.msra.mxu0 %v10871_v14  ;;  %v10898_v14 = vld [vmem:[#allocation8 + $0xdac] ss:$16 sps:$4 sm:$0xff]  }
 0x532   :  { %6425 = vmatprep.subr.bf16.mxu0 %v10874_v27  ;;  %6395 = vmatpush2.bf16.msra.mxu1 %v10877_v37  ;;  %11702 = vst [vmem:[#allocation62_spill] sm:$0xff] %v10898_v14  ;;  %v10901_v27 = vld [vmem:[#allocation8 + $0xf00] ss:$16 sps:$4 sm:$0xff]   ;;  %v10904_v37 = vld [vmem:[#allocation8 + $0xeec] ss:$16 sps:$4 sm:$0xff]  }
 0x533   :  { %6396 = vmatprep.subr.bf16.mxu1 %v10880_v28  ;;  %11703 = vst [vmem:[#allocation55_spill] sm:$0xff] %v10901_v27  ;;  %11704 = vst [vmem:[#allocation39_spill] sm:$0xff] %v10904_v37  ;;  %v10908_v28 = vrot.slane %v10715_v50, %v11705_v54 }
 0x535   :  { %6426 = vmatpush2.bf16.msra.mxu0 %v10883_v25  ;;  %11706 = vst [vmem:[#allocation59_spill] sm:$0xff] %v10908_v28  ;;  %v10911_v25 = vld [vmem:[#allocation8 + $0xda8] ss:$16 sps:$4 sm:$0xff]   ;;  %v5308_v54 = vadd.f32 %v10748_v17, %v10908_v28 }
 0x536   :  { %6427 = vmatprep.subr.bf16.mxu0 %v10886_v39  ;;  %6397 = vmatpush2.bf16.msra.mxu1 %v10889_v20  ;;  %11707 = vst [vmem:[#allocation63_spill] sm:$0xff] %v10911_v25  ;;  %v10915_v39 = vrot.slane %v10715_v50, %v11708_v5  ;;  %v10918_v20 = vld [vmem:[#allocation8 + $0xd8c] ss:$16 sps:$4 sm:$0xff]  }
 0x537   :  { %6398 = vmatprep.subr.bf16.mxu1 %v10892_v62 }
 0x538   :  { %v5310_v50 = vadd.f32 %v10756_v40, %v10915_v39  ;;  %v10940_v40 = vld [vmem:[#allocation8 + $0xd4c] ss:$16 sps:$4 sm:$0xff]  }
 0x539   :  { %6428 = vmatpush2.bf16.msra.mxu0 %v10895_v18  ;;  %v10925_v18 = vld [vmem:[#allocation8 + $0xd88] ss:$16 sps:$4 sm:$0xff]  }
 0x53a   :  { %6429 = vmatprep.subr.bf16.mxu0 %v10898_v14  ;;  %6399 = vmatpush2.bf16.msra.mxu1 %v10901_v27  ;;  %v10932_v14 = vld [vmem:[#allocation8 + $0xd6c] ss:$16 sps:$4 sm:$0xff]  }
 0x53b   :  { %6450 = vmatprep.subr.bf16.mxu1 %v10904_v37 }
 0x53d   :  { %v5348_v62 = vpop.f32.mrf.mxu1  ;;  %6430 = vmatpush2.bf16.msra.mxu0 %v10911_v25  ;;  %v10937_v25 = vld [vmem:[#allocation8 + $0xd68] ss:$16 sps:$4 sm:$0xff]  }
 0x53e   :  { %v5349_v5 = vadd.f32 %v5348_v62, %v5308_v54  ;;  %v10929_v47 = vpop.f32.mrf.mxu0  ;;  %6431 = vmatprep.subr.bf16.mxu0 %v10918_v20 }
 0x53f   :  { %v5350_v27 = vpop.f32.mrf.mxu1 }
 0x540   :  { %v5351_v37 = vadd.f32 %v5350_v27, %v5310_v50  ;;  %v10934_v10 = vpop.f32.mrf.mxu0  ;;  %v5357_v17 = vpack.c.bf16 %v5349_v5, %v5349_v5  ;;  %v10943_v27 = vld [vmem:[#allocation8 + $0xd48] ss:$16 sps:$4 sm:$0xff]   ;;  %v10952_v5 = vld [vmem:[#allocation8 + $0xd0c] ss:$16 sps:$4 sm:$0xff]  }
 0x541   :  { %v5352_v28 = vpop.f32.mrf.mxu1  ;;  %6432 = vmatpush2.bf16.msra.mxu0 %v10925_v18 }
 0x542   :  { %v5358_v21 = vpack.c.bf16 %v5351_v37, %v5351_v37  ;;  %v5401_v22 = vpop.f32.mrf.mxu0  ;;  %6433 = vmatprep.subr.bf16.mxu0 %v10932_v14  ;;  %v10946_v28 = vld [vmem:[#allocation8 + $0xd2c] ss:$16 sps:$4 sm:$0xff]   ;;  %v10949_v37 = vld [vmem:[#allocation8 + $0xd28] ss:$16 sps:$4 sm:$0xff]  }
 0x543   :  { %v5353_v54 = vpop.f32.mrf.mxu1  ;;  %v10959_v22 = vld [vmem:[#allocation8 + $0xee8] ss:$16 sps:$4 sm:$0xff]  }
 0x544   :  { %8712 = vtanh.bf16 %v5358_v21  ;;  %v5402_v62 = vpop.f32.mrf.mxu0  ;;  %v10955_v21 = vld [vmem:[#allocation8 + $0xd08] ss:$16 sps:$4 sm:$0xff]  }
 0x545   :  { %8714 = vtanh.bf16 %v5357_v17  ;;  %6434 = vmatpush2.bf16.msra.mxu0 %v10937_v25  ;;  %11709 = vst [vmem:[#allocation66_spill] sm:$0xff] %v10955_v21  ;;  %v10962_v17 = vld [vmem:[#allocation8 + $0xecc] ss:$16 sps:$4 sm:$0xff]   ;;  %v10969_v62 = vld [vmem:[#allocation8 + $0xec8] ss:$16 sps:$4 sm:$0xff]  }
 0x546   :  { %6435 = vmatprep.subr.bf16.mxu0 %v10940_v40 }
 0x549   :  { %6436 = vmatpush2.bf16.msra.mxu0 %v10943_v27 }
 0x54a   :  { %6437 = vmatprep.subr.bf16.mxu0 %v10946_v28 }
 0x54d   :  { %6438 = vmatpush2.bf16.msra.mxu0 %v10949_v37 }
 0x54e   :  { %6439 = vmatprep.subr.bf16.mxu0 %v10952_v5 }
 0x551   :  { %6440 = vmatpush2.bf16.msra.mxu0 %v10955_v21  ;;  %v10973_v21 = vld [vmem:[#allocation8 + $0xeac] ss:$16 sps:$4 sm:$0xff]  }
 0x552   :  { %v8713_v50 = vpop.eup %8712  ;;  %6499 = vmatprep.subr.bf16.mxu0 %v10588_v30  ;;  %v10977_v30 = vld [vmem:[#allocation8 + $0xea8] ss:$16 sps:$4 sm:$0xff]  }
 0x553   :  { %v10964_v54 = vpop.eup %8714  ;;  %6400 = vmatprep.mubr.bf16.mxu1 %v8713_v50 }
 0x554   :  { %6401 = vmatmul.mubr.bf16.vlgmr.msra.gmra.mxu1 %v10964_v54  ;;  %6442 = vmatmul.mubr.bf16.vlgmr.msra.gmra.mxu0 %v10792_v19  ;;  %v10981_v19 = vld [vmem:[#allocation8 + $0xe8c] ss:$16 sps:$4 sm:$0xff]  }
 0x555   :  { %6451 = vmatpush1.bf16.msra.mxu1 %v10959_v22  ;;  %6482 = vmatprep.mubr.bf16.mxu1 %v8713_v50 }
 0x556   :  { %6500 = vmatpush1.bf16.msra.mxu0 %v10595_v55  ;;  %6452 = vmatprep.subr.bf16.mxu1 %v10962_v17  ;;  %v10985_v55 = vld [vmem:[#allocation8 + $0xe88] ss:$16 sps:$4 sm:$0xff]  }
 0x557   :  { %6501 = vmatprep.subr.bf16.mxu0 %v10601_v57  ;;  %v10989_v57 = vld [vmem:[#allocation8 + $0xe6c] ss:$16 sps:$4 sm:$0xff]  }
 0x559   :  { %6453 = vmatpush1.bf16.msra.mxu1 %v10969_v62 }
 0x55a   :  { %6502 = vmatpush1.bf16.msra.mxu0 %v10609_v61  ;;  %6454 = vmatprep.subr.bf16.mxu1 %v10973_v21  ;;  %v10993_v61 = vld [vmem:[#allocation8 + $0xe68] ss:$16 sps:$4 sm:$0xff]  }
 0x55b   :  { %6503 = vmatprep.subr.bf16.mxu0 %v10612_v26  ;;  %v10997_v26 = vld [vmem:[#allocation8 + $0xe4c] ss:$16 sps:$4 sm:$0xff]  }
 0x55d   :  { %6455 = vmatpush1.bf16.msra.mxu1 %v10977_v30 }
 0x55e   :  { %6504 = vmatpush1.bf16.msra.mxu0 %v10617_v43  ;;  %6456 = vmatprep.subr.bf16.mxu1 %v10981_v19  ;;  %v11001_v43 = vld [vmem:[#allocation8 + $0xe48] ss:$16 sps:$4 sm:$0xff]  }
 0x55f   :  { %6505 = vmatprep.subr.bf16.mxu0 %v10620_v7  ;;  %v11005_v7 = vld [vmem:[#allocation8 + $0xe2c] ss:$16 sps:$4 sm:$0xff]  }
 0x561   :  { %6457 = vmatpush1.bf16.msra.mxu1 %v10985_v55 }
 0x562   :  { %6506 = vmatpush1.bf16.msra.mxu0 %v10625_v49  ;;  %6458 = vmatprep.subr.bf16.mxu1 %v10989_v57  ;;  %v11009_v49 = vld [vmem:[#allocation8 + $0xe28] ss:$16 sps:$4 sm:$0xff]  }
 0x563   :  { %6507 = vmatprep.subr.bf16.mxu0 %v10628_v63  ;;  %v11013_v63 = vld [vmem:[#allocation8 + $0xe0c] ss:$16 sps:$4 sm:$0xff]  }
 0x565   :  { %6459 = vmatpush1.bf16.msra.mxu1 %v10993_v61 }
 0x566   :  { %6508 = vmatpush1.bf16.msra.mxu0 %v10633_v42  ;;  %6460 = vmatprep.subr.bf16.mxu1 %v10997_v26  ;;  %v11017_v42 = vld [vmem:[#allocation8 + $0xe08] ss:$16 sps:$4 sm:$0xff]  }
 0x567   :  { %6509 = vmatprep.subr.bf16.mxu0 %v10636_v32  ;;  %v11021_v32 = vld [vmem:[#allocation8 + $0xfec] ss:$16 sps:$4 sm:$0xff]  }
 0x569   :  { %6461 = vmatpush1.bf16.msra.mxu1 %v11001_v43 }
 0x56a   :  { %6510 = vmatpush1.bf16.msra.mxu0 %v10641_v31  ;;  %6462 = vmatprep.subr.bf16.mxu1 %v11005_v7  ;;  %v11025_v31 = vld [vmem:[#allocation8 + $0xfe8] ss:$16 sps:$4 sm:$0xff]  }
 0x56b   :  { %6511 = vmatprep.subr.bf16.mxu0 %v10644_v51  ;;  %11710 = vst [vmem:[#allocation42_spill] sm:$0xff] %v11025_v31  ;;  %v11029_v51 = vld [vmem:[#allocation8 + $0xfcc] ss:$16 sps:$4 sm:$0xff]  }
 0x56c   :  { %11711 = vst [vmem:[#allocation65_spill] sm:$0xff] %v11029_v51 }
 0x56d   :  { %6463 = vmatpush1.bf16.msra.mxu1 %v11009_v49 }
 0x56e   :  { %6512 = vmatpush1.bf16.msra.mxu0 %v10649_v15  ;;  %6464 = vmatprep.subr.bf16.mxu1 %v11013_v63  ;;  %v11033_v15 = vld [vmem:[#allocation8 + $0xfc8] ss:$16 sps:$4 sm:$0xff]  }
 0x56f   :  { %6513 = vmatprep.subr.bf16.mxu0 %v10652_v44  ;;  %11712 = vst [vmem:[#allocation49_spill] sm:$0xff] %v11033_v15  ;;  %v11037_v44 = vld [vmem:[#allocation8 + $0xfac] ss:$16 sps:$4 sm:$0xff]  }
 0x570   :  { %11713 = vst [vmem:[#allocation50_spill] sm:$0xff] %v11037_v44 }
 0x571   :  { %6465 = vmatpush1.bf16.msra.mxu1 %v11017_v42 }
 0x572   :  { %6514 = vmatpush1.bf16.msra.mxu0 %v10657_v58  ;;  %6466 = vmatprep.subr.bf16.mxu1 %v11021_v32  ;;  %v11041_v58 = vld [vmem:[#allocation8 + $0xfa8] ss:$16 sps:$4 sm:$0xff]  }
 0x573   :  { %6515 = vmatprep.subr.bf16.mxu0 %v10660_v46  ;;  %11714 = vst [vmem:[#allocation57_spill] sm:$0xff] %v11041_v58  ;;  %v11045_v46 = vld [vmem:[#allocation8 + $0xf8c] ss:$16 sps:$4 sm:$0xff]  }
 0x575   :  { %6467 = vmatpush2.bf16.msra.mxu1 %v11025_v31  ;;  %v11065_v31 = vld [vmem:[#allocation8 + $0xf68] ss:$16 sps:$4 sm:$0xff]  }
 0x576   :  { %6516 = vmatpush2.bf16.msra.mxu0 %v10665_v3  ;;  %6468 = vmatprep.subr.bf16.mxu1 %v11029_v51  ;;  %v5398_v3 = vadd.f32 %v10929_v47, %v10726_v53  ;;  %v11051_v51 = vld [vmem:[#allocation8 + $0xf88] ss:$16 sps:$4 sm:$0xff]  }
 0x577   :  { %6517 = vmatprep.subr.bf16.mxu0 %v10668_v16  ;;  %v5400_v16 = vadd.f32 %v10934_v10, %v10736_v4 }
 0x579   :  { %6469 = vmatpush2.bf16.msra.mxu1 %v11033_v15 }
 0x57a   :  { %6518 = vmatpush2.bf16.msra.mxu0 %v10673_v23  ;;  %6470 = vmatprep.subr.bf16.mxu1 %v11037_v44  ;;  %v11059_v44 = vld [vmem:[#allocation8 + $0xf6c] ss:$16 sps:$4 sm:$0xff]  }
 0x57b   :  { %6519 = vmatprep.subr.bf16.mxu0 %v10676_v56 }
 0x57d   :  { %6471 = vmatpush2.bf16.msra.mxu1 %v11041_v58  ;;  %v5438_v50 = vpop.f32.mrf.mxu1 }
 0x57e   :  { %6520 = vmatpush2.bf16.msra.mxu0 %v10681_v48  ;;  %v5439_v23 = vadd.f32 %v5438_v50, %v5398_v3  ;;  %v11056_v15 = vpop.f32.mrf.mxu0  ;;  %6472 = vmatprep.subr.bf16.mxu1 %v11045_v46  ;;  %v11069_v3 = vld [vmem:[#allocation8 + $0xf4c] ss:$16 sps:$4 sm:$0xff]  }
 0x57f   :  { %v5440_v56 = vpop.f32.mrf.mxu1  ;;  %6521 = vmatprep.subr.bf16.mxu0 %v10684_v29 }
 0x580   :  { %v5441_v53 = vadd.f32 %v5440_v56, %v5400_v16  ;;  %v11062_v47 = vpop.f32.mrf.mxu0  ;;  %v5527_v4 = vpack.c.bf16 %v5439_v23, %v5439_v23  ;;  %v11073_v16 = vld [vmem:[#allocation8 + $0xf48] ss:$16 sps:$4 sm:$0xff]  }
 0x581   :  { %6473 = vmatpush2.bf16.msra.mxu1 %v11051_v51  ;;  %v5442_v58 = vpop.f32.mrf.mxu1  ;;  %v11731_v23 = vld [vmem:[#allocation41_spill] sm:$0xff]  ;;  %v11732_v56 = vld [vmem:[#allocation23_spill] sm:$0xff] }
 0x582   :  { %v5528_v48 = vpack.c.bf16 %v5441_v53, %v5441_v53  ;;  %6522 = vmatpush2.bf16.msra.mxu0 %v10689_v9  ;;  %v5483_v10 = vpop.f32.mrf.mxu0  ;;  %6474 = vmatprep.subr.bf16.mxu1 %v11059_v44  ;;  %v11077_v9 = vld [vmem:[#allocation8 + $0xf2c] ss:$16 sps:$4 sm:$0xff]   ;;  %v11081_v58 = vld [vmem:[#allocation8 + $0xf28] ss:$16 sps:$4 sm:$0xff]  }
 0x583   :  { %v5443_v50 = vpop.f32.mrf.mxu1  ;;  %6523 = vmatprep.subr.bf16.mxu0 %v10692_v41  ;;  %v11085_v41 = vld [vmem:[#allocation8 + $0xf0c] ss:$16 sps:$4 sm:$0xff]   ;;  %v11733_v53 = vld [vmem:[#allocation43_spill] sm:$0xff] }
 0x584   :  { %8716 = vtanh.bf16 %v5528_v48  ;;  %v5484_v29 = vpop.f32.mrf.mxu0  ;;  %v11735_v48 = vld [vmem:[#allocation45_spill] sm:$0xff]  ;;  %v11736_v10 = vld [vmem:[#allocation24_spill] sm:$0xff]  ;;  %v11737_v50 = vld [vmem:[#allocation47_spill] sm:$0xff] }
 0x585   :  { %6475 = vmatpush2.bf16.msra.mxu1 %v11065_v31  ;;  %8718 = vtanh.bf16 %v5527_v4  ;;  %v11734_v4 = vld [vmem:[#allocation44_spill] sm:$0xff] }
 0x586   :  { %6524 = vmatpush2.bf16.msra.mxu0 %v10697_v13  ;;  %6476 = vmatprep.subr.bf16.mxu1 %v11069_v3  ;;  %v11089_v13 = vld [vmem:[#allocation8 + $0xf08] ss:$16 sps:$4 sm:$0xff]   ;;  %v11738_v29 = vld [vmem:[#allocation48_spill] sm:$0xff] }
 0x587   :  { %6525 = vmatprep.subr.bf16.mxu0 %v10700_v0 }
 0x589   :  { %6477 = vmatpush2.bf16.msra.mxu1 %v11073_v16 }
 0x58a   :  { %6526 = vmatpush2.bf16.msra.mxu0 %v10705_v36  ;;  %6478 = vmatprep.subr.bf16.mxu1 %v11077_v9 }
 0x58b   :  { %6527 = vmatprep.subr.bf16.mxu0 %v10708_v12  ;;  %v11715_v12 = vld [vmem:[#allocation19_spill] sm:$0xff] }
 0x58d   :  { %6479 = vmatpush2.bf16.msra.mxu1 %v11081_v58 }
 0x58e   :  { %6528 = vmatpush2.bf16.msra.mxu0 %v10713_v11  ;;  %6480 = vmatprep.subr.bf16.mxu1 %v11085_v41  ;;  %v11716_v11 = vld [vmem:[#allocation73_spill] sm:$0xff] }
 0x58f   :  { %6529 = vmatprep.subr.bf16.mxu0 %v10718_v60  ;;  %v11717_v60 = vld [vmem:[#allocation25_spill] sm:$0xff] }
 0x591   :  { %6481 = vmatpush2.bf16.msra.mxu1 %v11089_v13 }
 0x592   :  { %v8717_v0 = vpop.eup %8716  ;;  %6530 = vmatpush2.bf16.msra.mxu0 %v10729_v8  ;;  %6540 = vmatprep.subr.bf16.mxu1 %v10722_v52  ;;  %v11718_v52 = vld [vmem:[#allocation74_spill] sm:$0xff]  ;;  %v11719_v8 = vld [vmem:[#allocation36_spill] sm:$0xff] }
 0x593   :  { %6531 = vmatprep.mubr.bf16.mxu0 %v8717_v0  ;;  %6581 = vmatprep.subr.bf16.mxu0 %v10732_v45  ;;  %v11098_v36 = vpop.eup %8718  ;;  %v11720_v45 = vld [vmem:[#allocation75_spill] sm:$0xff] }
 0x594   :  { %6483 = vmatmul.mubr.bf16.vlgmr.msra.gmra.mxu1 %v10964_v54  ;;  %v11730_v54 = vld [vmem:[#allocation17_spill] sm:$0xff] }
 0x595   :  { %6541 = vmatpush1.bf16.msra.mxu1 %v10739_v1  ;;  %6532 = vmatmul.mubr.bf16.vlgmr.msra.gmra.mxu0 %v11098_v36  ;;  %v11721_v1 = vld [vmem:[#allocation27_spill] sm:$0xff] }
 0x596   :  { %6582 = vmatpush1.bf16.msra.mxu0 %v10785_v38  ;;  %6613 = vmatprep.mubr.bf16.mxu0 %v8717_v0  ;;  %v11726_v38 = vld [vmem:[#allocation21_spill] sm:$0xff] }
 0x597   :  { %6542 = vmatprep.subr.bf16.mxu1 %v10742_v24  ;;  %6583 = vmatprep.subr.bf16.mxu0 %v10787_v6  ;;  %v11722_v24 = vld [vmem:[#allocation76_spill] sm:$0xff]  ;;  %v11739_v0 = vld [vmem:[#allocation53_spill] sm:$0xff] }
 0x598   :  { %v11727_v6 = vld [vmem:[#allocation40_spill] sm:$0xff] }
 0x599   :  { %6543 = vmatpush1.bf16.msra.mxu1 %v10754_v59  ;;  %v11723_v59 = vld [vmem:[#allocation38_spill] sm:$0xff] }
 0x59a   :  { %6584 = vmatpush1.bf16.msra.mxu0 %v10799_v35  ;;  %6544 = vmatprep.subr.bf16.mxu1 %v10759_v2  ;;  %v11724_v2 = vld [vmem:[#allocation20_spill] sm:$0xff]  ;;  %v11728_v35 = vld [vmem:[#allocation22_spill] sm:$0xff] }
 0x59b   :  { %6585 = vmatprep.subr.bf16.mxu0 %v10802_v33  ;;  %v11729_v33 = vld [vmem:[#allocation33_spill] sm:$0xff] }
 0x59d   :  { %6545 = vmatpush1.bf16.msra.mxu1 %v10762_v34  ;;  %v11725_v34 = vld [vmem:[#allocation31_spill] sm:$0xff] }
 0x59e   :  { %6586 = vmatpush1.bf16.msra.mxu0 %v11715_v12  ;;  %6546 = vmatprep.subr.bf16.mxu1 %v11716_v11  ;;  %v11740_v12 = vld [vmem:[#allocation26_spill] sm:$0xff]  ;;  %v11741_v11 = vld [vmem:[#allocation51_spill] sm:$0xff] }
 0x59f   :  { %6587 = vmatprep.subr.bf16.mxu0 %v11717_v60  ;;  %v11742_v60 = vld [vmem:[#allocation52_spill] sm:$0xff] }
 0x5a1   :  { %6547 = vmatpush1.bf16.msra.mxu1 %v11718_v52  ;;  %v11743_v52 = vld [vmem:[#allocation37_spill] sm:$0xff] }
 0x5a2   :  { %6588 = vmatpush1.bf16.msra.mxu0 %v11719_v8  ;;  %6548 = vmatprep.subr.bf16.mxu1 %v11720_v45  ;;  %v11744_v8 = vld [vmem:[#allocation30_spill] sm:$0xff] }
 0x5a3   :  { %6589 = vmatprep.subr.bf16.mxu0 %v11721_v1  ;;  %v11745_v45 = vld [vmem:[#allocation62_spill] sm:$0xff]  ;;  %v11746_v1 = vld [vmem:[#allocation59_spill] sm:$0xff] }
 0x5a5   :  { %6549 = vmatpush1.bf16.msra.mxu1 %v11722_v24  ;;  %v5480_v24 = vadd.f32 %v11056_v15, %v11746_v1 }
 0x5a6   :  { %6590 = vmatpush1.bf16.msra.mxu0 %v11723_v59  ;;  %6550 = vmatprep.subr.bf16.mxu1 %v11724_v2  ;;  %v11747_v59 = vld [vmem:[#allocation56_spill] sm:$0xff] }
 0x5a7   :  { %6591 = vmatprep.subr.bf16.mxu0 %v11725_v34  ;;  %v5482_v34 = vadd.f32 %v11062_v47, %v10915_v39  ;;  %v11752_v39 = vld [vmem:[#allocation64_spill] sm:$0xff]  ;;  %v11754_v47 = vld [vmem:[#allocation46_spill] sm:$0xff] }
 0x5a9   :  { %6551 = vmatpush1.bf16.msra.mxu1 %v11726_v38 }
 0x5aa   :  { %6592 = vmatpush1.bf16.msra.mxu0 %v11727_v6  ;;  %6552 = vmatprep.subr.bf16.mxu1 %v11728_v35  ;;  %v11748_v6 = vld [vmem:[#allocation63_spill] sm:$0xff]  ;;  %v11749_v35 = vld [vmem:[#allocation32_spill] sm:$0xff] }
 0x5ab   :  { %6593 = vmatprep.subr.bf16.mxu0 %v11729_v33 }
 0x5ad   :  { %6553 = vmatpush1.bf16.msra.mxu1 %v11730_v54 }
 0x5ae   :  { %6594 = vmatpush1.bf16.msra.mxu0 %v11731_v23  ;;  %6554 = vmatprep.subr.bf16.mxu1 %v11732_v56  ;;  %v11750_v56 = vld [vmem:[#allocation60_spill] sm:$0xff] }
 0x5af   :  { %6595 = vmatprep.subr.bf16.mxu0 %v11733_v53 }
 0x5b1   :  { %6555 = vmatpush1.bf16.msra.mxu1 %v11734_v4  ;;  %v11751_v4 = vld [vmem:[#allocation34_spill] sm:$0xff] }
 0x5b2   :  { %6596 = vmatpush1.bf16.msra.mxu0 %v11735_v48  ;;  %6556 = vmatprep.subr.bf16.mxu1 %v11736_v10  ;;  %v11756_v10 = vld [vmem:[#allocation54_spill] sm:$0xff] }
 0x5b3   :  { %6597 = vmatprep.subr.bf16.mxu0 %v11737_v50 }
 0x5b5   :  { %6557 = vmatpush2.bf16.msra.mxu1 %v11738_v29  ;;  %v11760_v29 = vld [vmem:[#allocation39_spill] sm:$0xff] }
 0x5b6   :  { %6598 = vmatpush2.bf16.msra.mxu0 %v11739_v0  ;;  %6558 = vmatprep.subr.bf16.mxu1 %v11740_v12 }
 0x5b7   :  { %6599 = vmatprep.subr.bf16.mxu0 %v11741_v11 }
 0x5b9   :  { %6559 = vmatpush2.bf16.msra.mxu1 %v11742_v60 }
 0x5ba   :  { %6600 = vmatpush2.bf16.msra.mxu0 %v11743_v52  ;;  %6560 = vmatprep.subr.bf16.mxu1 %v11744_v8 }
 0x5bb   :  { %6601 = vmatprep.subr.bf16.mxu0 %v11745_v45 }
 0x5bd   :  { %6561 = vmatpush2.bf16.msra.mxu1 %v11747_v59  ;;  %v5520_v2 = vpop.f32.mrf.mxu1 }
 0x5be   :  { %v5521_v38 = vadd.f32 %v5520_v2, %v5480_v24  ;;  %6602 = vmatpush2.bf16.msra.mxu0 %v11748_v6  ;;  %6562 = vmatprep.subr.bf16.mxu1 %v11749_v35  ;;  %v11768_v24 = vld [vmem:[#allocation28_spill] sm:$0xff]  ;;  %v11769_v2 = vld [vmem:[#allocation29_spill] sm:$0xff] }
 0x5bf   :  { %v5522_v33 = vpop.f32.mrf.mxu1  ;;  %6603 = vmatprep.subr.bf16.mxu0 %v10918_v20  ;;  %v11753_v20 = vld [vmem:[#allocation18_spill] sm:$0xff] }
 0x5c0   :  { %v5523_v54 = vadd.f32 %v5522_v33, %v5482_v34  ;;  %v5529_v23 = vpack.c.bf16 %v5521_v38, %v5521_v38 }
 0x5c1   :  { %6563 = vmatpush2.bf16.msra.mxu1 %v11750_v56  ;;  %v5524_v53 = vpop.f32.mrf.mxu1 }
 0x5c2   :  { %v5530_v15 = vpack.c.bf16 %v5523_v54, %v5523_v54  ;;  %6604 = vmatpush2.bf16.msra.mxu0 %v10925_v18  ;;  %6564 = vmatprep.subr.bf16.mxu1 %v11751_v4  ;;  %v11755_v18 = vld [vmem:[#allocation35_spill] sm:$0xff] }
 0x5c3   :  { %v5525_v48 = vpop.f32.mrf.mxu1  ;;  %6605 = vmatprep.subr.bf16.mxu0 %v10932_v14  ;;  %v11757_v14 = vld [vmem:[#allocation61_spill] sm:$0xff] }
 0x5c4   :  { %8720 = vtanh.bf16 %v5530_v15 }
 0x5c5   :  { %8722 = vtanh.bf16 %v5529_v23  ;;  %6565 = vmatpush2.bf16.msra.mxu1 %v11752_v39 }
 0x5c6   :  { %6606 = vmatpush2.bf16.msra.mxu0 %v10937_v25  ;;  %6566 = vmatprep.subr.bf16.mxu1 %v11753_v20  ;;  %v11758_v25 = vld [vmem:[#allocation55_spill] sm:$0xff] }
 0x5c7   :  { %6607 = vmatprep.subr.bf16.mxu0 %v10940_v40  ;;  %v11759_v40 = vld [vmem:[#allocation66_spill] sm:$0xff] }
 0x5c9   :  { %6567 = vmatpush2.bf16.msra.mxu1 %v11754_v47 }
 0x5ca   :  { %6608 = vmatpush2.bf16.msra.mxu0 %v10943_v27  ;;  %6568 = vmatprep.subr.bf16.mxu1 %v11755_v18 }
 0x5cb   :  { %6609 = vmatprep.subr.bf16.mxu0 %v10946_v28 }
 0x5cd   :  { %6569 = vmatpush2.bf16.msra.mxu1 %v11756_v10 }
 0x5ce   :  { %6610 = vmatpush2.bf16.msra.mxu0 %v10949_v37  ;;  %6570 = vmatprep.subr.bf16.mxu1 %v11757_v14 }
 0x5cf   :  { %6611 = vmatprep.subr.bf16.mxu0 %v10952_v5 }
 0x5d1   :  { %6571 = vmatpush2.bf16.msra.mxu1 %v11758_v25 }
 0x5d2   :  { %v8721_v50 = vpop.eup %8720  ;;  %6612 = vmatpush2.bf16.msra.mxu0 %v11759_v40  ;;  %6622 = vmatprep.subr.bf16.mxu1 %v11760_v29 }
 0x5d3   :  { %v8723_v27 = vpop.eup %8722  ;;  %6572 = vmatprep.mubr.bf16.mxu1 %v8721_v50 }
 0x5d4   :  { %6573 = vmatmul.mubr.bf16.vlgmr.msra.gmra.mxu1 %v8723_v27  ;;  %v6361_v0 = vpop.f32.mrf.mxu0 }
 0x5d5   :  { %6614 = vmatmul.mubr.bf16.vlgmr.msra.gmra.mxu0 %v11098_v36  ;;  %6623 = vmatpush1.bf16.msra.mxu1 %v10959_v22  ;;  %v11762_v22 = vld [vmem:[#allocation65_spill] sm:$0xff] }
 0x5d6   :  { %6654 = vmatprep.mubr.bf16.mxu1 %v8721_v50  ;;  %v6363_v28 = vpop.f32.mrf.mxu0  ;;  %6624 = vmatprep.subr.bf16.mxu1 %v10962_v17  ;;  %v11763_v17 = vld [vmem:[#allocation49_spill] sm:$0xff] }
 0x5d8   :  { %v6365_v37 = vpop.f32.mrf.mxu0 }
 0x5d9   :  { %6625 = vmatpush1.bf16.msra.mxu1 %v10969_v62  ;;  %v11764_v62 = vld [vmem:[#allocation50_spill] sm:$0xff] }
 0x5da   :  { %v6366_v5 = vpop.f32.mrf.mxu0  ;;  %6626 = vmatprep.subr.bf16.mxu1 %v10973_v21  ;;  %v11761_v21 = vld [vmem:[#allocation42_spill] sm:$0xff] }
 0x5dd   :  { %6627 = vmatpush1.bf16.msra.mxu1 %v10977_v30  ;;  %v11765_v30 = vld [vmem:[#allocation57_spill] sm:$0xff] }
 0x5de   :  { %6628 = vmatprep.subr.bf16.mxu1 %v10981_v19  ;;  %v5665_v19 = vld [vmem:[#allocation9 + $0xc] sm:$0xf] }
 0x5df   :  { %v5678_v59 = vrot.slane %v5665_v19, %v11768_v24  ;;  %v5682_v34 = vrot.slane %v5665_v19, %v11769_v2 }
 0x5e1   :  { %6629 = vmatpush1.bf16.msra.mxu1 %v10985_v55  ;;  %v11766_v55 = vld [vmem:[#allocation15_spill] sm:$0xff] }
 0x5e2   :  { %6630 = vmatprep.subr.bf16.mxu1 %v10989_v57  ;;  %v5670_v57 = vrot.slane %v5665_v19, %v11766_v55 }
 0x5e5   :  { %6631 = vmatpush1.bf16.msra.mxu1 %v10993_v61  ;;  %v11767_v61 = vld [vmem:[#allocation16_spill] sm:$0xff] }
 0x5e6   :  { %6632 = vmatprep.subr.bf16.mxu1 %v10997_v26  ;;  %v5674_v26 = vrot.slane %v5665_v19, %v11767_v61 }
 0x5e9   :  { %6633 = vmatpush1.bf16.msra.mxu1 %v11001_v43  ;;  %v6362_v43 = vadd.f32 %v6361_v0, %v5670_v57 }
 0x5ea   :  { %6634 = vmatprep.subr.bf16.mxu1 %v11005_v7 }
 0x5ed   :  { %6635 = vmatpush1.bf16.msra.mxu1 %v11009_v49 }
 0x5ee   :  { %6636 = vmatprep.subr.bf16.mxu1 %v11013_v63  ;;  %v6364_v63 = vadd.f32 %v6363_v28, %v5674_v26 }
 0x5f1   :  { %6637 = vmatpush1.bf16.msra.mxu1 %v11017_v42 }
 0x5f2   :  { %6638 = vmatprep.subr.bf16.mxu1 %v11021_v32 }
 0x5f5   :  { %6639 = vmatpush2.bf16.msra.mxu1 %v11761_v21 }
 0x5f6   :  { %6640 = vmatprep.subr.bf16.mxu1 %v11762_v22 }
 0x5f9   :  { %6641 = vmatpush2.bf16.msra.mxu1 %v11763_v17 }
 0x5fa   :  { %6642 = vmatprep.subr.bf16.mxu1 %v11764_v62 }
 0x5fd   :  { %6643 = vmatpush2.bf16.msra.mxu1 %v11765_v30 }
 0x5fe   :  { %6644 = vmatprep.subr.bf16.mxu1 %v11045_v46 }
 0x601   :  { %6645 = vmatpush2.bf16.msra.mxu1 %v11051_v51 }
 0x602   :  { %6646 = vmatprep.subr.bf16.mxu1 %v11059_v44 }
 0x605   :  { %6647 = vmatpush2.bf16.msra.mxu1 %v11065_v31 }
 0x606   :  { %6648 = vmatprep.subr.bf16.mxu1 %v11069_v3 }
 0x609   :  { %6649 = vmatpush2.bf16.msra.mxu1 %v11073_v16 }
 0x60a   :  { %6650 = vmatprep.subr.bf16.mxu1 %v11077_v9 }
 0x60d   :  { %6651 = vmatpush2.bf16.msra.mxu1 %v11081_v58 }
 0x60e   :  { %6652 = vmatprep.subr.bf16.mxu1 %v11085_v41  ;;  %v6671_v41 = vld [vmem:[#allocation11] sm:$0xf] }
 0x60f   :  { %v6680_v12 = vrot.slane %v6671_v41, %v11766_v55  ;;  %v6684_v11 = vrot.slane %v6671_v41, %v11767_v61  ;;  %v6688_v18 = vrot.slane %v6671_v41, %v11768_v24  ;;  %v6692_v25 = vrot.slane %v6671_v41, %v11769_v2 }
 0x611   :  { %6653 = vmatpush2.bf16.msra.mxu1 %v11089_v13 }
 0x614   :  { %6655 = vmatmul.mubr.bf16.vlgmr.msra.gmra.mxu1 %v8723_v27  ;;  %v6402_v7 = vpop.f32.mrf.mxu1  ;;  %v6443_v49 = vpop.f32.mrf.mxu0 }
 0x615   :  { %v6403_v42 = vadd.f32 %v6402_v7, %v6362_v43  ;;  %v6444_v38 = vadd.f32 %v6443_v49, %v5678_v59 }
 0x616   :  { %v6404_v32 = vpop.f32.mrf.mxu1  ;;  %v6445_v31 = vpop.f32.mrf.mxu0 }
 0x617   :  { %v6491_v51 = vpack.c.bf16 %v6403_v42, %v6403_v42  ;;  %v6405_v44 = vadd.f32 %v6404_v32, %v6364_v63  ;;  %v6446_v35 = vadd.f32 %v6445_v31, %v5682_v34 }
 0x618   :  { %v6406_v46 = vpop.f32.mrf.mxu1  ;;  %v6447_v3 = vpop.f32.mrf.mxu0 }
 0x619   :  { %8724 = vtanh.bf16 %v6491_v51  ;;  %v6492_v16 = vpack.c.bf16 %v6405_v44, %v6405_v44 }
 0x61a   :  { %v6407_v9 = vpop.f32.mrf.mxu1  ;;  %v6448_v58 = vpop.f32.mrf.mxu0 }
 0x61b   :  { %8726 = vtanh.bf16 %v6492_v16 }
 0x627   :  { %v8725_v36 = vpop.eup %8724 }
 0x628   :  { %v6672_v13 = vunpack.c.l.bf16 %v8725_v36 }
 0x629   :  { %v8727_v60 = vpop.eup %8726 }
 0x62a   :  { %v6673_v52 = vunpack.c.l.bf16 %v8727_v60  ;;  %v6697_v8 = vmul.f32 %v6680_v12, %v6672_v13 }
 0x62c   :  { %v6698_v45 = vmul.f32 %v6684_v11, %v6673_v52 }
 0x62e   :  { %v6701_v1 = vadd.f32 %v6698_v45, %v6697_v8 }
 0x654   :  { %v6484_v6 = vpop.f32.mrf.mxu1 }
 0x655   :  { %v6485_v33 = vadd.f32 %v6484_v6, %v6444_v38  ;;  %v6533_v54 = vpop.f32.mrf.mxu0 }
 0x656   :  { %v6486_v23 = vpop.f32.mrf.mxu1  ;;  %v6534_v37 = vadd.f32 %v6533_v54, %v5670_v57 }
 0x657   :  { %v6493_v56 = vpack.c.bf16 %v6485_v33, %v6485_v33  ;;  %v6487_v53 = vadd.f32 %v6486_v23, %v6446_v35  ;;  %v6535_v15 = vpop.f32.mrf.mxu0 }
 0x658   :  { %v6488_v4 = vpop.f32.mrf.mxu1  ;;  %v6536_v21 = vadd.f32 %v6535_v15, %v5674_v26 }
 0x659   :  { %8728 = vtanh.bf16 %v6493_v56  ;;  %v6494_v48 = vpack.c.bf16 %v6487_v53, %v6487_v53  ;;  %v6537_v39 = vpop.f32.mrf.mxu0 }
 0x65a   :  { %v6489_v20 = vpop.f32.mrf.mxu1 }
 0x65b   :  { %8730 = vtanh.bf16 %v6494_v48  ;;  %v6538_v47 = vpop.f32.mrf.mxu0 }
 0x667   :  { %v8729_v10 = vpop.eup %8728 }
 0x668   :  { %v6674_v14 = vunpack.c.l.bf16 %v8729_v10 }
 0x669   :  { %v8731_v50 = vpop.eup %8730 }
 0x66a   :  { %v6675_v40 = vunpack.c.l.bf16 %v8731_v50  ;;  %v6699_v29 = vmul.f32 %v6688_v18, %v6674_v14 }
 0x66c   :  { %v6700_v27 = vmul.f32 %v6692_v25, %v6675_v40  ;;  %v6702_v0 = vadd.f32 %v6701_v1, %v6699_v29 }
 0x66e   :  { %v6703_v28 = vadd.f32 %v6702_v0, %v6700_v27 }
 0x670   :  { %6704 = vadd.xlane.f32.xlu0 %v6703_v28 }
 0x694   :  { %v6574_v5 = vpop.f32.mrf.mxu1 }
 0x695   :  { %v6575_v22 = vadd.f32 %v6574_v5, %v6534_v37  ;;  %v6615_v17 = vpop.f32.mrf.mxu0 }
 0x696   :  { %v6576_v62 = vpop.f32.mrf.mxu1  ;;  %v6616_v46 = vadd.f32 %v6615_v17, %v5678_v59  ;;  %v7514_v59 = vld [vmem:[#allocation3] ss:$0 sm:$0xff] }
 0x697   :  { %v6663_v30 = vpack.c.bf16 %v6575_v22, %v6575_v22  ;;  %v6577_v19 = vadd.f32 %v6576_v62, %v6536_v21  ;;  %v6617_v55 = vpop.f32.mrf.mxu0 }
 0x698   :  { %v6578_v61 = vpop.f32.mrf.mxu1  ;;  %v6618_v16 = vadd.f32 %v6617_v55, %v5682_v34 }
 0x699   :  { %8732 = vtanh.bf16 %v6663_v30  ;;  %v6664_v43 = vpack.c.bf16 %v6577_v19, %v6577_v19  ;;  %v6619_v7 = vpop.f32.mrf.mxu0 }
 0x69a   :  { %v6579_v49 = vpop.f32.mrf.mxu1 }
 0x69b   :  { %8734 = vtanh.bf16 %v6664_v43  ;;  %v6620_v63 = vpop.f32.mrf.mxu0 }
 0x6a7   :  { %v8733_v42 = vpop.eup %8732 }
 0x6a8   :  { %v6714_v32 = vunpack.c.l.bf16 %v8733_v42 }
 0x6a9   :  { %v8735_v31 = vpop.eup %8734 }
 0x6aa   :  { %v6715_v51 = vunpack.c.l.bf16 %v8735_v31  ;;  %v6718_v57 = vmul.f32 %v6714_v32, %v6680_v12 }
 0x6ac   :  { %v6719_v44 = vmul.f32 %v6715_v51, %v6684_v11 }
 0x6ae   :  { %v6722_v26 = vadd.f32 %v6719_v44, %v6718_v57 }
 0x6d4   :  { %v6656_v3 = vpop.f32.mrf.mxu1 }
 0x6d5   :  { %v6657_v9 = vadd.f32 %v6656_v3, %v6616_v46 }
 0x6d6   :  { %v6658_v58 = vpop.f32.mrf.mxu1 }
 0x6d7   :  { %v6665_v41 = vpack.c.bf16 %v6657_v9, %v6657_v9  ;;  %v6659_v36 = vadd.f32 %v6658_v58, %v6618_v16 }
 0x6d8   :  { %v6660_v13 = vpop.f32.mrf.mxu1 }
 0x6d9   :  { %8736 = vtanh.bf16 %v6665_v41  ;;  %v6666_v60 = vpack.c.bf16 %v6659_v36, %v6659_v36 }
 0x6da   :  { %v6661_v52 = vpop.f32.mrf.mxu1 }
 0x6db   :  { %8738 = vtanh.bf16 %v6666_v60 }
 0x6e7   :  { %v8737_v8 = vpop.eup %8736 }
 0x6e8   :  { %v6716_v45 = vunpack.c.l.bf16 %v8737_v8 }
 0x6e9   :  { %v8739_v1 = vpop.eup %8738 }
 0x6ea   :  { %v6717_v24 = vunpack.c.l.bf16 %v8739_v1  ;;  %v6720_v2 = vmul.f32 %v6716_v45, %v6688_v18 }
 0x6ec   :  { %v6721_v12 = vmul.f32 %v6717_v24, %v6692_v25  ;;  %v6723_v11 = vadd.f32 %v6722_v26, %v6720_v2 }
 0x6ee   :  { %v6724_v38 = vadd.f32 %v6723_v11, %v6721_v12 }
 0x6f0   :  { %6725 = vadd.xlane.f32.xlu0 %v6724_v38 }
 0x6f9   :  { %v6705_v34 = vpop.xlane.xlu0 %6704 }
 0x6fa   :  { %v6713_v6 = vadd.f32 %v7514_v59, %v6705_v34 }
 0x6fc   :  { %6729 = vst.msk [vmem:[%s11222_s7] sm:$0xff] %vm6728_vm8, %v6713_v6 }
 0x779   :  { %v6726_v35 = vpop.xlane.xlu0 %6725 }
 0x77a   :  { %v6727_v33 = vadd.f32 %v7514_v59, %v6726_v35 }
 0x77c   :  { %6730 = vst.msk [vmem:[%s11222_s7 + $0x8] sm:$0xff] %vm6728_vm8, %v6727_v33 }
 0x77d   :  { %6735 = vsyncpa [#allocation5], 1 }
 0x77e   :  { %6736 = vsyncpa [#allocation7], 1 }
 0x77f   :  { %6737 = vsyncpa [#allocation10], 1 }

</bundles_post_ra>
